<compile_context>
chip_gen: v7x
topology: tpu7x:2x2x1
jax: 0.10.0
libtpu: 0.0.40
codegen_flags: <defaults>
</compile_context>

<pallas_src>
import jax
import jax.numpy as jnp
from jax import lax
from jax.experimental import pallas as pl
from jax.experimental.pallas import tpu as pltpu

# ----------------------- small synthetic configuration -----------------------
N_V = 256                    # n_token (vocab), scaled down
CUTOFFS = [128, 192, 224]    # scaled-down analogue of [10000, 20000, 40000, 60000, 100000]
DIV_VAL = 2
DIV_FREQ = 2
N_E = 128                    # embedding dim (cluster 0), lane-aligned
N_PROJ = 32                  # args.n_proj (SRU / ProjectedLinear bottleneck)
N_D = 128                    # model dim (d_proj), lane-aligned
DEPTH = 2
HIGHWAY_BIAS = -3.0          # args.bias (SRU reset/highway gate bias)
L, B = 8, 2                  # sequence length, batch

N_CLUSTERS = len(CUTOFFS)    # number of tail clusters


def _cutoff_ends():
    return [0] + CUTOFFS + [N_V]


# ------------------------------- fused kernel ---------------------------------

def _fused_forward_kernel(*refs):
    """Single invocation: the full (L*B) token slab stays in VMEM end-to-end."""
    f32, bf16 = jnp.float32, jnp.bfloat16
    ce = _cutoff_ends()
    D = N_D

    it = iter(refs)
    x_ref = next(it)                                   # (L*B, 1) int32 token ids, row = t*B + b
    y_ref = next(it)                                   # (L*B, 1) int32 targets
    c0_ref = next(it)                                  # (DEPTH, B, D) f32 initial states
    head_w_ref = next(it)                              # (V0 + n_clusters, d_emb0) bf16
    head_b_ref = next(it)                              # (1, V0 + n_clusters) f32
    proj_refs = [next(it) for _ in range(N_CLUSTERS + 1)]   # (D, d_emb_i) bf16 (tied emb/out proj)
    tail_w_refs = [next(it) for _ in range(N_CLUSTERS)]     # (V_i, d_emb_i) bf16 (tied emb/out weight)
    tail_b_refs = [next(it) for _ in range(N_CLUSTERS)]     # (1, V_i) f32
    rnn_refs = [tuple(next(it) for _ in range(3)) for _ in range(DEPTH)]  # w_fused, v, bias
    loss_ref = next(it)                                # (L*B, 1) f32
    hid_ref = next(it)                                 # (DEPTH, B, D) f32
    h_scr = next(it)                                   # (L*B, D) f32 VMEM scratch (SRU h rows)

    LB = x_ref.shape[0]                                # L*B rows (time-major: row = t*B + b)
    Bt = c0_ref.shape[1]                               # batch slab width for the recurrence
    n_steps = LB // Bt

    ids = x_ref[...]                                   # (L*B, 1) int32
    tgt = y_ref[...]                                   # (L*B, 1) int32

    # Load tied weights once (reused for both embedding and output roles).
    head_w = head_w_ref[...]
    head_b = head_b_ref[...]
    projs = [r[...] for r in proj_refs]
    tails_w = [r[...] for r in tail_w_refs]
    tails_b = [r[...] for r in tail_b_refs]

    V0 = ce[1]
    n_head = V0 + N_CLUSTERS

    # ---- AdaptiveEmbedding: per-cluster one-hot gather (MXU) + tied projection, batched rows ----
    # TODO(synk): at real wt103 vocab replace the one-hot matmul with a scalar-prefetch/DMA row
    # gather; the dense one-hot is only sensible at this toy V.
    emb = jnp.zeros((LB, D), f32)
    for i in range(N_CLUSTERS + 1):
        lo, hi = ce[i], ce[i + 1]
        Vi = hi - lo
        w_i = head_w[0:V0, :] if i == 0 else tails_w[i - 1]          # (Vi, d_emb_i) bf16
        # one-hot rows are all-zero for tokens outside [lo, hi) -> masked accumulate for free
        oh = (lax.broadcasted_iota(jnp.int32, (LB, Vi), 1) == (ids - lo)).astype(bf16)
        e_i = jnp.dot(oh, w_i, preferred_element_type=f32)           # (L*B, d_emb_i)
        # tied emb_proj: e_i @ proj_i.T  (contract d_emb dims; no transposed weight copy)
        emb = emb + lax.dot_general(
            e_i.astype(bf16), projs[i],
            dimension_numbers=(((1,), (1,)), ((), ())),
            preferred_element_type=f32)
    h = emb * (float(D) ** 0.5)        # emb_scale = d_proj ** 0.5; dropout == identity (eval)

    # ---- SRU stack: pre-folded ProjectedLinear (one MXU pass) + unrolled recurrence on (B,D) slabs ----
    for layer in range(DEPTH):
        w_ref, v_ref, b_ref = rnn_refs[layer]
        u = jnp.dot(h.astype(bf16), w_ref[...], preferred_element_type=f32)   # (L*B, 3D)
        v = v_ref[...]                                   # (2, D): weight_c (forget, reset)
        bias = b_ref[...]                                # (2, D): (forget bias, reset/highway bias)
        u0 = u[:, 0:D]                                   # candidate
        u1 = u[:, D:2 * D] + bias[0:1, :]                # c-independent gate terms hoisted
        u2 = u[:, 2 * D:3 * D] + bias[1:2, :]
        vf, vr = v[0:1, :], v[1:2, :]
        c = c0_ref[layer]                                # (B, D) state slab
        # static unroll; TODO(synk): switch to lax.fori_loop(..., unroll=True) at real L
        for t in range(n_steps):
            sl = slice(t * Bt, (t + 1) * Bt)
            f = jax.nn.sigmoid(u1[sl, :] + vf * c)
            r = jax.nn.sigmoid(u2[sl, :] + vr * c)
            c = f * c + (1.0 - f) * u0[sl, :]
            h_scr[sl, :] = r * c + (1.0 - r) * h[sl, :]  # highway w/ layer input; row store to scratch
        hid_ref[layer] = c                               # final state of this layer
        h = h_scr[...]                                   # becomes next layer's input / head input

    # ---- AdaptiveLogSoftmax: per-token target NLL only (no (N, V) writeback) ----
    h_bf = h.astype(bf16)

    # head: logits = (h @ proj0) @ head_w.T + head_b
    z0 = jnp.dot(h_bf, projs[0], preferred_element_type=f32)                    # (L*B, d_emb0)
    head_logits = lax.dot_general(
        z0.astype(bf16), head_w,
        dimension_numbers=(((1,), (1,)), ((), ())),
        preferred_element_type=f32) + head_b                                    # (L*B, n_head)
    m = jnp.max(head_logits, axis=-1, keepdims=True)
    head_lp = head_logits - (m + jnp.log(
        jnp.sum(jnp.exp(head_logits - m), axis=-1, keepdims=True)))

    lane0 = lax.broadcasted_iota(jnp.int32, (LB, n_head), 1)
    lp_head_tgt = jnp.sum(jnp.where(lane0 == tgt, head_lp, 0.0),
                          axis=-1, keepdims=True)                               # (L*B, 1)
    nll = jnp.where(tgt < V0, -lp_head_tgt, jnp.zeros_like(lp_head_tgt))

    # tail clusters (dense at toy size)
    # TODO(synk): at real scale gate each cluster on target membership (scalar prefetch + pl.when)
    # and tile the logits over the vocab with an online-LSE accumulator.
    for i in range(1, N_CLUSTERS + 1):
        lo, hi = ce[i], ce[i + 1]
        Vi = hi - lo
        zi = jnp.dot(h_bf, projs[i], preferred_element_type=f32)                # (L*B, d_emb_i)
        logits_i = lax.dot_general(
            zi.astype(bf16), tails_w[i - 1],
            dimension_numbers=(((1,), (1,)), ((), ())),
            preferred_element_type=f32) + tails_b[i - 1]                        # (L*B, Vi)
        mi = jnp.max(logits_i, axis=-1, keepdims=True)
        lp_i = logits_i - (mi + jnp.log(
            jnp.sum(jnp.exp(logits_i - mi), axis=-1, keepdims=True)))
        lane_i = lax.broadcasted_iota(jnp.int32, (LB, Vi), 1)
        lp_tail_tgt = jnp.sum(jnp.where(lane_i == (tgt - lo), lp_i, 0.0),
                              axis=-1, keepdims=True)                           # (L*B, 1)
        cluster_lp = head_lp[:, n_head - i:n_head - i + 1]   # transformer-xl head_logprob[:, -i]
        mask = (tgt >= lo) & (tgt < hi)
        nll = jnp.where(mask, -(cluster_lp + lp_tail_tgt), nll)

    # TODO(synk): at real sequence lengths emit the loss lane-dense (last dim a multiple of 128)
    # instead of a trailing-1 column; at L*B=16 the single masked store is negligible.
    loss_ref[...] = nll


# ------------------------------- parameters -----------------------------------

def init_params(key):
    """Mirror Model.init_weights: dim>1 uniform(-0.03,0.03), 1-dim zero; tied weights."""
    ce = _cutoff_ends()

    def uni(k, shape):
        return jax.random.uniform(k, shape, jnp.float32, -0.03, 0.03)

    keys = iter(jax.random.split(key, 64))

    emb_w, projs, out_b = [], [], []
    for i in range(len(ce) - 1):
        lo, hi = ce[i], ce[i + 1]
        d_emb_i = N_E // (DIV_VAL ** (i // DIV_FREQ))
        emb_w.append(uni(next(keys), (hi - lo, d_emb_i)))   # tied: emb_layers[i].weight == out_layers[i].weight
        projs.append(uni(next(keys), (N_D, d_emb_i)))       # tied: emb_projs[i] == out_projs[i]
        out_b.append(jnp.zeros((hi - lo,), jnp.float32))    # 1-dim params zero-initialised

    cluster_w = uni(next(keys), (N_CLUSTERS, N_E))
    cluster_b = jnp.zeros((N_CLUSTERS,), jnp.float32)

    rnn = []
    for _ in range(DEPTH):
        rnn.append({
            "w1": uni(next(keys), (N_D, N_PROJ)),            # ProjectedLinear first factor
            "w2": uni(next(keys), (N_PROJ, 3 * N_D)),        # ProjectedLinear second factor (-> 3*d)
            "v": uni(next(keys), (2, N_D)),                  # SRU weight_c (forget, reset)
            "b": jnp.concatenate(                            # (forget bias, reset/highway bias)
                [jnp.zeros((1, N_D), jnp.float32),
                 jnp.full((1, N_D), HIGHWAY_BIAS, jnp.float32)], axis=0),
        })

    return {"emb_w": emb_w, "projs": projs, "out_b": out_b,
            "cluster_w": cluster_w, "cluster_b": cluster_b, "rnn": rnn}


def prepare_params(params):
    """One-time (eval-static) prep hoisted out of forward: head concat, bf16 casts,
    and folding the ProjectedLinear W1 @ W2 into one (D, 3D) matrix per SRU layer."""
    bf16 = jnp.bfloat16
    head_w = jnp.concatenate([params["emb_w"][0], params["cluster_w"]], axis=0).astype(bf16)
    head_b = jnp.concatenate([params["out_b"][0], params["cluster_b"]], axis=0).reshape(1, -1)
    return {
        "head_w": head_w,
        "head_b": head_b,
        "projs": [p.astype(bf16) for p in params["projs"]],
        "tail_w": [w.astype(bf16) for w in params["emb_w"][1:]],
        "tail_b": [b.reshape(1, -1) for b in params["out_b"][1:]],
        "rnn": [{"w": jnp.dot(r["w1"], r["w2"]).astype(bf16),   # fused ProjectedLinear factor
                 "v": r["v"], "b": r["b"]} for r in params["rnn"]],
    }


# --------------------------------- forward ------------------------------------

def forward(prep, x, y, hidden):
    """x, y: (L, B) int32; hidden: (DEPTH, B, N_D) f32 -> (loss (L, B), hidden (DEPTH, B, N_D))."""
    Lx, Bx = x.shape

    # time-major row flattening (row = t*B + b), matching output.view(-1, d) ordering
    x_in = x.reshape(Lx * Bx, 1)
    y_in = y.reshape(Lx * Bx, 1)

    inputs = [x_in, y_in, hidden, prep["head_w"], prep["head_b"]]
    inputs += prep["projs"]
    inputs += prep["tail_w"]
    inputs += prep["tail_b"]
    for r in prep["rnn"]:
        inputs += [r["w"], r["v"], r["b"]]

    out_shape = (
        jax.ShapeDtypeStruct((Lx * Bx, 1), jnp.float32),
        jax.ShapeDtypeStruct((DEPTH, Bx, N_D), jnp.float32),
    )

    # No grid: one kernel invocation processes the full batch (best for single-TC v5e/v6e).
    # TODO(synk): on v7x, split the batch into two "parallel" grid tiles to use both TCs.
    loss_flat, hidden_out = pl.pallas_call(
        _fused_forward_kernel,
        out_shape=out_shape,
        scratch_shapes=[pltpu.VMEM((Lx * Bx, N_D), jnp.float32)],
    )(*inputs)

    loss = loss_flat.reshape(Lx, Bx)                      # matches loss.view(y.size(0), -1)
    return loss, hidden_out


# ----------------------------------- main --------------------------------------

if __name__ == "__main__":
    key = jax.random.PRNGKey(0)
    kp, kx, ky = jax.random.split(key, 3)
    params = init_params(kp)
    prep = prepare_params(params)

    x = jax.random.randint(kx, (L, B), 0, N_V, dtype=jnp.int32)
    y = jax.random.randint(ky, (L, B), 0, N_V, dtype=jnp.int32)
    hidden = jnp.zeros((DEPTH, B, N_D), jnp.float32)      # Model.init_hidden

    loss, hidden_out = jax.jit(forward)(prep, x, y, hidden)
    jax.block_until_ready((loss, hidden_out))

    assert loss.shape == (L, B) and hidden_out.shape == (DEPTH, B, N_D)
    assert bool(jnp.all(jnp.isfinite(loss)))
    print("KERNEL_OK")
</pallas_src>

<mosaic_0001>
module attributes {stable_mosaic.version = 11 : i64} {
  func.func @_fused_forward_kernel(%arg0: memref<16x1xi32, #tpu.memory_space<vmem>>, %arg1: memref<16x1xi32, #tpu.memory_space<vmem>>, %arg2: memref<2x2x128xf32, #tpu.memory_space<vmem>>, %arg3: memref<131x128xbf16, #tpu.memory_space<vmem>>, %arg4: memref<1x131xf32, #tpu.memory_space<vmem>>, %arg5: memref<128x128xbf16, #tpu.memory_space<vmem>>, %arg6: memref<128x128xbf16, #tpu.memory_space<vmem>>, %arg7: memref<128x64xbf16, #tpu.memory_space<vmem>>, %arg8: memref<128x64xbf16, #tpu.memory_space<vmem>>, %arg9: memref<64x128xbf16, #tpu.memory_space<vmem>>, %arg10: memref<32x64xbf16, #tpu.memory_space<vmem>>, %arg11: memref<32x64xbf16, #tpu.memory_space<vmem>>, %arg12: memref<1x64xf32, #tpu.memory_space<vmem>>, %arg13: memref<1x32xf32, #tpu.memory_space<vmem>>, %arg14: memref<1x32xf32, #tpu.memory_space<vmem>>, %arg15: memref<128x384xbf16, #tpu.memory_space<vmem>>, %arg16: memref<2x128xf32, #tpu.memory_space<vmem>>, %arg17: memref<2x128xf32, #tpu.memory_space<vmem>>, %arg18: memref<128x384xbf16, #tpu.memory_space<vmem>>, %arg19: memref<2x128xf32, #tpu.memory_space<vmem>>, %arg20: memref<2x128xf32, #tpu.memory_space<vmem>>, %arg21: memref<16x1xf32, #tpu.memory_space<vmem>>, %arg22: memref<2x2x128xf32, #tpu.memory_space<vmem>>, %arg23: memref<16x128xf32, #tpu.memory_space<vmem>>) attributes {dimension_semantics = [], scalar_prefetch = 0 : i64, scratch_operands = 1 : i64, tpu.core_type = #tpu.core_type<tc>} {
    %c0 = arith.constant 0 : index
    %c0_0 = arith.constant 0 : index
    %0 = vector.load %arg0[%c0, %c0_0] : memref<16x1xi32, #tpu.memory_space<vmem>>, vector<16x1xi32>
    %c0_1 = arith.constant 0 : index
    %c0_2 = arith.constant 0 : index
    %1 = vector.load %arg1[%c0_1, %c0_2] : memref<16x1xi32, #tpu.memory_space<vmem>>, vector<16x1xi32>
    %c0_3 = arith.constant 0 : index
    %c0_4 = arith.constant 0 : index
    %2 = vector.load %arg3[%c0_3, %c0_4] : memref<131x128xbf16, #tpu.memory_space<vmem>>, vector<131x128xbf16>
    %c0_5 = arith.constant 0 : index
    %c0_6 = arith.constant 0 : index
    %3 = vector.load %arg4[%c0_5, %c0_6] : memref<1x131xf32, #tpu.memory_space<vmem>>, vector<1x131xf32>
    %c0_7 = arith.constant 0 : index
    %c0_8 = arith.constant 0 : index
    %4 = vector.load %arg5[%c0_7, %c0_8] : memref<128x128xbf16, #tpu.memory_space<vmem>>, vector<128x128xbf16>
    %c0_9 = arith.constant 0 : index
    %c0_10 = arith.constant 0 : index
    %5 = vector.load %arg6[%c0_9, %c0_10] : memref<128x128xbf16, #tpu.memory_space<vmem>>, vector<128x128xbf16>
    %c0_11 = arith.constant 0 : index
    %c0_12 = arith.constant 0 : index
    %6 = vector.load %arg7[%c0_11, %c0_12] : memref<128x64xbf16, #tpu.memory_space<vmem>>, vector<128x64xbf16>
    %c0_13 = arith.constant 0 : index
    %c0_14 = arith.constant 0 : index
    %7 = vector.load %arg8[%c0_13, %c0_14] : memref<128x64xbf16, #tpu.memory_space<vmem>>, vector<128x64xbf16>
    %c0_15 = arith.constant 0 : index
    %c0_16 = arith.constant 0 : index
    %8 = vector.load %arg9[%c0_15, %c0_16] : memref<64x128xbf16, #tpu.memory_space<vmem>>, vector<64x128xbf16>
    %c0_17 = arith.constant 0 : index
    %c0_18 = arith.constant 0 : index
    %9 = vector.load %arg10[%c0_17, %c0_18] : memref<32x64xbf16, #tpu.memory_space<vmem>>, vector<32x64xbf16>
    %c0_19 = arith.constant 0 : index
    %c0_20 = arith.constant 0 : index
    %10 = vector.load %arg11[%c0_19, %c0_20] : memref<32x64xbf16, #tpu.memory_space<vmem>>, vector<32x64xbf16>
    %c0_21 = arith.constant 0 : index
    %c0_22 = arith.constant 0 : index
    %11 = vector.load %arg12[%c0_21, %c0_22] : memref<1x64xf32, #tpu.memory_space<vmem>>, vector<1x64xf32>
    %c0_23 = arith.constant 0 : index
    %c0_24 = arith.constant 0 : index
    %12 = vector.load %arg13[%c0_23, %c0_24] : memref<1x32xf32, #tpu.memory_space<vmem>>, vector<1x32xf32>
    %c0_25 = arith.constant 0 : index
    %c0_26 = arith.constant 0 : index
    %13 = vector.load %arg14[%c0_25, %c0_26] : memref<1x32xf32, #tpu.memory_space<vmem>>, vector<1x32xf32>
    %cst = arith.constant 0.000000e+00 : f32
    %14 = vector.broadcast %cst : f32 to vector<16x128xf32>
    %15 = vector.extract_strided_slice %2 {offsets = [0, 0], sizes = [128, 128], strides = [1, 1]} : vector<131x128xbf16> to vector<128x128xbf16>
    %16 = tpu.iota {dimensions = array<i32: 1>} : vector<16x128xi32>
    %c0_i32 = arith.constant 0 : i32
    %17 = vector.broadcast %c0_i32 : i32 to vector<16x1xi32>
    %18 = arith.subi %0, %17 : vector<16x1xi32>
    %19 = vector.broadcast %18 : vector<16x1xi32> to vector<16x128xi32>
    %20 = arith.cmpi eq, %16, %19 : vector<16x128xi32>
    %21 = arith.extui %20 : vector<16x128xi1> to vector<16x128xi32>
    %22 = arith.sitofp %21 : vector<16x128xi32> to vector<16x128xf32>
    %23 = arith.truncf %22 : vector<16x128xf32> to vector<16x128xbf16>
    %cst_27 = arith.constant dense<0.000000e+00> : vector<16x128xf32>
    %24 = tpu.matmul %23, %15, %cst_27 {dimension_numbers = #tpu.dot_dimension_numbers<[1], [0], [0], [1], [0, 0, 1, 1], [], []>} : vector<16x128xbf16>, vector<128x128xbf16>, vector<16x128xf32> -> vector<16x128xf32>
    %25 = arith.truncf %24 : vector<16x128xf32> to vector<16x128xbf16>
    %cst_28 = arith.constant dense<0.000000e+00> : vector<16x128xf32>
    %26 = tpu.matmul %25, %4, %cst_28 {dimension_numbers = #tpu.dot_dimension_numbers<[1], [1], [0], [0], [0, 0, 1, 0], [], []>} : vector<16x128xbf16>, vector<128x128xbf16>, vector<16x128xf32> -> vector<16x128xf32>
    %27 = arith.addf %14, %26 : vector<16x128xf32>
    %28 = tpu.iota {dimensions = array<i32: 1>} : vector<16x64xi32>
    %c128_i32 = arith.constant 128 : i32
    %29 = vector.broadcast %c128_i32 : i32 to vector<16x1xi32>
    %30 = arith.subi %0, %29 : vector<16x1xi32>
    %31 = vector.broadcast %30 : vector<16x1xi32> to vector<16x64xi32>
    %32 = arith.cmpi eq, %28, %31 : vector<16x64xi32>
    %33 = arith.extui %32 : vector<16x64xi1> to vector<16x64xi32>
    %34 = arith.sitofp %33 : vector<16x64xi32> to vector<16x64xf32>
    %35 = arith.truncf %34 : vector<16x64xf32> to vector<16x64xbf16>
    %cst_29 = arith.constant dense<0.000000e+00> : vector<16x128xf32>
    %36 = tpu.matmul %35, %8, %cst_29 {dimension_numbers = #tpu.dot_dimension_numbers<[1], [0], [0], [1], [0, 0, 1, 1], [], []>} : vector<16x64xbf16>, vector<64x128xbf16>, vector<16x128xf32> -> vector<16x128xf32>
    %37 = arith.truncf %36 : vector<16x128xf32> to vector<16x128xbf16>
    %cst_30 = arith.constant dense<0.000000e+00> : vector<16x128xf32>
    %38 = tpu.matmul %37, %5, %cst_30 {dimension_numbers = #tpu.dot_dimension_numbers<[1], [1], [0], [0], [0, 0, 1, 0], [], []>} : vector<16x128xbf16>, vector<128x128xbf16>, vector<16x128xf32> -> vector<16x128xf32>
    %39 = arith.addf %27, %38 : vector<16x128xf32>
    %40 = tpu.iota {dimensions = array<i32: 1>} : vector<16x32xi32>
    %c192_i32 = arith.constant 192 : i32
    %41 = vector.broadcast %c192_i32 : i32 to vector<16x1xi32>
    %42 = arith.subi %0, %41 : vector<16x1xi32>
    %43 = vector.broadcast %42 : vector<16x1xi32> to vector<16x32xi32>
    %44 = arith.cmpi eq, %40, %43 : vector<16x32xi32>
    %45 = arith.extui %44 : vector<16x32xi1> to vector<16x32xi32>
    %46 = arith.sitofp %45 : vector<16x32xi32> to vector<16x32xf32>
    %47 = arith.truncf %46 : vector<16x32xf32> to vector<16x32xbf16>
    %cst_31 = arith.constant dense<0.000000e+00> : vector<16x64xf32>
    %48 = tpu.matmul %47, %9, %cst_31 {dimension_numbers = #tpu.dot_dimension_numbers<[1], [0], [0], [1], [0, 0, 1, 1], [], []>} : vector<16x32xbf16>, vector<32x64xbf16>, vector<16x64xf32> -> vector<16x64xf32>
    %49 = arith.truncf %48 : vector<16x64xf32> to vector<16x64xbf16>
    %cst_32 = arith.constant dense<0.000000e+00> : vector<16x128xf32>
    %50 = tpu.matmul %49, %6, %cst_32 {dimension_numbers = #tpu.dot_dimension_numbers<[1], [1], [0], [0], [0, 0, 1, 0], [], []>} : vector<16x64xbf16>, vector<128x64xbf16>, vector<16x128xf32> -> vector<16x128xf32>
    %51 = arith.addf %39, %50 : vector<16x128xf32>
    %52 = tpu.iota {dimensions = array<i32: 1>} : vector<16x32xi32>
    %c224_i32 = arith.constant 224 : i32
    %53 = vector.broadcast %c224_i32 : i32 to vector<16x1xi32>
    %54 = arith.subi %0, %53 : vector<16x1xi32>
    %55 = vector.broadcast %54 : vector<16x1xi32> to vector<16x32xi32>
    %56 = arith.cmpi eq, %52, %55 : vector<16x32xi32>
    %57 = arith.extui %56 : vector<16x32xi1> to vector<16x32xi32>
    %58 = arith.sitofp %57 : vector<16x32xi32> to vector<16x32xf32>
    %59 = arith.truncf %58 : vector<16x32xf32> to vector<16x32xbf16>
    %cst_33 = arith.constant dense<0.000000e+00> : vector<16x64xf32>
    %60 = tpu.matmul %59, %10, %cst_33 {dimension_numbers = #tpu.dot_dimension_numbers<[1], [0], [0], [1], [0, 0, 1, 1], [], []>} : vector<16x32xbf16>, vector<32x64xbf16>, vector<16x64xf32> -> vector<16x64xf32>
    %61 = arith.truncf %60 : vector<16x64xf32> to vector<16x64xbf16>
    %cst_34 = arith.constant dense<0.000000e+00> : vector<16x128xf32>
    %62 = tpu.matmul %61, %7, %cst_34 {dimension_numbers = #tpu.dot_dimension_numbers<[1], [1], [0], [0], [0, 0, 1, 0], [], []>} : vector<16x64xbf16>, vector<128x64xbf16>, vector<16x128xf32> -> vector<16x128xf32>
    %63 = arith.addf %51, %62 : vector<16x128xf32>
    %cst_35 = arith.constant 11.3137083 : f32
    %64 = vector.broadcast %cst_35 : f32 to vector<16x128xf32>
    %65 = arith.mulf %63, %64 : vector<16x128xf32>
    %66 = arith.truncf %65 : vector<16x128xf32> to vector<16x128xbf16>
    %c0_36 = arith.constant 0 : index
    %c0_37 = arith.constant 0 : index
    %67 = vector.load %arg15[%c0_36, %c0_37] : memref<128x384xbf16, #tpu.memory_space<vmem>>, vector<128x384xbf16>
    %cst_38 = arith.constant dense<0.000000e+00> : vector<16x384xf32>
    %68 = tpu.matmul %66, %67, %cst_38 {dimension_numbers = #tpu.dot_dimension_numbers<[1], [0], [0], [1], [0, 0, 1, 1], [], []>} : vector<16x128xbf16>, vector<128x384xbf16>, vector<16x384xf32> -> vector<16x384xf32>
    %c0_39 = arith.constant 0 : index
    %c0_40 = arith.constant 0 : index
    %69 = vector.load %arg16[%c0_39, %c0_40] : memref<2x128xf32, #tpu.memory_space<vmem>>, vector<2x128xf32>
    %c0_41 = arith.constant 0 : index
    %c0_42 = arith.constant 0 : index
    %70 = vector.load %arg17[%c0_41, %c0_42] : memref<2x128xf32, #tpu.memory_space<vmem>>, vector<2x128xf32>
    %71 = vector.extract_strided_slice %68 {offsets = [0, 0], sizes = [16, 128], strides = [1, 1]} : vector<16x384xf32> to vector<16x128xf32>
    %72 = vector.extract_strided_slice %68 {offsets = [0, 128], sizes = [16, 128], strides = [1, 1]} : vector<16x384xf32> to vector<16x128xf32>
    %73 = vector.extract_strided_slice %70 {offsets = [0, 0], sizes = [1, 128], strides = [1, 1]} : vector<2x128xf32> to vector<1x128xf32>
    %74 = vector.broadcast %73 : vector<1x128xf32> to vector<16x128xf32>
    %75 = arith.addf %72, %74 : vector<16x128xf32>
    %76 = vector.extract_strided_slice %68 {offsets = [0, 256], sizes = [16, 128], strides = [1, 1]} : vector<16x384xf32> to vector<16x128xf32>
    %77 = vector.extract_strided_slice %70 {offsets = [1, 0], sizes = [1, 128], strides = [1, 1]} : vector<2x128xf32> to vector<1x128xf32>
    %78 = vector.broadcast %77 : vector<1x128xf32> to vector<16x128xf32>
    %79 = arith.addf %76, %78 : vector<16x128xf32>
    %80 = vector.extract_strided_slice %69 {offsets = [0, 0], sizes = [1, 128], strides = [1, 1]} : vector<2x128xf32> to vector<1x128xf32>
    %81 = vector.extract_strided_slice %69 {offsets = [1, 0], sizes = [1, 128], strides = [1, 1]} : vector<2x128xf32> to vector<1x128xf32>
    %c0_43 = arith.constant 0 : index
    %c0_44 = arith.constant 0 : index
    %c0_45 = arith.constant 0 : index
    %82 = vector.load %arg2[%c0_43, %c0_44, %c0_45] : memref<2x2x128xf32, #tpu.memory_space<vmem>>, vector<1x2x128xf32>
    %83 = vector.shape_cast %82 : vector<1x2x128xf32> to vector<2x128xf32>
    %84 = vector.extract_strided_slice %75 {offsets = [0, 0], sizes = [2, 128], strides = [1, 1]} : vector<16x128xf32> to vector<2x128xf32>
    %85 = vector.broadcast %80 : vector<1x128xf32> to vector<2x128xf32>
    %86 = arith.mulf %85, %83 : vector<2x128xf32>
    %87 = arith.addf %84, %86 : vector<2x128xf32>
    %88 = arith.negf %87 : vector<2x128xf32>
    %89 = math.exp %88 : vector<2x128xf32>
    %cst_46 = arith.constant 1.000000e+00 : f32
    %90 = vector.broadcast %cst_46 : f32 to vector<2x128xf32>
    %91 = arith.addf %90, %89 : vector<2x128xf32>
    %92 = arith.divf %90, %91 : vector<2x128xf32>
    %93 = vector.extract_strided_slice %79 {offsets = [0, 0], sizes = [2, 128], strides = [1, 1]} : vector<16x128xf32> to vector<2x128xf32>
    %94 = vector.broadcast %81 : vector<1x128xf32> to vector<2x128xf32>
    %95 = arith.mulf %94, %83 : vector<2x128xf32>
    %96 = arith.addf %93, %95 : vector<2x128xf32>
    %97 = arith.negf %96 : vector<2x128xf32>
    %98 = math.exp %97 : vector<2x128xf32>
    %cst_47 = arith.constant 1.000000e+00 : f32
    %99 = vector.broadcast %cst_47 : f32 to vector<2x128xf32>
    %100 = arith.addf %99, %98 : vector<2x128xf32>
    %101 = arith.divf %99, %100 : vector<2x128xf32>
    %102 = arith.mulf %92, %83 : vector<2x128xf32>
    %cst_48 = arith.constant 1.000000e+00 : f32
    %103 = vector.broadcast %cst_48 : f32 to vector<2x128xf32>
    %104 = arith.subf %103, %92 : vector<2x128xf32>
    %105 = vector.extract_strided_slice %71 {offsets = [0, 0], sizes = [2, 128], strides = [1, 1]} : vector<16x128xf32> to vector<2x128xf32>
    %106 = arith.mulf %104, %105 : vector<2x128xf32>
    %107 = arith.addf %102, %106 : vector<2x128xf32>
    %108 = arith.mulf %101, %107 : vector<2x128xf32>
    %cst_49 = arith.constant 1.000000e+00 : f32
    %109 = vector.broadcast %cst_49 : f32 to vector<2x128xf32>
    %110 = arith.subf %109, %101 : vector<2x128xf32>
    %111 = vector.extract_strided_slice %65 {offsets = [0, 0], sizes = [2, 128], strides = [1, 1]} : vector<16x128xf32> to vector<2x128xf32>
    %112 = arith.mulf %110, %111 : vector<2x128xf32>
    %113 = arith.addf %108, %112 : vector<2x128xf32>
    %c0_50 = arith.constant 0 : index
    %c0_51 = arith.constant 0 : index
    %114 = vector.load %arg23[%c0_50, %c0_51] : memref<16x128xf32, #tpu.memory_space<vmem>>, vector<2x128xf32>
    tpu.vector_store %arg23[%c0_50, %c0_51], %113 {strides = array<i32>} : memref<16x128xf32, #tpu.memory_space<vmem>>, vector<2x128xf32>,
    %115 = vector.extract_strided_slice %75 {offsets = [2, 0], sizes = [2, 128], strides = [1, 1]} : vector<16x128xf32> to vector<2x128xf32>
    %116 = vector.broadcast %80 : vector<1x128xf32> to vector<2x128xf32>
    %117 = arith.mulf %116, %107 : vector<2x128xf32>
    %118 = arith.addf %115, %117 : vector<2x128xf32>
    %119 = arith.negf %118 : vector<2x128xf32>
    %120 = math.exp %119 : vector<2x128xf32>
    %cst_52 = arith.constant 1.000000e+00 : f32
    %121 = vector.broadcast %cst_52 : f32 to vector<2x128xf32>
    %122 = arith.addf %121, %120 : vector<2x128xf32>
    %123 = arith.divf %121, %122 : vector<2x128xf32>
    %124 = vector.extract_strided_slice %79 {offsets = [2, 0], sizes = [2, 128], strides = [1, 1]} : vector<16x128xf32> to vector<2x128xf32>
    %125 = vector.broadcast %81 : vector<1x128xf32> to vector<2x128xf32>
    %126 = arith.mulf %125, %107 : vector<2x128xf32>
    %127 = arith.addf %124, %126 : vector<2x128xf32>
    %128 = arith.negf %127 : vector<2x128xf32>
    %129 = math.exp %128 : vector<2x128xf32>
    %cst_53 = arith.constant 1.000000e+00 : f32
    %130 = vector.broadcast %cst_53 : f32 to vector<2x128xf32>
    %131 = arith.addf %130, %129 : vector<2x128xf32>
    %132 = arith.divf %130, %131 : vector<2x128xf32>
    %133 = arith.mulf %123, %107 : vector<2x128xf32>
    %cst_54 = arith.constant 1.000000e+00 : f32
    %134 = vector.broadcast %cst_54 : f32 to vector<2x128xf32>
    %135 = arith.subf %134, %123 : vector<2x128xf32>
    %136 = vector.extract_strided_slice %71 {offsets = [2, 0], sizes = [2, 128], strides = [1, 1]} : vector<16x128xf32> to vector<2x128xf32>
    %137 = arith.mulf %135, %136 : vector<2x128xf32>
    %138 = arith.addf %133, %137 : vector<2x128xf32>
    %139 = arith.mulf %132, %138 : vector<2x128xf32>
    %cst_55 = arith.constant 1.000000e+00 : f32
    %140 = vector.broadcast %cst_55 : f32 to vector<2x128xf32>
    %141 = arith.subf %140, %132 : vector<2x128xf32>
    %142 = vector.extract_strided_slice %65 {offsets = [2, 0], sizes = [2, 128], strides = [1, 1]} : vector<16x128xf32> to vector<2x128xf32>
    %143 = arith.mulf %141, %142 : vector<2x128xf32>
    %144 = arith.addf %139, %143 : vector<2x128xf32>
    %c2 = arith.constant 2 : index
    %c0_56 = arith.constant 0 : index
    %145 = vector.load %arg23[%c2, %c0_56] : memref<16x128xf32, #tpu.memory_space<vmem>>, vector<2x128xf32>
    tpu.vector_store %arg23[%c2, %c0_56], %144 {strides = array<i32>} : memref<16x128xf32, #tpu.memory_space<vmem>>, vector<2x128xf32>,
    %146 = vector.extract_strided_slice %75 {offsets = [4, 0], sizes = [2, 128], strides = [1, 1]} : vector<16x128xf32> to vector<2x128xf32>
    %147 = vector.broadcast %80 : vector<1x128xf32> to vector<2x128xf32>
    %148 = arith.mulf %147, %138 : vector<2x128xf32>
    %149 = arith.addf %146, %148 : vector<2x128xf32>
    %150 = arith.negf %149 : vector<2x128xf32>
    %151 = math.exp %150 : vector<2x128xf32>
    %cst_57 = arith.constant 1.000000e+00 : f32
    %152 = vector.broadcast %cst_57 : f32 to vector<2x128xf32>
    %153 = arith.addf %152, %151 : vector<2x128xf32>
    %154 = arith.divf %152, %153 : vector<2x128xf32>
    %155 = vector.extract_strided_slice %79 {offsets = [4, 0], sizes = [2, 128], strides = [1, 1]} : vector<16x128xf32> to vector<2x128xf32>
    %156 = vector.broadcast %81 : vector<1x128xf32> to vector<2x128xf32>
    %157 = arith.mulf %156, %138 : vector<2x128xf32>
    %158 = arith.addf %155, %157 : vector<2x128xf32>
    %159 = arith.negf %158 : vector<2x128xf32>
    %160 = math.exp %159 : vector<2x128xf32>
    %cst_58 = arith.constant 1.000000e+00 : f32
    %161 = vector.broadcast %cst_58 : f32 to vector<2x128xf32>
    %162 = arith.addf %161, %160 : vector<2x128xf32>
    %163 = arith.divf %161, %162 : vector<2x128xf32>
    %164 = arith.mulf %154, %138 : vector<2x128xf32>
    %cst_59 = arith.constant 1.000000e+00 : f32
    %165 = vector.broadcast %cst_59 : f32 to vector<2x128xf32>
    %166 = arith.subf %165, %154 : vector<2x128xf32>
    %167 = vector.extract_strided_slice %71 {offsets = [4, 0], sizes = [2, 128], strides = [1, 1]} : vector<16x128xf32> to vector<2x128xf32>
    %168 = arith.mulf %166, %167 : vector<2x128xf32>
    %169 = arith.addf %164, %168 : vector<2x128xf32>
    %170 = arith.mulf %163, %169 : vector<2x128xf32>
    %cst_60 = arith.constant 1.000000e+00 : f32
    %171 = vector.broadcast %cst_60 : f32 to vector<2x128xf32>
    %172 = arith.subf %171, %163 : vector<2x128xf32>
    %173 = vector.extract_strided_slice %65 {offsets = [4, 0], sizes = [2, 128], strides = [1, 1]} : vector<16x128xf32> to vector<2x128xf32>
    %174 = arith.mulf %172, %173 : vector<2x128xf32>
    %175 = arith.addf %170, %174 : vector<2x128xf32>
    %c4 = arith.constant 4 : index
    %c0_61 = arith.constant 0 : index
    %176 = vector.load %arg23[%c4, %c0_61] : memref<16x128xf32, #tpu.memory_space<vmem>>, vector<2x128xf32>
    tpu.vector_store %arg23[%c4, %c0_61], %175 {strides = array<i32>} : memref<16x128xf32, #tpu.memory_space<vmem>>, vector<2x128xf32>,
    %177 = vector.extract_strided_slice %75 {offsets = [6, 0], sizes = [2, 128], strides = [1, 1]} : vector<16x128xf32> to vector<2x128xf32>
    %178 = vector.broadcast %80 : vector<1x128xf32> to vector<2x128xf32>
    %179 = arith.mulf %178, %169 : vector<2x128xf32>
    %180 = arith.addf %177, %179 : vector<2x128xf32>
    %181 = arith.negf %180 : vector<2x128xf32>
    %182 = math.exp %181 : vector<2x128xf32>
    %cst_62 = arith.constant 1.000000e+00 : f32
    %183 = vector.broadcast %cst_62 : f32 to vector<2x128xf32>
    %184 = arith.addf %183, %182 : vector<2x128xf32>
    %185 = arith.divf %183, %184 : vector<2x128xf32>
    %186 = vector.extract_strided_slice %79 {offsets = [6, 0], sizes = [2, 128], strides = [1, 1]} : vector<16x128xf32> to vector<2x128xf32>
    %187 = vector.broadcast %81 : vector<1x128xf32> to vector<2x128xf32>
    %188 = arith.mulf %187, %169 : vector<2x128xf32>
    %189 = arith.addf %186, %188 : vector<2x128xf32>
    %190 = arith.negf %189 : vector<2x128xf32>
    %191 = math.exp %190 : vector<2x128xf32>
    %cst_63 = arith.constant 1.000000e+00 : f32
    %192 = vector.broadcast %cst_63 : f32 to vector<2x128xf32>
    %193 = arith.addf %192, %191 : vector<2x128xf32>
    %194 = arith.divf %192, %193 : vector<2x128xf32>
    %195 = arith.mulf %185, %169 : vector<2x128xf32>
    %cst_64 = arith.constant 1.000000e+00 : f32
    %196 = vector.broadcast %cst_64 : f32 to vector<2x128xf32>
    %197 = arith.subf %196, %185 : vector<2x128xf32>
    %198 = vector.extract_strided_slice %71 {offsets = [6, 0], sizes = [2, 128], strides = [1, 1]} : vector<16x128xf32> to vector<2x128xf32>
    %199 = arith.mulf %197, %198 : vector<2x128xf32>
    %200 = arith.addf %195, %199 : vector<2x128xf32>
    %201 = arith.mulf %194, %200 : vector<2x128xf32>
    %cst_65 = arith.constant 1.000000e+00 : f32
    %202 = vector.broadcast %cst_65 : f32 to vector<2x128xf32>
    %203 = arith.subf %202, %194 : vector<2x128xf32>
    %204 = vector.extract_strided_slice %65 {offsets = [6, 0], sizes = [2, 128], strides = [1, 1]} : vector<16x128xf32> to vector<2x128xf32>
    %205 = arith.mulf %203, %204 : vector<2x128xf32>
    %206 = arith.addf %201, %205 : vector<2x128xf32>
    %c6 = arith.constant 6 : index
    %c0_66 = arith.constant 0 : index
    %207 = vector.load %arg23[%c6, %c0_66] : memref<16x128xf32, #tpu.memory_space<vmem>>, vector<2x128xf32>
    tpu.vector_store %arg23[%c6, %c0_66], %206 {strides = array<i32>} : memref<16x128xf32, #tpu.memory_space<vmem>>, vector<2x128xf32>,
    %208 = vector.extract_strided_slice %75 {offsets = [8, 0], sizes = [2, 128], strides = [1, 1]} : vector<16x128xf32> to vector<2x128xf32>
    %209 = vector.broadcast %80 : vector<1x128xf32> to vector<2x128xf32>
    %210 = arith.mulf %209, %200 : vector<2x128xf32>
    %211 = arith.addf %208, %210 : vector<2x128xf32>
    %212 = arith.negf %211 : vector<2x128xf32>
    %213 = math.exp %212 : vector<2x128xf32>
    %cst_67 = arith.constant 1.000000e+00 : f32
    %214 = vector.broadcast %cst_67 : f32 to vector<2x128xf32>
    %215 = arith.addf %214, %213 : vector<2x128xf32>
    %216 = arith.divf %214, %215 : vector<2x128xf32>
    %217 = vector.extract_strided_slice %79 {offsets = [8, 0], sizes = [2, 128], strides = [1, 1]} : vector<16x128xf32> to vector<2x128xf32>
    %218 = vector.broadcast %81 : vector<1x128xf32> to vector<2x128xf32>
    %219 = arith.mulf %218, %200 : vector<2x128xf32>
    %220 = arith.addf %217, %219 : vector<2x128xf32>
    %221 = arith.negf %220 : vector<2x128xf32>
    %222 = math.exp %221 : vector<2x128xf32>
    %cst_68 = arith.constant 1.000000e+00 : f32
    %223 = vector.broadcast %cst_68 : f32 to vector<2x128xf32>
    %224 = arith.addf %223, %222 : vector<2x128xf32>
    %225 = arith.divf %223, %224 : vector<2x128xf32>
    %226 = arith.mulf %216, %200 : vector<2x128xf32>
    %cst_69 = arith.constant 1.000000e+00 : f32
    %227 = vector.broadcast %cst_69 : f32 to vector<2x128xf32>
    %228 = arith.subf %227, %216 : vector<2x128xf32>
    %229 = vector.extract_strided_slice %71 {offsets = [8, 0], sizes = [2, 128], strides = [1, 1]} : vector<16x128xf32> to vector<2x128xf32>
    %230 = arith.mulf %228, %229 : vector<2x128xf32>
    %231 = arith.addf %226, %230 : vector<2x128xf32>
    %232 = arith.mulf %225, %231 : vector<2x128xf32>
    %cst_70 = arith.constant 1.000000e+00 : f32
    %233 = vector.broadcast %cst_70 : f32 to vector<2x128xf32>
    %234 = arith.subf %233, %225 : vector<2x128xf32>
    %235 = vector.extract_strided_slice %65 {offsets = [8, 0], sizes = [2, 128], strides = [1, 1]} : vector<16x128xf32> to vector<2x128xf32>
    %236 = arith.mulf %234, %235 : vector<2x128xf32>
    %237 = arith.addf %232, %236 : vector<2x128xf32>
    %c8 = arith.constant 8 : index
    %c0_71 = arith.constant 0 : index
    %238 = vector.load %arg23[%c8, %c0_71] : memref<16x128xf32, #tpu.memory_space<vmem>>, vector<2x128xf32>
    tpu.vector_store %arg23[%c8, %c0_71], %237 {strides = array<i32>} : memref<16x128xf32, #tpu.memory_space<vmem>>, vector<2x128xf32>,
    %239 = vector.extract_strided_slice %75 {offsets = [10, 0], sizes = [2, 128], strides = [1, 1]} : vector<16x128xf32> to vector<2x128xf32>
    %240 = vector.broadcast %80 : vector<1x128xf32> to vector<2x128xf32>
    %241 = arith.mulf %240, %231 : vector<2x128xf32>
    %242 = arith.addf %239, %241 : vector<2x128xf32>
    %243 = arith.negf %242 : vector<2x128xf32>
    %244 = math.exp %243 : vector<2x128xf32>
    %cst_72 = arith.constant 1.000000e+00 : f32
    %245 = vector.broadcast %cst_72 : f32 to vector<2x128xf32>
    %246 = arith.addf %245, %244 : vector<2x128xf32>
    %247 = arith.divf %245, %246 : vector<2x128xf32>
    %248 = vector.extract_strided_slice %79 {offsets = [10, 0], sizes = [2, 128], strides = [1, 1]} : vector<16x128xf32> to vector<2x128xf32>
    %249 = vector.broadcast %81 : vector<1x128xf32> to vector<2x128xf32>
    %250 = arith.mulf %249, %231 : vector<2x128xf32>
    %251 = arith.addf %248, %250 : vector<2x128xf32>
    %252 = arith.negf %251 : vector<2x128xf32>
    %253 = math.exp %252 : vector<2x128xf32>
    %cst_73 = arith.constant 1.000000e+00 : f32
    %254 = vector.broadcast %cst_73 : f32 to vector<2x128xf32>
    %255 = arith.addf %254, %253 : vector<2x128xf32>
    %256 = arith.divf %254, %255 : vector<2x128xf32>
    %257 = arith.mulf %247, %231 : vector<2x128xf32>
    %cst_74 = arith.constant 1.000000e+00 : f32
    %258 = vector.broadcast %cst_74 : f32 to vector<2x128xf32>
    %259 = arith.subf %258, %247 : vector<2x128xf32>
    %260 = vector.extract_strided_slice %71 {offsets = [10, 0], sizes = [2, 128], strides = [1, 1]} : vector<16x128xf32> to vector<2x128xf32>
    %261 = arith.mulf %259, %260 : vector<2x128xf32>
    %262 = arith.addf %257, %261 : vector<2x128xf32>
    %263 = arith.mulf %256, %262 : vector<2x128xf32>
    %cst_75 = arith.constant 1.000000e+00 : f32
    %264 = vector.broadcast %cst_75 : f32 to vector<2x128xf32>
    %265 = arith.subf %264, %256 : vector<2x128xf32>
    %266 = vector.extract_strided_slice %65 {offsets = [10, 0], sizes = [2, 128], strides = [1, 1]} : vector<16x128xf32> to vector<2x128xf32>
    %267 = arith.mulf %265, %266 : vector<2x128xf32>
    %268 = arith.addf %263, %267 : vector<2x128xf32>
    %c10 = arith.constant 10 : index
    %c0_76 = arith.constant 0 : index
    %269 = vector.load %arg23[%c10, %c0_76] : memref<16x128xf32, #tpu.memory_space<vmem>>, vector<2x128xf32>
    tpu.vector_store %arg23[%c10, %c0_76], %268 {strides = array<i32>} : memref<16x128xf32, #tpu.memory_space<vmem>>, vector<2x128xf32>,
    %270 = vector.extract_strided_slice %75 {offsets = [12, 0], sizes = [2, 128], strides = [1, 1]} : vector<16x128xf32> to vector<2x128xf32>
    %271 = vector.broadcast %80 : vector<1x128xf32> to vector<2x128xf32>
    %272 = arith.mulf %271, %262 : vector<2x128xf32>
    %273 = arith.addf %270, %272 : vector<2x128xf32>
    %274 = arith.negf %273 : vector<2x128xf32>
    %275 = math.exp %274 : vector<2x128xf32>
    %cst_77 = arith.constant 1.000000e+00 : f32
    %276 = vector.broadcast %cst_77 : f32 to vector<2x128xf32>
    %277 = arith.addf %276, %275 : vector<2x128xf32>
    %278 = arith.divf %276, %277 : vector<2x128xf32>
    %279 = vector.extract_strided_slice %79 {offsets = [12, 0], sizes = [2, 128], strides = [1, 1]} : vector<16x128xf32> to vector<2x128xf32>
    %280 = vector.broadcast %81 : vector<1x128xf32> to vector<2x128xf32>
    %281 = arith.mulf %280, %262 : vector<2x128xf32>
    %282 = arith.addf %279, %281 : vector<2x128xf32>
    %283 = arith.negf %282 : vector<2x128xf32>
    %284 = math.exp %283 : vector<2x128xf32>
    %cst_78 = arith.constant 1.000000e+00 : f32
    %285 = vector.broadcast %cst_78 : f32 to vector<2x128xf32>
    %286 = arith.addf %285, %284 : vector<2x128xf32>
    %287 = arith.divf %285, %286 : vector<2x128xf32>
    %288 = arith.mulf %278, %262 : vector<2x128xf32>
    %cst_79 = arith.constant 1.000000e+00 : f32
    %289 = vector.broadcast %cst_79 : f32 to vector<2x128xf32>
    %290 = arith.subf %289, %278 : vector<2x128xf32>
    %291 = vector.extract_strided_slice %71 {offsets = [12, 0], sizes = [2, 128], strides = [1, 1]} : vector<16x128xf32> to vector<2x128xf32>
    %292 = arith.mulf %290, %291 : vector<2x128xf32>
    %293 = arith.addf %288, %292 : vector<2x128xf32>
    %294 = arith.mulf %287, %293 : vector<2x128xf32>
    %cst_80 = arith.constant 1.000000e+00 : f32
    %295 = vector.broadcast %cst_80 : f32 to vector<2x128xf32>
    %296 = arith.subf %295, %287 : vector<2x128xf32>
    %297 = vector.extract_strided_slice %65 {offsets = [12, 0], sizes = [2, 128], strides = [1, 1]} : vector<16x128xf32> to vector<2x128xf32>
    %298 = arith.mulf %296, %297 : vector<2x128xf32>
    %299 = arith.addf %294, %298 : vector<2x128xf32>
    %c12 = arith.constant 12 : index
    %c0_81 = arith.constant 0 : index
    %300 = vector.load %arg23[%c12, %c0_81] : memref<16x128xf32, #tpu.memory_space<vmem>>, vector<2x128xf32>
    tpu.vector_store %arg23[%c12, %c0_81], %299 {strides = array<i32>} : memref<16x128xf32, #tpu.memory_space<vmem>>, vector<2x128xf32>,
    %301 = vector.extract_strided_slice %75 {offsets = [14, 0], sizes = [2, 128], strides = [1, 1]} : vector<16x128xf32> to vector<2x128xf32>
    %302 = vector.broadcast %80 : vector<1x128xf32> to vector<2x128xf32>
    %303 = arith.mulf %302, %293 : vector<2x128xf32>
    %304 = arith.addf %301, %303 : vector<2x128xf32>
    %305 = arith.negf %304 : vector<2x128xf32>
    %306 = math.exp %305 : vector<2x128xf32>
    %cst_82 = arith.constant 1.000000e+00 : f32
    %307 = vector.broadcast %cst_82 : f32 to vector<2x128xf32>
    %308 = arith.addf %307, %306 : vector<2x128xf32>
    %309 = arith.divf %307, %308 : vector<2x128xf32>
    %310 = vector.extract_strided_slice %79 {offsets = [14, 0], sizes = [2, 128], strides = [1, 1]} : vector<16x128xf32> to vector<2x128xf32>
    %311 = vector.broadcast %81 : vector<1x128xf32> to vector<2x128xf32>
    %312 = arith.mulf %311, %293 : vector<2x128xf32>
    %313 = arith.addf %310, %312 : vector<2x128xf32>
    %314 = arith.negf %313 : vector<2x128xf32>
    %315 = math.exp %314 : vector<2x128xf32>
    %cst_83 = arith.constant 1.000000e+00 : f32
    %316 = vector.broadcast %cst_83 : f32 to vector<2x128xf32>
    %317 = arith.addf %316, %315 : vector<2x128xf32>
    %318 = arith.divf %316, %317 : vector<2x128xf32>
    %319 = arith.mulf %309, %293 : vector<2x128xf32>
    %cst_84 = arith.constant 1.000000e+00 : f32
    %320 = vector.broadcast %cst_84 : f32 to vector<2x128xf32>
    %321 = arith.subf %320, %309 : vector<2x128xf32>
    %322 = vector.extract_strided_slice %71 {offsets = [14, 0], sizes = [2, 128], strides = [1, 1]} : vector<16x128xf32> to vector<2x128xf32>
    %323 = arith.mulf %321, %322 : vector<2x128xf32>
    %324 = arith.addf %319, %323 : vector<2x128xf32>
    %325 = arith.mulf %318, %324 : vector<2x128xf32>
    %cst_85 = arith.constant 1.000000e+00 : f32
    %326 = vector.broadcast %cst_85 : f32 to vector<2x128xf32>
    %327 = arith.subf %326, %318 : vector<2x128xf32>
    %328 = vector.extract_strided_slice %65 {offsets = [14, 0], sizes = [2, 128], strides = [1, 1]} : vector<16x128xf32> to vector<2x128xf32>
    %329 = arith.mulf %327, %328 : vector<2x128xf32>
    %330 = arith.addf %325, %329 : vector<2x128xf32>
    %c14 = arith.constant 14 : index
    %c0_86 = arith.constant 0 : index
    %331 = vector.load %arg23[%c14, %c0_86] : memref<16x128xf32, #tpu.memory_space<vmem>>, vector<2x128xf32>
    tpu.vector_store %arg23[%c14, %c0_86], %330 {strides = array<i32>} : memref<16x128xf32, #tpu.memory_space<vmem>>, vector<2x128xf32>,
    %c0_87 = arith.constant 0 : index
    %c0_88 = arith.constant 0 : index
    %c0_89 = arith.constant 0 : index
    %332 = vector.load %arg22[%c0_87, %c0_88, %c0_89] : memref<2x2x128xf32, #tpu.memory_space<vmem>>, vector<1x2x128xf32>
    %333 = vector.shape_cast %332 : vector<1x2x128xf32> to vector<2x128xf32>
    %334 = vector.shape_cast %324 : vector<2x128xf32> to vector<1x2x128xf32>
    tpu.vector_store %arg22[%c0_87, %c0_88, %c0_89], %334 {strides = array<i32>} : memref<2x2x128xf32, #tpu.memory_space<vmem>>, vector<1x2x128xf32>,
    %c0_90 = arith.constant 0 : index
    %c0_91 = arith.constant 0 : index
    %335 = vector.load %arg23[%c0_90, %c0_91] : memref<16x128xf32, #tpu.memory_space<vmem>>, vector<16x128xf32>
    %336 = arith.truncf %335 : vector<16x128xf32> to vector<16x128xbf16>
    %c0_92 = arith.constant 0 : index
    %c0_93 = arith.constant 0 : index
    %337 = vector.load %arg18[%c0_92, %c0_93] : memref<128x384xbf16, #tpu.memory_space<vmem>>, vector<128x384xbf16>
    %cst_94 = arith.constant dense<0.000000e+00> : vector<16x384xf32>
    %338 = tpu.matmul %336, %337, %cst_94 {dimension_numbers = #tpu.dot_dimension_numbers<[1], [0], [0], [1], [0, 0, 1, 1], [], []>} : vector<16x128xbf16>, vector<128x384xbf16>, vector<16x384xf32> -> vector<16x384xf32>
    %c0_95 = arith.constant 0 : index
    %c0_96 = arith.constant 0 : index
    %339 = vector.load %arg19[%c0_95, %c0_96] : memref<2x128xf32, #tpu.memory_space<vmem>>, vector<2x128xf32>
    %c0_97 = arith.constant 0 : index
    %c0_98 = arith.constant 0 : index
    %340 = vector.load %arg20[%c0_97, %c0_98] : memref<2x128xf32, #tpu.memory_space<vmem>>, vector<2x128xf32>
    %341 = vector.extract_strided_slice %338 {offsets = [0, 0], sizes = [16, 128], strides = [1, 1]} : vector<16x384xf32> to vector<16x128xf32>
    %342 = vector.extract_strided_slice %338 {offsets = [0, 128], sizes = [16, 128], strides = [1, 1]} : vector<16x384xf32> to vector<16x128xf32>
    %343 = vector.extract_strided_slice %340 {offsets = [0, 0], sizes = [1, 128], strides = [1, 1]} : vector<2x128xf32> to vector<1x128xf32>
    %344 = vector.broadcast %343 : vector<1x128xf32> to vector<16x128xf32>
    %345 = arith.addf %342, %344 : vector<16x128xf32>
    %346 = vector.extract_strided_slice %338 {offsets = [0, 256], sizes = [16, 128], strides = [1, 1]} : vector<16x384xf32> to vector<16x128xf32>
    %347 = vector.extract_strided_slice %340 {offsets = [1, 0], sizes = [1, 128], strides = [1, 1]} : vector<2x128xf32> to vector<1x128xf32>
    %348 = vector.broadcast %347 : vector<1x128xf32> to vector<16x128xf32>
    %349 = arith.addf %346, %348 : vector<16x128xf32>
    %350 = vector.extract_strided_slice %339 {offsets = [0, 0], sizes = [1, 128], strides = [1, 1]} : vector<2x128xf32> to vector<1x128xf32>
    %351 = vector.extract_strided_slice %339 {offsets = [1, 0], sizes = [1, 128], strides = [1, 1]} : vector<2x128xf32> to vector<1x128xf32>
    %c1 = arith.constant 1 : index
    %c0_99 = arith.constant 0 : index
    %c0_100 = arith.constant 0 : index
    %352 = vector.load %arg2[%c1, %c0_99, %c0_100] : memref<2x2x128xf32, #tpu.memory_space<vmem>>, vector<1x2x128xf32>
    %353 = vector.shape_cast %352 : vector<1x2x128xf32> to vector<2x128xf32>
    %354 = vector.extract_strided_slice %345 {offsets = [0, 0], sizes = [2, 128], strides = [1, 1]} : vector<16x128xf32> to vector<2x128xf32>
    %355 = vector.broadcast %350 : vector<1x128xf32> to vector<2x128xf32>
    %356 = arith.mulf %355, %353 : vector<2x128xf32>
    %357 = arith.addf %354, %356 : vector<2x128xf32>
    %358 = arith.negf %357 : vector<2x128xf32>
    %359 = math.exp %358 : vector<2x128xf32>
    %cst_101 = arith.constant 1.000000e+00 : f32
    %360 = vector.broadcast %cst_101 : f32 to vector<2x128xf32>
    %361 = arith.addf %360, %359 : vector<2x128xf32>
    %362 = arith.divf %360, %361 : vector<2x128xf32>
    %363 = vector.extract_strided_slice %349 {offsets = [0, 0], sizes = [2, 128], strides = [1, 1]} : vector<16x128xf32> to vector<2x128xf32>
    %364 = vector.broadcast %351 : vector<1x128xf32> to vector<2x128xf32>
    %365 = arith.mulf %364, %353 : vector<2x128xf32>
    %366 = arith.addf %363, %365 : vector<2x128xf32>
    %367 = arith.negf %366 : vector<2x128xf32>
    %368 = math.exp %367 : vector<2x128xf32>
    %cst_102 = arith.constant 1.000000e+00 : f32
    %369 = vector.broadcast %cst_102 : f32 to vector<2x128xf32>
    %370 = arith.addf %369, %368 : vector<2x128xf32>
    %371 = arith.divf %369, %370 : vector<2x128xf32>
    %372 = arith.mulf %362, %353 : vector<2x128xf32>
    %cst_103 = arith.constant 1.000000e+00 : f32
    %373 = vector.broadcast %cst_103 : f32 to vector<2x128xf32>
    %374 = arith.subf %373, %362 : vector<2x128xf32>
    %375 = vector.extract_strided_slice %341 {offsets = [0, 0], sizes = [2, 128], strides = [1, 1]} : vector<16x128xf32> to vector<2x128xf32>
    %376 = arith.mulf %374, %375 : vector<2x128xf32>
    %377 = arith.addf %372, %376 : vector<2x128xf32>
    %378 = arith.mulf %371, %377 : vector<2x128xf32>
    %cst_104 = arith.constant 1.000000e+00 : f32
    %379 = vector.broadcast %cst_104 : f32 to vector<2x128xf32>
    %380 = arith.subf %379, %371 : vector<2x128xf32>
    %381 = vector.extract_strided_slice %335 {offsets = [0, 0], sizes = [2, 128], strides = [1, 1]} : vector<16x128xf32> to vector<2x128xf32>
    %382 = arith.mulf %380, %381 : vector<2x128xf32>
    %383 = arith.addf %378, %382 : vector<2x128xf32>
    %c0_105 = arith.constant 0 : index
    %c0_106 = arith.constant 0 : index
    %384 = vector.load %arg23[%c0_105, %c0_106] : memref<16x128xf32, #tpu.memory_space<vmem>>, vector<2x128xf32>
    tpu.vector_store %arg23[%c0_105, %c0_106], %383 {strides = array<i32>} : memref<16x128xf32, #tpu.memory_space<vmem>>, vector<2x128xf32>,
    %385 = vector.extract_strided_slice %345 {offsets = [2, 0], sizes = [2, 128], strides = [1, 1]} : vector<16x128xf32> to vector<2x128xf32>
    %386 = vector.broadcast %350 : vector<1x128xf32> to vector<2x128xf32>
    %387 = arith.mulf %386, %377 : vector<2x128xf32>
    %388 = arith.addf %385, %387 : vector<2x128xf32>
    %389 = arith.negf %388 : vector<2x128xf32>
    %390 = math.exp %389 : vector<2x128xf32>
    %cst_107 = arith.constant 1.000000e+00 : f32
    %391 = vector.broadcast %cst_107 : f32 to vector<2x128xf32>
    %392 = arith.addf %391, %390 : vector<2x128xf32>
    %393 = arith.divf %391, %392 : vector<2x128xf32>
    %394 = vector.extract_strided_slice %349 {offsets = [2, 0], sizes = [2, 128], strides = [1, 1]} : vector<16x128xf32> to vector<2x128xf32>
    %395 = vector.broadcast %351 : vector<1x128xf32> to vector<2x128xf32>
    %396 = arith.mulf %395, %377 : vector<2x128xf32>
    %397 = arith.addf %394, %396 : vector<2x128xf32>
    %398 = arith.negf %397 : vector<2x128xf32>
    %399 = math.exp %398 : vector<2x128xf32>
    %cst_108 = arith.constant 1.000000e+00 : f32
    %400 = vector.broadcast %cst_108 : f32 to vector<2x128xf32>
    %401 = arith.addf %400, %399 : vector<2x128xf32>
    %402 = arith.divf %400, %401 : vector<2x128xf32>
    %403 = arith.mulf %393, %377 : vector<2x128xf32>
    %cst_109 = arith.constant 1.000000e+00 : f32
    %404 = vector.broadcast %cst_109 : f32 to vector<2x128xf32>
    %405 = arith.subf %404, %393 : vector<2x128xf32>
    %406 = vector.extract_strided_slice %341 {offsets = [2, 0], sizes = [2, 128], strides = [1, 1]} : vector<16x128xf32> to vector<2x128xf32>
    %407 = arith.mulf %405, %406 : vector<2x128xf32>
    %408 = arith.addf %403, %407 : vector<2x128xf32>
    %409 = arith.mulf %402, %408 : vector<2x128xf32>
    %cst_110 = arith.constant 1.000000e+00 : f32
    %410 = vector.broadcast %cst_110 : f32 to vector<2x128xf32>
    %411 = arith.subf %410, %402 : vector<2x128xf32>
    %412 = vector.extract_strided_slice %335 {offsets = [2, 0], sizes = [2, 128], strides = [1, 1]} : vector<16x128xf32> to vector<2x128xf32>
    %413 = arith.mulf %411, %412 : vector<2x128xf32>
    %414 = arith.addf %409, %413 : vector<2x128xf32>
    %c2_111 = arith.constant 2 : index
    %c0_112 = arith.constant 0 : index
    %415 = vector.load %arg23[%c2_111, %c0_112] : memref<16x128xf32, #tpu.memory_space<vmem>>, vector<2x128xf32>
    tpu.vector_store %arg23[%c2_111, %c0_112], %414 {strides = array<i32>} : memref<16x128xf32, #tpu.memory_space<vmem>>, vector<2x128xf32>,
    %416 = vector.extract_strided_slice %345 {offsets = [4, 0], sizes = [2, 128], strides = [1, 1]} : vector<16x128xf32> to vector<2x128xf32>
    %417 = vector.broadcast %350 : vector<1x128xf32> to vector<2x128xf32>
    %418 = arith.mulf %417, %408 : vector<2x128xf32>
    %419 = arith.addf %416, %418 : vector<2x128xf32>
    %420 = arith.negf %419 : vector<2x128xf32>
    %421 = math.exp %420 : vector<2x128xf32>
    %cst_113 = arith.constant 1.000000e+00 : f32
    %422 = vector.broadcast %cst_113 : f32 to vector<2x128xf32>
    %423 = arith.addf %422, %421 : vector<2x128xf32>
    %424 = arith.divf %422, %423 : vector<2x128xf32>
    %425 = vector.extract_strided_slice %349 {offsets = [4, 0], sizes = [2, 128], strides = [1, 1]} : vector<16x128xf32> to vector<2x128xf32>
    %426 = vector.broadcast %351 : vector<1x128xf32> to vector<2x128xf32>
    %427 = arith.mulf %426, %408 : vector<2x128xf32>
    %428 = arith.addf %425, %427 : vector<2x128xf32>
    %429 = arith.negf %428 : vector<2x128xf32>
    %430 = math.exp %429 : vector<2x128xf32>
    %cst_114 = arith.constant 1.000000e+00 : f32
    %431 = vector.broadcast %cst_114 : f32 to vector<2x128xf32>
    %432 = arith.addf %431, %430 : vector<2x128xf32>
    %433 = arith.divf %431, %432 : vector<2x128xf32>
    %434 = arith.mulf %424, %408 : vector<2x128xf32>
    %cst_115 = arith.constant 1.000000e+00 : f32
    %435 = vector.broadcast %cst_115 : f32 to vector<2x128xf32>
    %436 = arith.subf %435, %424 : vector<2x128xf32>
    %437 = vector.extract_strided_slice %341 {offsets = [4, 0], sizes = [2, 128], strides = [1, 1]} : vector<16x128xf32> to vector<2x128xf32>
    %438 = arith.mulf %436, %437 : vector<2x128xf32>
    %439 = arith.addf %434, %438 : vector<2x128xf32>
    %440 = arith.mulf %433, %439 : vector<2x128xf32>
    %cst_116 = arith.constant 1.000000e+00 : f32
    %441 = vector.broadcast %cst_116 : f32 to vector<2x128xf32>
    %442 = arith.subf %441, %433 : vector<2x128xf32>
    %443 = vector.extract_strided_slice %335 {offsets = [4, 0], sizes = [2, 128], strides = [1, 1]} : vector<16x128xf32> to vector<2x128xf32>
    %444 = arith.mulf %442, %443 : vector<2x128xf32>
    %445 = arith.addf %440, %444 : vector<2x128xf32>
    %c4_117 = arith.constant 4 : index
    %c0_118 = arith.constant 0 : index
    %446 = vector.load %arg23[%c4_117, %c0_118] : memref<16x128xf32, #tpu.memory_space<vmem>>, vector<2x128xf32>
    tpu.vector_store %arg23[%c4_117, %c0_118], %445 {strides = array<i32>} : memref<16x128xf32, #tpu.memory_space<vmem>>, vector<2x128xf32>,
    %447 = vector.extract_strided_slice %345 {offsets = [6, 0], sizes = [2, 128], strides = [1, 1]} : vector<16x128xf32> to vector<2x128xf32>
    %448 = vector.broadcast %350 : vector<1x128xf32> to vector<2x128xf32>
    %449 = arith.mulf %448, %439 : vector<2x128xf32>
    %450 = arith.addf %447, %449 : vector<2x128xf32>
    %451 = arith.negf %450 : vector<2x128xf32>
    %452 = math.exp %451 : vector<2x128xf32>
    %cst_119 = arith.constant 1.000000e+00 : f32
    %453 = vector.broadcast %cst_119 : f32 to vector<2x128xf32>
    %454 = arith.addf %453, %452 : vector<2x128xf32>
    %455 = arith.divf %453, %454 : vector<2x128xf32>
    %456 = vector.extract_strided_slice %349 {offsets = [6, 0], sizes = [2, 128], strides = [1, 1]} : vector<16x128xf32> to vector<2x128xf32>
    %457 = vector.broadcast %351 : vector<1x128xf32> to vector<2x128xf32>
    %458 = arith.mulf %457, %439 : vector<2x128xf32>
    %459 = arith.addf %456, %458 : vector<2x128xf32>
    %460 = arith.negf %459 : vector<2x128xf32>
    %461 = math.exp %460 : vector<2x128xf32>
    %cst_120 = arith.constant 1.000000e+00 : f32
    %462 = vector.broadcast %cst_120 : f32 to vector<2x128xf32>
    %463 = arith.addf %462, %461 : vector<2x128xf32>
    %464 = arith.divf %462, %463 : vector<2x128xf32>
    %465 = arith.mulf %455, %439 : vector<2x128xf32>
    %cst_121 = arith.constant 1.000000e+00 : f32
    %466 = vector.broadcast %cst_121 : f32 to vector<2x128xf32>
    %467 = arith.subf %466, %455 : vector<2x128xf32>
    %468 = vector.extract_strided_slice %341 {offsets = [6, 0], sizes = [2, 128], strides = [1, 1]} : vector<16x128xf32> to vector<2x128xf32>
    %469 = arith.mulf %467, %468 : vector<2x128xf32>
    %470 = arith.addf %465, %469 : vector<2x128xf32>
    %471 = arith.mulf %464, %470 : vector<2x128xf32>
    %cst_122 = arith.constant 1.000000e+00 : f32
    %472 = vector.broadcast %cst_122 : f32 to vector<2x128xf32>
    %473 = arith.subf %472, %464 : vector<2x128xf32>
    %474 = vector.extract_strided_slice %335 {offsets = [6, 0], sizes = [2, 128], strides = [1, 1]} : vector<16x128xf32> to vector<2x128xf32>
    %475 = arith.mulf %473, %474 : vector<2x128xf32>
    %476 = arith.addf %471, %475 : vector<2x128xf32>
    %c6_123 = arith.constant 6 : index
    %c0_124 = arith.constant 0 : index
    %477 = vector.load %arg23[%c6_123, %c0_124] : memref<16x128xf32, #tpu.memory_space<vmem>>, vector<2x128xf32>
    tpu.vector_store %arg23[%c6_123, %c0_124], %476 {strides = array<i32>} : memref<16x128xf32, #tpu.memory_space<vmem>>, vector<2x128xf32>,
    %478 = vector.extract_strided_slice %345 {offsets = [8, 0], sizes = [2, 128], strides = [1, 1]} : vector<16x128xf32> to vector<2x128xf32>
    %479 = vector.broadcast %350 : vector<1x128xf32> to vector<2x128xf32>
    %480 = arith.mulf %479, %470 : vector<2x128xf32>
    %481 = arith.addf %478, %480 : vector<2x128xf32>
    %482 = arith.negf %481 : vector<2x128xf32>
    %483 = math.exp %482 : vector<2x128xf32>
    %cst_125 = arith.constant 1.000000e+00 : f32
    %484 = vector.broadcast %cst_125 : f32 to vector<2x128xf32>
    %485 = arith.addf %484, %483 : vector<2x128xf32>
    %486 = arith.divf %484, %485 : vector<2x128xf32>
    %487 = vector.extract_strided_slice %349 {offsets = [8, 0], sizes = [2, 128], strides = [1, 1]} : vector<16x128xf32> to vector<2x128xf32>
    %488 = vector.broadcast %351 : vector<1x128xf32> to vector<2x128xf32>
    %489 = arith.mulf %488, %470 : vector<2x128xf32>
    %490 = arith.addf %487, %489 : vector<2x128xf32>
    %491 = arith.negf %490 : vector<2x128xf32>
    %492 = math.exp %491 : vector<2x128xf32>
    %cst_126 = arith.constant 1.000000e+00 : f32
    %493 = vector.broadcast %cst_126 : f32 to vector<2x128xf32>
    %494 = arith.addf %493, %492 : vector<2x128xf32>
    %495 = arith.divf %493, %494 : vector<2x128xf32>
    %496 = arith.mulf %486, %470 : vector<2x128xf32>
    %cst_127 = arith.constant 1.000000e+00 : f32
    %497 = vector.broadcast %cst_127 : f32 to vector<2x128xf32>
    %498 = arith.subf %497, %486 : vector<2x128xf32>
    %499 = vector.extract_strided_slice %341 {offsets = [8, 0], sizes = [2, 128], strides = [1, 1]} : vector<16x128xf32> to vector<2x128xf32>
    %500 = arith.mulf %498, %499 : vector<2x128xf32>
    %501 = arith.addf %496, %500 : vector<2x128xf32>
    %502 = arith.mulf %495, %501 : vector<2x128xf32>
    %cst_128 = arith.constant 1.000000e+00 : f32
    %503 = vector.broadcast %cst_128 : f32 to vector<2x128xf32>
    %504 = arith.subf %503, %495 : vector<2x128xf32>
    %505 = vector.extract_strided_slice %335 {offsets = [8, 0], sizes = [2, 128], strides = [1, 1]} : vector<16x128xf32> to vector<2x128xf32>
    %506 = arith.mulf %504, %505 : vector<2x128xf32>
    %507 = arith.addf %502, %506 : vector<2x128xf32>
    %c8_129 = arith.constant 8 : index
    %c0_130 = arith.constant 0 : index
    %508 = vector.load %arg23[%c8_129, %c0_130] : memref<16x128xf32, #tpu.memory_space<vmem>>, vector<2x128xf32>
    tpu.vector_store %arg23[%c8_129, %c0_130], %507 {strides = array<i32>} : memref<16x128xf32, #tpu.memory_space<vmem>>, vector<2x128xf32>,
    %509 = vector.extract_strided_slice %345 {offsets = [10, 0], sizes = [2, 128], strides = [1, 1]} : vector<16x128xf32> to vector<2x128xf32>
    %510 = vector.broadcast %350 : vector<1x128xf32> to vector<2x128xf32>
    %511 = arith.mulf %510, %501 : vector<2x128xf32>
    %512 = arith.addf %509, %511 : vector<2x128xf32>
    %513 = arith.negf %512 : vector<2x128xf32>
    %514 = math.exp %513 : vector<2x128xf32>
    %cst_131 = arith.constant 1.000000e+00 : f32
    %515 = vector.broadcast %cst_131 : f32 to vector<2x128xf32>
    %516 = arith.addf %515, %514 : vector<2x128xf32>
    %517 = arith.divf %515, %516 : vector<2x128xf32>
    %518 = vector.extract_strided_slice %349 {offsets = [10, 0], sizes = [2, 128], strides = [1, 1]} : vector<16x128xf32> to vector<2x128xf32>
    %519 = vector.broadcast %351 : vector<1x128xf32> to vector<2x128xf32>
    %520 = arith.mulf %519, %501 : vector<2x128xf32>
    %521 = arith.addf %518, %520 : vector<2x128xf32>
    %522 = arith.negf %521 : vector<2x128xf32>
    %523 = math.exp %522 : vector<2x128xf32>
    %cst_132 = arith.constant 1.000000e+00 : f32
    %524 = vector.broadcast %cst_132 : f32 to vector<2x128xf32>
    %525 = arith.addf %524, %523 : vector<2x128xf32>
    %526 = arith.divf %524, %525 : vector<2x128xf32>
    %527 = arith.mulf %517, %501 : vector<2x128xf32>
    %cst_133 = arith.constant 1.000000e+00 : f32
    %528 = vector.broadcast %cst_133 : f32 to vector<2x128xf32>
    %529 = arith.subf %528, %517 : vector<2x128xf32>
    %530 = vector.extract_strided_slice %341 {offsets = [10, 0], sizes = [2, 128], strides = [1, 1]} : vector<16x128xf32> to vector<2x128xf32>
    %531 = arith.mulf %529, %530 : vector<2x128xf32>
    %532 = arith.addf %527, %531 : vector<2x128xf32>
    %533 = arith.mulf %526, %532 : vector<2x128xf32>
    %cst_134 = arith.constant 1.000000e+00 : f32
    %534 = vector.broadcast %cst_134 : f32 to vector<2x128xf32>
    %535 = arith.subf %534, %526 : vector<2x128xf32>
    %536 = vector.extract_strided_slice %335 {offsets = [10, 0], sizes = [2, 128], strides = [1, 1]} : vector<16x128xf32> to vector<2x128xf32>
    %537 = arith.mulf %535, %536 : vector<2x128xf32>
    %538 = arith.addf %533, %537 : vector<2x128xf32>
    %c10_135 = arith.constant 10 : index
    %c0_136 = arith.constant 0 : index
    %539 = vector.load %arg23[%c10_135, %c0_136] : memref<16x128xf32, #tpu.memory_space<vmem>>, vector<2x128xf32>
    tpu.vector_store %arg23[%c10_135, %c0_136], %538 {strides = array<i32>} : memref<16x128xf32, #tpu.memory_space<vmem>>, vector<2x128xf32>,
    %540 = vector.extract_strided_slice %345 {offsets = [12, 0], sizes = [2, 128], strides = [1, 1]} : vector<16x128xf32> to vector<2x128xf32>
    %541 = vector.broadcast %350 : vector<1x128xf32> to vector<2x128xf32>
    %542 = arith.mulf %541, %532 : vector<2x128xf32>
    %543 = arith.addf %540, %542 : vector<2x128xf32>
    %544 = arith.negf %543 : vector<2x128xf32>
    %545 = math.exp %544 : vector<2x128xf32>
    %cst_137 = arith.constant 1.000000e+00 : f32
    %546 = vector.broadcast %cst_137 : f32 to vector<2x128xf32>
    %547 = arith.addf %546, %545 : vector<2x128xf32>
    %548 = arith.divf %546, %547 : vector<2x128xf32>
    %549 = vector.extract_strided_slice %349 {offsets = [12, 0], sizes = [2, 128], strides = [1, 1]} : vector<16x128xf32> to vector<2x128xf32>
    %550 = vector.broadcast %351 : vector<1x128xf32> to vector<2x128xf32>
    %551 = arith.mulf %550, %532 : vector<2x128xf32>
    %552 = arith.addf %549, %551 : vector<2x128xf32>
    %553 = arith.negf %552 : vector<2x128xf32>
    %554 = math.exp %553 : vector<2x128xf32>
    %cst_138 = arith.constant 1.000000e+00 : f32
    %555 = vector.broadcast %cst_138 : f32 to vector<2x128xf32>
    %556 = arith.addf %555, %554 : vector<2x128xf32>
    %557 = arith.divf %555, %556 : vector<2x128xf32>
    %558 = arith.mulf %548, %532 : vector<2x128xf32>
    %cst_139 = arith.constant 1.000000e+00 : f32
    %559 = vector.broadcast %cst_139 : f32 to vector<2x128xf32>
    %560 = arith.subf %559, %548 : vector<2x128xf32>
    %561 = vector.extract_strided_slice %341 {offsets = [12, 0], sizes = [2, 128], strides = [1, 1]} : vector<16x128xf32> to vector<2x128xf32>
    %562 = arith.mulf %560, %561 : vector<2x128xf32>
    %563 = arith.addf %558, %562 : vector<2x128xf32>
    %564 = arith.mulf %557, %563 : vector<2x128xf32>
    %cst_140 = arith.constant 1.000000e+00 : f32
    %565 = vector.broadcast %cst_140 : f32 to vector<2x128xf32>
    %566 = arith.subf %565, %557 : vector<2x128xf32>
    %567 = vector.extract_strided_slice %335 {offsets = [12, 0], sizes = [2, 128], strides = [1, 1]} : vector<16x128xf32> to vector<2x128xf32>
    %568 = arith.mulf %566, %567 : vector<2x128xf32>
    %569 = arith.addf %564, %568 : vector<2x128xf32>
    %c12_141 = arith.constant 12 : index
    %c0_142 = arith.constant 0 : index
    %570 = vector.load %arg23[%c12_141, %c0_142] : memref<16x128xf32, #tpu.memory_space<vmem>>, vector<2x128xf32>
    tpu.vector_store %arg23[%c12_141, %c0_142], %569 {strides = array<i32>} : memref<16x128xf32, #tpu.memory_space<vmem>>, vector<2x128xf32>,
    %571 = vector.extract_strided_slice %345 {offsets = [14, 0], sizes = [2, 128], strides = [1, 1]} : vector<16x128xf32> to vector<2x128xf32>
    %572 = vector.broadcast %350 : vector<1x128xf32> to vector<2x128xf32>
    %573 = arith.mulf %572, %563 : vector<2x128xf32>
    %574 = arith.addf %571, %573 : vector<2x128xf32>
    %575 = arith.negf %574 : vector<2x128xf32>
    %576 = math.exp %575 : vector<2x128xf32>
    %cst_143 = arith.constant 1.000000e+00 : f32
    %577 = vector.broadcast %cst_143 : f32 to vector<2x128xf32>
    %578 = arith.addf %577, %576 : vector<2x128xf32>
    %579 = arith.divf %577, %578 : vector<2x128xf32>
    %580 = vector.extract_strided_slice %349 {offsets = [14, 0], sizes = [2, 128], strides = [1, 1]} : vector<16x128xf32> to vector<2x128xf32>
    %581 = vector.broadcast %351 : vector<1x128xf32> to vector<2x128xf32>
    %582 = arith.mulf %581, %563 : vector<2x128xf32>
    %583 = arith.addf %580, %582 : vector<2x128xf32>
    %584 = arith.negf %583 : vector<2x128xf32>
    %585 = math.exp %584 : vector<2x128xf32>
    %cst_144 = arith.constant 1.000000e+00 : f32
    %586 = vector.broadcast %cst_144 : f32 to vector<2x128xf32>
    %587 = arith.addf %586, %585 : vector<2x128xf32>
    %588 = arith.divf %586, %587 : vector<2x128xf32>
    %589 = arith.mulf %579, %563 : vector<2x128xf32>
    %cst_145 = arith.constant 1.000000e+00 : f32
    %590 = vector.broadcast %cst_145 : f32 to vector<2x128xf32>
    %591 = arith.subf %590, %579 : vector<2x128xf32>
    %592 = vector.extract_strided_slice %341 {offsets = [14, 0], sizes = [2, 128], strides = [1, 1]} : vector<16x128xf32> to vector<2x128xf32>
    %593 = arith.mulf %591, %592 : vector<2x128xf32>
    %594 = arith.addf %589, %593 : vector<2x128xf32>
    %595 = arith.mulf %588, %594 : vector<2x128xf32>
    %cst_146 = arith.constant 1.000000e+00 : f32
    %596 = vector.broadcast %cst_146 : f32 to vector<2x128xf32>
    %597 = arith.subf %596, %588 : vector<2x128xf32>
    %598 = vector.extract_strided_slice %335 {offsets = [14, 0], sizes = [2, 128], strides = [1, 1]} : vector<16x128xf32> to vector<2x128xf32>
    %599 = arith.mulf %597, %598 : vector<2x128xf32>
    %600 = arith.addf %595, %599 : vector<2x128xf32>
    %c14_147 = arith.constant 14 : index
    %c0_148 = arith.constant 0 : index
    %601 = vector.load %arg23[%c14_147, %c0_148] : memref<16x128xf32, #tpu.memory_space<vmem>>, vector<2x128xf32>
    tpu.vector_store %arg23[%c14_147, %c0_148], %600 {strides = array<i32>} : memref<16x128xf32, #tpu.memory_space<vmem>>, vector<2x128xf32>,
    %c1_149 = arith.constant 1 : index
    %c0_150 = arith.constant 0 : index
    %c0_151 = arith.constant 0 : index
    %602 = vector.load %arg22[%c1_149, %c0_150, %c0_151] : memref<2x2x128xf32, #tpu.memory_space<vmem>>, vector<1x2x128xf32>
    %603 = vector.shape_cast %602 : vector<1x2x128xf32> to vector<2x128xf32>
    %604 = vector.shape_cast %594 : vector<2x128xf32> to vector<1x2x128xf32>
    tpu.vector_store %arg22[%c1_149, %c0_150, %c0_151], %604 {strides = array<i32>} : memref<2x2x128xf32, #tpu.memory_space<vmem>>, vector<1x2x128xf32>,
    %c0_152 = arith.constant 0 : index
    %c0_153 = arith.constant 0 : index
    %605 = vector.load %arg23[%c0_152, %c0_153] : memref<16x128xf32, #tpu.memory_space<vmem>>, vector<16x128xf32>
    %606 = arith.truncf %605 : vector<16x128xf32> to vector<16x128xbf16>
    %cst_154 = arith.constant dense<0.000000e+00> : vector<16x128xf32>
    %607 = tpu.matmul %606, %4, %cst_154 {dimension_numbers = #tpu.dot_dimension_numbers<[1], [0], [0], [1], [0, 0, 1, 1], [], []>} : vector<16x128xbf16>, vector<128x128xbf16>, vector<16x128xf32> -> vector<16x128xf32>
    %608 = arith.truncf %607 : vector<16x128xf32> to vector<16x128xbf16>
    %cst_155 = arith.constant dense<0.000000e+00> : vector<16x131xf32>
    %609 = tpu.matmul %608, %2, %cst_155 {dimension_numbers = #tpu.dot_dimension_numbers<[1], [1], [0], [0], [0, 0, 1, 0], [], []>} : vector<16x128xbf16>, vector<131x128xbf16>, vector<16x131xf32> -> vector<16x131xf32>
    %610 = vector.broadcast %3 : vector<1x131xf32> to vector<16x131xf32>
    %611 = arith.addf %609, %610 : vector<16x131xf32>
    %cst_156 = arith.constant dense<0xFF800000> : vector<16xf32>
    %612 = vector.multi_reduction <maximumf>, %611, %cst_156 [1] : vector<16x131xf32> to vector<16xf32>
    %613 = vector.shape_cast %612 : vector<16xf32> to vector<16x1xf32>
    %614 = vector.broadcast %613 : vector<16x1xf32> to vector<16x131xf32>
    %615 = arith.subf %611, %614 : vector<16x131xf32>
    %616 = math.exp %615 : vector<16x131xf32>
    %cst_157 = arith.constant dense<0.000000e+00> : vector<16xf32>
    %617 = vector.multi_reduction <add>, %616, %cst_157 [1] : vector<16x131xf32> to vector<16xf32>
    %618 = vector.shape_cast %617 : vector<16xf32> to vector<16x1xf32>
    %619 = math.log %618 : vector<16x1xf32>
    %620 = arith.addf %613, %619 : vector<16x1xf32>
    %621 = vector.broadcast %620 : vector<16x1xf32> to vector<16x131xf32>
    %622 = arith.subf %611, %621 : vector<16x131xf32>
    %623 = tpu.iota {dimensions = array<i32: 1>} : vector<16x131xi32>
    %624 = vector.broadcast %1 : vector<16x1xi32> to vector<16x131xi32>
    %625 = arith.cmpi eq, %623, %624 : vector<16x131xi32>
    %cst_158 = arith.constant 0.000000e+00 : f32
    %626 = vector.broadcast %cst_158 : f32 to vector<16x131xf32>
    %627 = arith.select %625, %622, %626 : vector<16x131xi1>, vector<16x131xf32>
    %cst_159 = arith.constant dense<0.000000e+00> : vector<16xf32>
    %628 = vector.multi_reduction <add>, %627, %cst_159 [1] : vector<16x131xf32> to vector<16xf32>
    %629 = vector.shape_cast %628 : vector<16xf32> to vector<16x1xf32>
    %c128_i32_160 = arith.constant 128 : i32
    %630 = vector.broadcast %c128_i32_160 : i32 to vector<16x1xi32>
    %631 = arith.cmpi slt, %1, %630 : vector<16x1xi32>
    %cst_161 = arith.constant 0.000000e+00 : f32
    %632 = vector.broadcast %cst_161 : f32 to vector<16x1xf32>
    %633 = arith.subf %632, %629 : vector<16x1xf32>
    %cst_162 = arith.constant 0.000000e+00 : f32
    %634 = vector.broadcast %cst_162 : f32 to vector<16x1xf32>
    %635 = arith.select %631, %633, %634 : vector<16x1xi1>, vector<16x1xf32>
    %cst_163 = arith.constant dense<0.000000e+00> : vector<16x128xf32>
    %636 = tpu.matmul %606, %5, %cst_163 {dimension_numbers = #tpu.dot_dimension_numbers<[1], [0], [0], [1], [0, 0, 1, 1], [], []>} : vector<16x128xbf16>, vector<128x128xbf16>, vector<16x128xf32> -> vector<16x128xf32>
    %637 = arith.truncf %636 : vector<16x128xf32> to vector<16x128xbf16>
    %cst_164 = arith.constant dense<0.000000e+00> : vector<16x64xf32>
    %638 = tpu.matmul %637, %8, %cst_164 {dimension_numbers = #tpu.dot_dimension_numbers<[1], [1], [0], [0], [0, 0, 1, 0], [], []>} : vector<16x128xbf16>, vector<64x128xbf16>, vector<16x64xf32> -> vector<16x64xf32>
    %639 = vector.broadcast %11 : vector<1x64xf32> to vector<16x64xf32>
    %640 = arith.addf %638, %639 : vector<16x64xf32>
    %cst_165 = arith.constant dense<0xFF800000> : vector<16xf32>
    %641 = vector.multi_reduction <maximumf>, %640, %cst_165 [1] : vector<16x64xf32> to vector<16xf32>
    %642 = vector.shape_cast %641 : vector<16xf32> to vector<16x1xf32>
    %643 = vector.broadcast %642 : vector<16x1xf32> to vector<16x64xf32>
    %644 = arith.subf %640, %643 : vector<16x64xf32>
    %645 = math.exp %644 : vector<16x64xf32>
    %cst_166 = arith.constant dense<0.000000e+00> : vector<16xf32>
    %646 = vector.multi_reduction <add>, %645, %cst_166 [1] : vector<16x64xf32> to vector<16xf32>
    %647 = vector.shape_cast %646 : vector<16xf32> to vector<16x1xf32>
    %648 = math.log %647 : vector<16x1xf32>
    %649 = arith.addf %642, %648 : vector<16x1xf32>
    %650 = vector.broadcast %649 : vector<16x1xf32> to vector<16x64xf32>
    %651 = arith.subf %640, %650 : vector<16x64xf32>
    %652 = tpu.iota {dimensions = array<i32: 1>} : vector<16x64xi32>
    %c128_i32_167 = arith.constant 128 : i32
    %653 = vector.broadcast %c128_i32_167 : i32 to vector<16x1xi32>
    %654 = arith.subi %1, %653 : vector<16x1xi32>
    %655 = vector.broadcast %654 : vector<16x1xi32> to vector<16x64xi32>
    %656 = arith.cmpi eq, %652, %655 : vector<16x64xi32>
    %cst_168 = arith.constant 0.000000e+00 : f32
    %657 = vector.broadcast %cst_168 : f32 to vector<16x64xf32>
    %658 = arith.select %656, %651, %657 : vector<16x64xi1>, vector<16x64xf32>
    %cst_169 = arith.constant dense<0.000000e+00> : vector<16xf32>
    %659 = vector.multi_reduction <add>, %658, %cst_169 [1] : vector<16x64xf32> to vector<16xf32>
    %660 = vector.shape_cast %659 : vector<16xf32> to vector<16x1xf32>
    %661 = vector.extract_strided_slice %622 {offsets = [0, 130], sizes = [16, 1], strides = [1, 1]} : vector<16x131xf32> to vector<16x1xf32>
    %c128_i32_170 = arith.constant 128 : i32
    %662 = vector.broadcast %c128_i32_170 : i32 to vector<16x1xi32>
    %663 = arith.cmpi sge, %1, %662 : vector<16x1xi32>
    %c192_i32_171 = arith.constant 192 : i32
    %664 = vector.broadcast %c192_i32_171 : i32 to vector<16x1xi32>
    %665 = arith.cmpi slt, %1, %664 : vector<16x1xi32>
    %666 = arith.andi %663, %665 : vector<16x1xi1>
    %667 = arith.addf %661, %660 : vector<16x1xf32>
    %cst_172 = arith.constant 0.000000e+00 : f32
    %668 = vector.broadcast %cst_172 : f32 to vector<16x1xf32>
    %669 = arith.subf %668, %667 : vector<16x1xf32>
    %670 = arith.select %666, %669, %635 : vector<16x1xi1>, vector<16x1xf32>
    %cst_173 = arith.constant dense<0.000000e+00> : vector<16x64xf32>
    %671 = tpu.matmul %606, %6, %cst_173 {dimension_numbers = #tpu.dot_dimension_numbers<[1], [0], [0], [1], [0, 0, 1, 1], [], []>} : vector<16x128xbf16>, vector<128x64xbf16>, vector<16x64xf32> -> vector<16x64xf32>
    %672 = arith.truncf %671 : vector<16x64xf32> to vector<16x64xbf16>
    %cst_174 = arith.constant dense<0.000000e+00> : vector<16x32xf32>
    %673 = tpu.matmul %672, %9, %cst_174 {dimension_numbers = #tpu.dot_dimension_numbers<[1], [1], [0], [0], [0, 0, 1, 0], [], []>} : vector<16x64xbf16>, vector<32x64xbf16>, vector<16x32xf32> -> vector<16x32xf32>
    %674 = vector.broadcast %12 : vector<1x32xf32> to vector<16x32xf32>
    %675 = arith.addf %673, %674 : vector<16x32xf32>
    %cst_175 = arith.constant dense<0xFF800000> : vector<16xf32>
    %676 = vector.multi_reduction <maximumf>, %675, %cst_175 [1] : vector<16x32xf32> to vector<16xf32>
    %677 = vector.shape_cast %676 : vector<16xf32> to vector<16x1xf32>
    %678 = vector.broadcast %677 : vector<16x1xf32> to vector<16x32xf32>
    %679 = arith.subf %675, %678 : vector<16x32xf32>
    %680 = math.exp %679 : vector<16x32xf32>
    %cst_176 = arith.constant dense<0.000000e+00> : vector<16xf32>
    %681 = vector.multi_reduction <add>, %680, %cst_176 [1] : vector<16x32xf32> to vector<16xf32>
    %682 = vector.shape_cast %681 : vector<16xf32> to vector<16x1xf32>
    %683 = math.log %682 : vector<16x1xf32>
    %684 = arith.addf %677, %683 : vector<16x1xf32>
    %685 = vector.broadcast %684 : vector<16x1xf32> to vector<16x32xf32>
    %686 = arith.subf %675, %685 : vector<16x32xf32>
    %687 = tpu.iota {dimensions = array<i32: 1>} : vector<16x32xi32>
    %c192_i32_177 = arith.constant 192 : i32
    %688 = vector.broadcast %c192_i32_177 : i32 to vector<16x1xi32>
    %689 = arith.subi %1, %688 : vector<16x1xi32>
    %690 = vector.broadcast %689 : vector<16x1xi32> to vector<16x32xi32>
    %691 = arith.cmpi eq, %687, %690 : vector<16x32xi32>
    %cst_178 = arith.constant 0.000000e+00 : f32
    %692 = vector.broadcast %cst_178 : f32 to vector<16x32xf32>
    %693 = arith.select %691, %686, %692 : vector<16x32xi1>, vector<16x32xf32>
    %cst_179 = arith.constant dense<0.000000e+00> : vector<16xf32>
    %694 = vector.multi_reduction <add>, %693, %cst_179 [1] : vector<16x32xf32> to vector<16xf32>
    %695 = vector.shape_cast %694 : vector<16xf32> to vector<16x1xf32>
    %696 = vector.extract_strided_slice %622 {offsets = [0, 129], sizes = [16, 1], strides = [1, 1]} : vector<16x131xf32> to vector<16x1xf32>
    %c192_i32_180 = arith.constant 192 : i32
    %697 = vector.broadcast %c192_i32_180 : i32 to vector<16x1xi32>
    %698 = arith.cmpi sge, %1, %697 : vector<16x1xi32>
    %c224_i32_181 = arith.constant 224 : i32
    %699 = vector.broadcast %c224_i32_181 : i32 to vector<16x1xi32>
    %700 = arith.cmpi slt, %1, %699 : vector<16x1xi32>
    %701 = arith.andi %698, %700 : vector<16x1xi1>
    %702 = arith.addf %696, %695 : vector<16x1xf32>
    %cst_182 = arith.constant 0.000000e+00 : f32
    %703 = vector.broadcast %cst_182 : f32 to vector<16x1xf32>
    %704 = arith.subf %703, %702 : vector<16x1xf32>
    %705 = arith.select %701, %704, %670 : vector<16x1xi1>, vector<16x1xf32>
    %cst_183 = arith.constant dense<0.000000e+00> : vector<16x64xf32>
    %706 = tpu.matmul %606, %7, %cst_183 {dimension_numbers = #tpu.dot_dimension_numbers<[1], [0], [0], [1], [0, 0, 1, 1], [], []>} : vector<16x128xbf16>, vector<128x64xbf16>, vector<16x64xf32> -> vector<16x64xf32>
    %707 = arith.truncf %706 : vector<16x64xf32> to vector<16x64xbf16>
    %cst_184 = arith.constant dense<0.000000e+00> : vector<16x32xf32>
    %708 = tpu.matmul %707, %10, %cst_184 {dimension_numbers = #tpu.dot_dimension_numbers<[1], [1], [0], [0], [0, 0, 1, 0], [], []>} : vector<16x64xbf16>, vector<32x64xbf16>, vector<16x32xf32> -> vector<16x32xf32>
    %709 = vector.broadcast %13 : vector<1x32xf32> to vector<16x32xf32>
    %710 = arith.addf %708, %709 : vector<16x32xf32>
    %cst_185 = arith.constant dense<0xFF800000> : vector<16xf32>
    %711 = vector.multi_reduction <maximumf>, %710, %cst_185 [1] : vector<16x32xf32> to vector<16xf32>
    %712 = vector.shape_cast %711 : vector<16xf32> to vector<16x1xf32>
    %713 = vector.broadcast %712 : vector<16x1xf32> to vector<16x32xf32>
    %714 = arith.subf %710, %713 : vector<16x32xf32>
    %715 = math.exp %714 : vector<16x32xf32>
    %cst_186 = arith.constant dense<0.000000e+00> : vector<16xf32>
    %716 = vector.multi_reduction <add>, %715, %cst_186 [1] : vector<16x32xf32> to vector<16xf32>
    %717 = vector.shape_cast %716 : vector<16xf32> to vector<16x1xf32>
    %718 = math.log %717 : vector<16x1xf32>
    %719 = arith.addf %712, %718 : vector<16x1xf32>
    %720 = vector.broadcast %719 : vector<16x1xf32> to vector<16x32xf32>
    %721 = arith.subf %710, %720 : vector<16x32xf32>
    %722 = tpu.iota {dimensions = array<i32: 1>} : vector<16x32xi32>
    %c224_i32_187 = arith.constant 224 : i32
    %723 = vector.broadcast %c224_i32_187 : i32 to vector<16x1xi32>
    %724 = arith.subi %1, %723 : vector<16x1xi32>
    %725 = vector.broadcast %724 : vector<16x1xi32> to vector<16x32xi32>
    %726 = arith.cmpi eq, %722, %725 : vector<16x32xi32>
    %cst_188 = arith.constant 0.000000e+00 : f32
    %727 = vector.broadcast %cst_188 : f32 to vector<16x32xf32>
    %728 = arith.select %726, %721, %727 : vector<16x32xi1>, vector<16x32xf32>
    %cst_189 = arith.constant dense<0.000000e+00> : vector<16xf32>
    %729 = vector.multi_reduction <add>, %728, %cst_189 [1] : vector<16x32xf32> to vector<16xf32>
    %730 = vector.shape_cast %729 : vector<16xf32> to vector<16x1xf32>
    %731 = vector.extract_strided_slice %622 {offsets = [0, 128], sizes = [16, 1], strides = [1, 1]} : vector<16x131xf32> to vector<16x1xf32>
    %c224_i32_190 = arith.constant 224 : i32
    %732 = vector.broadcast %c224_i32_190 : i32 to vector<16x1xi32>
    %733 = arith.cmpi sge, %1, %732 : vector<16x1xi32>
    %c256_i32 = arith.constant 256 : i32
    %734 = vector.broadcast %c256_i32 : i32 to vector<16x1xi32>
    %735 = arith.cmpi slt, %1, %734 : vector<16x1xi32>
    %736 = arith.andi %733, %735 : vector<16x1xi1>
    %737 = arith.addf %731, %730 : vector<16x1xf32>
    %cst_191 = arith.constant 0.000000e+00 : f32
    %738 = vector.broadcast %cst_191 : f32 to vector<16x1xf32>
    %739 = arith.subf %738, %737 : vector<16x1xf32>
    %740 = arith.select %736, %739, %705 : vector<16x1xi1>, vector<16x1xf32>
    %c0_192 = arith.constant 0 : index
    %c0_193 = arith.constant 0 : index
    %741 = vector.load %arg21[%c0_192, %c0_193] : memref<16x1xf32, #tpu.memory_space<vmem>>, vector<16x1xf32>
    tpu.vector_store %arg21[%c0_192, %c0_193], %740 {strides = array<i32>} : memref<16x1xf32, #tpu.memory_space<vmem>>, vector<16x1xf32>,
    return
  }
}

</mosaic_0001>

<bundles_post_ra>
// kernel: forward.1
= control target key start
LH: loop header
LB: loop body
LE: loop exit
PB: predicated region body
PF: predicated region fallthrough
CT: control target
= control target key end

     0   :  { %s5170_s0 = inlined_call_operand.vmem [shape: s32[16,1], index: 0, kind: input, shape index: {}]   ;;  %s5171_s1 = inlined_call_operand.vmem [shape: s32[16,1], index: 1, kind: input, shape index: {}]   ;;  %s5172_s2 = inlined_call_operand.vmem [shape: f32[2,2,128], index: 2, kind: input, shape index: {}]   ;;  %s5173_s3 = inlined_call_operand.vmem [shape: bf16[131,128], index: 3, kind: input, shape index: {}]   ;;  %s5174_s4 = inlined_call_operand.hbm [shape: f32[1,131], index: 4, kind: input, shape index: {}]   ;;  %s5175_s5 = inlined_call_operand.hbm [shape: bf16[128,128], index: 5, kind: input, shape index: {}]   ;;  %s5176_s6 = inlined_call_operand.hbm [shape: bf16[128,128], index: 6, kind: input, shape index: {}]   ;;  %s5177_s7 = inlined_call_operand.vmem [shape: bf16[128,64], index: 7, kind: input, shape index: {}]   ;;  %s5178_s8 = inlined_call_operand.vmem [shape: bf16[128,64], index: 8, kind: input, shape index: {}]   ;;  %s5179_s9 = inlined_call_operand.vmem [shape: bf16[64,128], index: 9, kind: input, shape index: {}]   ;;  %s5180_s10 = inlined_call_operand.vmem [shape: bf16[32,64], index: 10, kind: input, shape index: {}]   ;;  %s5181_s11 = inlined_call_operand.vmem [shape: bf16[32,64], index: 11, kind: input, shape index: {}]   ;;  %s5182_s12 = inlined_call_operand.hbm [shape: f32[1,64], index: 12, kind: input, shape index: {}]   ;;  %s5183_s13 = inlined_call_operand.hbm [shape: f32[1,32], index: 13, kind: input, shape index: {}]   ;;  %s5184_s14 = inlined_call_operand.hbm [shape: f32[1,32], index: 14, kind: input, shape index: {}]   ;;  %s5185_s15 = inlined_call_operand.vmem [shape: bf16[128,384], index: 15, kind: input, shape index: {}]   ;;  %s5186_s16 = inlined_call_operand.hbm [shape: f32[2,128], index: 16, kind: input, shape index: {}]   ;;  %s5187_s17 = inlined_call_operand.hbm [shape: f32[2,128], index: 17, kind: input, shape index: {}]   ;;  %s5188_s18 = inlined_call_operand.hbm [shape: bf16[128,384], index: 18, kind: input, shape index: {}]   ;;  %s5189_s19 = inlined_call_operand.hbm [shape: f32[2,128], index: 19, kind: input, shape index: {}]   ;;  %s5190_s20 = inlined_call_operand.hbm [shape: f32[2,128], index: 20, kind: input, shape index: {}]   ;;  %s5191_s21 = inlined_call_operand.vmem [shape: f32[16,1], index: 21, kind: output, shape index: {0}]   ;;  %s5192_s22 = inlined_call_operand.hbm [shape: f32[2,2,128], index: 22, kind: output, shape index: {1}]  }
   0x1   :  { %5202 = sst [smem:[#allocation29_spill]] %s5170_s0 }
   0x2   :  { %5203 = sst [smem:[#allocation30_spill]] %s5171_s1 }
   0x3   :  { %5204 = sst [smem:[#allocation31_spill]] %s5172_s2 }
   0x4   :  { %5205 = sst [smem:[#allocation32_spill]] %s5173_s3 }
   0x5   :  { %5206 = sst [smem:[#allocation33_spill]] %s5174_s4 }
   0x6   :  { %5207 = sst [smem:[#allocation34_spill]] %s5175_s5 }
   0x7   :  { %5208 = sst [smem:[#allocation35_spill]] %s5176_s6 }
   0x8   :  { %5209 = sst [smem:[#allocation36_spill]] %s5191_s21 }
   0x9   :  { %5210 = sst [smem:[#allocation37_spill]] %s5192_s22 }
   0xa   :  { %28 = vsyncpa [#allocation4], 0 }
   0xb   :  { %29 = vsyncpa [#allocation7], 0 }
   0xc   :  { %30 = vsyncpa [#allocation10], 0 }
   0xd   :  { %31 = vsyncpa [#allocation13], 0 }
   0xe   :  { %32 = vsyncpa [#allocation16], 0 }
   0xf   :  { %33 = vsyncpa [#allocation19], 0 }
  0x10   :  { %34 = vsyncpa [#allocation5], 0  ;;  %s3982_s3 = smov [#allocation6]   ;;  %s5211_s4 = sld [smem:[#allocation34_spill]] }
  0x11   :  { %s58_s28 = sshll.u32 %s3982_s3, 4  ;;  %s59_s28 = int_to_ptr.vmem [resolvable:$true] %s58_s28 }
  0x16   :  { %s3704_s0 = scalar_lea.hbm %s5211_s4, 1024 }
  0x17   :  { %p3705_p0 = scmp.ne.s32.totalorder %s5211_s4, %s3704_s0  ;;  %p3708_p1 = scmp.lt.u32.totalorder %s3704_s0, %s5211_s4 }
  0x19   :  { %p3710_p2 = pnand %p3708_p1, %p3705_p0 }
  0x1b   :  { %3713 = shalt.err (!%p3710_p2)
}
  0x1c   :  { %s3714_s6 = scalar_lea.vmem %s59_s28, 1024  ;;  %p3719_p4 = scmp.lt.s32.totalorder %s59_s28, %s59_s28 }
  0x1d   :  { %p3715_p3 = scmp.ne.s32.totalorder %s59_s28, %s3714_s6  ;;  %p3720_p5 = scmp.lt.s32.totalorder %s3714_s6, %s3714_s6 }
  0x1f   :  { %p3721_p6 = por %p3720_p5, %p3719_p4 }
  0x21   :  { %p3722_p7 = pnand %p3721_p6, %p3715_p3 }
  0x23   :  { %3725 = shalt.err (!%p3722_p7)
}
  0x24   :  { %s3983_s25 = smov 64   ;;  %s3984_s26 = smov 4  }
  0x25   :  { %64 = dma.hbm_to_vmem [thread:$0]  %s5211_s4, 1024, %s59_s28, [#allocation7], %s3983_s25, %s3983_s25, %s3984_s26  }
  0x26   :  { %s3985_s3 = smov [#allocation9]   ;;  %s3986_s30 = smov [#allocation12]  }
  0x27   :  { %s93_s29 = sshll.u32 %s3985_s3, 4  ;;  %s113_s0 = sshll.u32 %s3986_s30, 4  ;;  %s94_s29 = int_to_ptr.vmem [resolvable:$true] %s93_s29  ;;  %s114_s0 = int_to_ptr.vmem [resolvable:$true] %s113_s0 }
  0x28   :  { %s3726_s5 = scalar_lea.hbm %s5182_s12, 16 }
  0x29   :  { %p3727_p8 = scmp.ne.s32.totalorder %s5182_s12, %s3726_s5  ;;  %p3730_p9 = scmp.lt.u32.totalorder %s3726_s5, %s5182_s12 }
  0x2b   :  { %p3732_p10 = pnand %p3730_p9, %p3727_p8 }
  0x2d   :  { %3735 = shalt.err (!%p3732_p10)
}
  0x2e   :  { %s3736_s28 = scalar_lea.vmem %s94_s29, 16  ;;  %s3740_s4 = scalar_lea.vmem %s94_s29, 32 }
  0x2f   :  { %p3737_p11 = scmp.ne.s32.totalorder %s94_s29, %s3736_s28  ;;  %p3741_p12 = scmp.lt.s32.totalorder %s94_s29, %s94_s29 }
  0x30   :  { %p3742_p13 = scmp.lt.s32.totalorder %s3740_s4, %s3736_s28 }
  0x32   :  { %p3743_p0 = por %p3742_p13, %p3741_p12 }
  0x34   :  { %p3744_p1 = pnand %p3743_p0, %p3737_p11 }
  0x36   :  { %3747 = shalt.err (!%p3744_p1)
}
  0x37   :  { %96 = dma.hbm_to_vmem [thread:$0]  %s5182_s12, 16, %s94_s29, [#allocation10]  }
  0x38   :  { %s3748_s21 = scalar_lea.hbm %s5184_s14, 16 }
  0x39   :  { %p3749_p2 = scmp.ne.s32.totalorder %s5184_s14, %s3748_s21  ;;  %p3752_p3 = scmp.lt.u32.totalorder %s3748_s21, %s5184_s14 }
  0x3b   :  { %p3754_p4 = pnand %p3752_p3, %p3749_p2 }
  0x3d   :  { %3757 = shalt.err (!%p3754_p4)
}
  0x3e   :  { %s3758_s24 = scalar_lea.vmem %s114_s0, 16  ;;  %s3762_s6 = scalar_lea.vmem %s114_s0, 32 }
  0x3f   :  { %p3759_p5 = scmp.ne.s32.totalorder %s114_s0, %s3758_s24  ;;  %p3763_p6 = scmp.lt.s32.totalorder %s114_s0, %s114_s0 }
  0x40   :  { %p3764_p7 = scmp.lt.s32.totalorder %s3762_s6, %s3758_s24 }
  0x42   :  { %p3765_p8 = por %p3764_p7, %p3763_p6 }
  0x44   :  { %p3766_p9 = pnand %p3765_p8, %p3759_p5 }
  0x46   :  { %3769 = shalt.err (!%p3766_p9)
}
  0x47   :  { %116 = dma.hbm_to_vmem [thread:$0]  %s5184_s14, 16, %s114_s0, [#allocation13]  }
  0x48   :  { %s3987_s28 = smov [#allocation15]   ;;  %s3988_s2 = smov [#allocation18]  }
  0x49   :  { %s135_s4 = sshll.u32 %s3987_s28, 4  ;;  %s157_s27 = sshll.u32 %s3988_s2, 4  ;;  %s136_s4 = int_to_ptr.vmem [resolvable:$true] %s135_s4  ;;  %s158_s27 = int_to_ptr.vmem [resolvable:$true] %s157_s27 }
  0x4a   :  { %s3770_s21 = scalar_lea.hbm %s5187_s17, 32 }
  0x4b   :  { %p3771_p10 = scmp.ne.s32.totalorder %s5187_s17, %s3770_s21  ;;  %p3774_p11 = scmp.lt.u32.totalorder %s3770_s21, %s5187_s17 }
  0x4d   :  { %p3776_p12 = pnand %p3774_p11, %p3771_p10 }
  0x4f   :  { %3779 = shalt.err (!%p3776_p12)
}
  0x50   :  { %s3780_s14 = scalar_lea.vmem %s136_s4, 32  ;;  %p3785_p0 = scmp.lt.s32.totalorder %s136_s4, %s136_s4 }
  0x51   :  { %p3781_p13 = scmp.ne.s32.totalorder %s136_s4, %s3780_s14  ;;  %p3786_p1 = scmp.lt.s32.totalorder %s3780_s14, %s3780_s14 }
  0x53   :  { %p3787_p2 = por %p3786_p1, %p3785_p0 }
  0x55   :  { %p3788_p3 = pnand %p3787_p2, %p3781_p13 }
  0x57   :  { %3791 = shalt.err (!%p3788_p3)
}
  0x58   :  { %138 = dma.hbm_to_vmem [thread:$0]  %s5187_s17, 32, %s136_s4, [#allocation16]  }
  0x59   :  { %s3792_s29 = scalar_lea.hbm %s5189_s19, 32 }
  0x5a   :  { %p3793_p4 = scmp.ne.s32.totalorder %s5189_s19, %s3792_s29  ;;  %p3796_p5 = scmp.lt.u32.totalorder %s3792_s29, %s5189_s19 }
  0x5c   :  { %p3798_p6 = pnand %p3796_p5, %p3793_p4 }
  0x5e   :  { %3801 = shalt.err (!%p3798_p6)
}
  0x5f   :  { %s3802_s21 = scalar_lea.vmem %s158_s27, 32  ;;  %p3807_p8 = scmp.lt.s32.totalorder %s158_s27, %s158_s27 }
  0x60   :  { %p3803_p7 = scmp.ne.s32.totalorder %s158_s27, %s3802_s21  ;;  %p3808_p9 = scmp.lt.s32.totalorder %s3802_s21, %s3802_s21 }
  0x62   :  { %p3809_p10 = por %p3808_p9, %p3807_p8 }
  0x64   :  { %p3810_p11 = pnand %p3809_p10, %p3803_p7 }
  0x66   :  { %3813 = shalt.err (!%p3810_p11)
}
  0x67   :  { %160 = dma.hbm_to_vmem [thread:$0]  %s5189_s19, 32, %s158_s27, [#allocation19]  }
  0x68   :  { %s3989_s22 = smov [#allocation3]   ;;  %s3990_s1 = smov [#allocation8]  }
  0x69   :  { %s49_s23 = sshll.u32 %s3989_s22, 4  ;;  %s70_s5 = sshll.u32 %s3990_s1, 4  ;;  %s50_s23 = int_to_ptr.vmem [resolvable:$true] %s49_s23  ;;  %s71_s5 = int_to_ptr.vmem [resolvable:$true] %s70_s5 }
  0x6a   :  { %s5212_s24 = sld [smem:[#allocation33_spill]] }
  0x70   :  { %s3814_s6 = scalar_lea.hbm %s5212_s24, 32 }
  0x71   :  { %p3815_p12 = scmp.ne.s32.totalorder %s5212_s24, %s3814_s6  ;;  %p3818_p13 = scmp.lt.u32.totalorder %s3814_s6, %s5212_s24 }
  0x73   :  { %p3820_p0 = pnand %p3818_p13, %p3815_p12 }
  0x75   :  { %3823 = shalt.err (!%p3820_p0)
}
  0x76   :  { %s3824_s19 = scalar_lea.vmem %s50_s23, 32  ;;  %p3829_p2 = scmp.lt.s32.totalorder %s50_s23, %s50_s23 }
  0x77   :  { %p3825_p1 = scmp.ne.s32.totalorder %s50_s23, %s3824_s19  ;;  %p3830_p3 = scmp.lt.s32.totalorder %s3824_s19, %s3824_s19 }
  0x79   :  { %p3831_p4 = por %p3830_p3, %p3829_p2 }
  0x7b   :  { %p3832_p5 = pnand %p3831_p4, %p3825_p1 }
  0x7d   :  { %3835 = shalt.err (!%p3832_p5)
}
  0x7e   :  { %52 = dma.hbm_to_vmem [thread:$0]  %s5212_s24, 32, %s50_s23, [#allocation4]  }
  0x7f   :  { %s5213_s17 = sld [smem:[#allocation35_spill]] }
  0x85   :  { %s3836_s4 = scalar_lea.hbm %s5213_s17, 1024 }
  0x86   :  { %p3837_p6 = scmp.ne.s32.totalorder %s5213_s17, %s3836_s4  ;;  %p3840_p7 = scmp.lt.u32.totalorder %s3836_s4, %s5213_s17 }
  0x88   :  { %p3842_p8 = pnand %p3840_p7, %p3837_p6 }
  0x8a   :  { %3845 = shalt.err (!%p3842_p8)
}
  0x8b   :  { %s3846_s6 = scalar_lea.vmem %s71_s5, 1024  ;;  %p3851_p10 = scmp.lt.s32.totalorder %s71_s5, %s71_s5 }
  0x8c   :  { %p3847_p9 = scmp.ne.s32.totalorder %s71_s5, %s3846_s6  ;;  %p3852_p11 = scmp.lt.s32.totalorder %s3846_s6, %s3846_s6 }
  0x8e   :  { %p3853_p12 = por %p3852_p11, %p3851_p10 }
  0x90   :  { %p3854_p13 = pnand %p3853_p12, %p3847_p9 }
  0x92   :  { %3857 = shalt.err (!%p3854_p13)
}
  0x93   :  { %76 = dma.hbm_to_vmem [thread:$0]  %s5213_s17, 1024, %s71_s5, [#allocation7], %s3983_s25, %s3983_s25, %s3984_s26  }
  0x94   :  { %s3991_s12 = smov [#allocation11]   ;;  %s3992_s28 = smov [#allocation14]  }
  0x95   :  { %s103_s29 = sshll.u32 %s3991_s12, 4  ;;  %s125_s2 = sshll.u32 %s3992_s28, 4  ;;  %s104_s29 = int_to_ptr.vmem [resolvable:$true] %s103_s29  ;;  %s126_s2 = int_to_ptr.vmem [resolvable:$true] %s125_s2 }
  0x96   :  { %s3858_s3 = scalar_lea.hbm %s5183_s13, 16 }
  0x97   :  { %p3859_p0 = scmp.ne.s32.totalorder %s5183_s13, %s3858_s3  ;;  %p3862_p1 = scmp.lt.u32.totalorder %s3858_s3, %s5183_s13 }
  0x99   :  { %p3864_p2 = pnand %p3862_p1, %p3859_p0 }
  0x9b   :  { %3867 = shalt.err (!%p3864_p2)
}
  0x9c   :  { %s3868_s25 = scalar_lea.vmem %s104_s29, 16  ;;  %s3872_s26 = scalar_lea.vmem %s104_s29, 32 }
  0x9d   :  { %p3869_p3 = scmp.ne.s32.totalorder %s104_s29, %s3868_s25  ;;  %p3873_p4 = scmp.lt.s32.totalorder %s104_s29, %s104_s29 }
  0x9e   :  { %p3874_p5 = scmp.lt.s32.totalorder %s3872_s26, %s3868_s25 }
  0xa0   :  { %p3875_p6 = por %p3874_p5, %p3873_p4 }
  0xa2   :  { %p3876_p7 = pnand %p3875_p6, %p3869_p3 }
  0xa4   :  { %3879 = shalt.err (!%p3876_p7)
}
  0xa5   :  { %106 = dma.hbm_to_vmem [thread:$0]  %s5183_s13, 16, %s104_s29, [#allocation10]  }
  0xa6   :  { %s3880_s0 = scalar_lea.hbm %s5186_s16, 32 }
  0xa7   :  { %p3881_p8 = scmp.ne.s32.totalorder %s5186_s16, %s3880_s0  ;;  %p3884_p9 = scmp.lt.u32.totalorder %s3880_s0, %s5186_s16 }
  0xa9   :  { %p3886_p10 = pnand %p3884_p9, %p3881_p8 }
  0xab   :  { %3889 = shalt.err (!%p3886_p10)
}
  0xac   :  { %s3890_s28 = scalar_lea.vmem %s126_s2, 32  ;;  %p3895_p12 = scmp.lt.s32.totalorder %s126_s2, %s126_s2 }
  0xad   :  { %p3891_p11 = scmp.ne.s32.totalorder %s126_s2, %s3890_s28  ;;  %p3896_p13 = scmp.lt.s32.totalorder %s3890_s28, %s3890_s28 }
  0xaf   :  { %p3897_p0 = por %p3896_p13, %p3895_p12 }
  0xb1   :  { %p3898_p1 = pnand %p3897_p0, %p3891_p11 }
  0xb3   :  { %3901 = shalt.err (!%p3898_p1)
}
  0xb4   :  { %128 = dma.hbm_to_vmem [thread:$0]  %s5186_s16, 32, %s126_s2, [#allocation13]  }
  0xb5   :  { %s3993_s19 = smov [#allocation17]   ;;  %s3902_s21 = scalar_lea.hbm %s5188_s18, 3072 }
  0xb6   :  { %s144_s27 = sshll.u32 %s3993_s19, 4  ;;  %p3903_p2 = scmp.ne.s32.totalorder %s5188_s18, %s3902_s21  ;;  %s145_s27 = int_to_ptr.vmem [resolvable:$true] %s144_s27 }
  0xb7   :  { %p3906_p3 = scmp.lt.u32.totalorder %s3902_s21, %s5188_s18 }
  0xb9   :  { %p3908_p4 = pnand %p3906_p3, %p3903_p2 }
  0xbb   :  { %3911 = shalt.err (!%p3908_p4)
}
  0xbc   :  { %s3912_s5 = scalar_lea.vmem %s145_s27, 3072  ;;  %p3917_p6 = scmp.lt.s32.totalorder %s145_s27, %s145_s27 }
  0xbd   :  { %p3913_p5 = scmp.ne.s32.totalorder %s145_s27, %s3912_s5  ;;  %p3918_p7 = scmp.lt.s32.totalorder %s3912_s5, %s3912_s5 }
  0xbf   :  { %p3919_p8 = por %p3918_p7, %p3917_p6 }
  0xc1   :  { %p3920_p9 = pnand %p3919_p8, %p3913_p5 }
  0xc3   :  { %3923 = shalt.err (!%p3920_p9)
}
  0xc4   :  { %s3994_s16 = smov 192   ;;  %s3995_s2 = smov 12  }
  0xc5   :  { %150 = dma.hbm_to_vmem [thread:$0]  %s5188_s18, 3072, %s145_s27, [#allocation16], %s3994_s16, %s3994_s16, %s3995_s2  }
  0xc6   :  { %s3996_s14 = smov [#allocation20]   ;;  %s3924_s24 = scalar_lea.hbm %s5190_s20, 32 }
  0xc7   :  { %s167_s0 = sshll.u32 %s3996_s14, 4  ;;  %p3925_p10 = scmp.ne.s32.totalorder %s5190_s20, %s3924_s24  ;;  %s168_s0 = int_to_ptr.vmem [resolvable:$true] %s167_s0 }
  0xc8   :  { %p3928_p11 = scmp.lt.u32.totalorder %s3924_s24, %s5190_s20 }
  0xca   :  { %p3930_p12 = pnand %p3928_p11, %p3925_p10 }
  0xcc   :  { %3933 = shalt.err (!%p3930_p12)
}
  0xcd   :  { %s3934_s19 = scalar_lea.vmem %s168_s0, 32  ;;  %p3939_p0 = scmp.lt.s32.totalorder %s168_s0, %s168_s0 }
  0xce   :  { %p3935_p13 = scmp.ne.s32.totalorder %s168_s0, %s3934_s19  ;;  %p3940_p1 = scmp.lt.s32.totalorder %s3934_s19, %s3934_s19 }
  0xd0   :  { %p3941_p2 = por %p3940_p1, %p3939_p0 }
  0xd2   :  { %p3942_p3 = pnand %p3941_p2, %p3935_p13 }
  0xd4   :  { %3945 = shalt.err (!%p3942_p3)
}
  0xd5   :  { %170 = dma.hbm_to_vmem [thread:$0]  %s5190_s20, 32, %s168_s0, [#allocation19]  }
  0xd6   :  { %3968 = dma.done.wait [#allocation4], 32  }
  0xd7   :  { %3969 = vsyncadd [#allocation4], 4294967264 }
  0xd8   :  { %3970 = dma.done.wait [#allocation7], 2048  }
  0xd9   :  { %3971 = vsyncadd [#allocation7], 4294965248 }
  0xda   :  { %3972 = dma.done.wait [#allocation10], 32  }
  0xdb   :  { %3973 = vsyncadd [#allocation10], 4294967264 }
  0xdc   :  { %3974 = dma.done.wait [#allocation13], 48  }
  0xdd   :  { %3975 = vsyncadd [#allocation13], 4294967248 }
  0xde   :  { %3976 = dma.done.wait [#allocation16], 3104  }
  0xdf   :  { %3977 = vsyncadd [#allocation16], 4294964192 }
  0xe0   :  { %3978 = dma.done.wait [#allocation19], 64  }
  0xe1   :  { %3979 = vsyncadd [#allocation19], 4294967232  ;;  %v3997_v0 = vmov 0   ;;  %v3998_v1 = vmov 0.0   ;;  %s5214_s30 = sld [smem:[#allocation29_spill]]  ;;  %s5215_s26 = sld [smem:[#allocation32_spill]]  ;;  %v310_v22 = vlaneseq }
  0xe2   :  { %3394 = vset.pattern.permute.xlu1 %v3997_v0  ;;  %3393 = vset.pattern.permute.xlu0 %v3997_v0  ;;  %vm3999_vm0 = vmmov 0   ;;  %v3401_v11 = vld [vmem:[%s5179_s9] sm:$0xff]   ;;  %v3403_v13 = vld [vmem:[%s5179_s9 + $0x8] sm:$0xff]   ;;  %v3405_v16 = vld [vmem:[%s5179_s9 + $0x10] sm:$0xff]   ;;  %v4000_v29 = vmov 1.0|1.0  }
  0xe3   :  { %3081 = vmatprep.subr.bf16.mxu0 %v3998_v1  ;;  %3101 = vmatprep.subr.bf16.mxu1 %v3998_v1  ;;  %v3406_v18 = vld [vmem:[%s5179_s9 + $0x18] sm:$0xff]   ;;  %v4322_v24 = vand.u32 127, %v310_v22  ;;  %v3407_v27 = vld [vmem:[%s5180_s10] sm:$0xff]   ;;  %vm454_vm6 = vcmask 523264   ;;  %v3408_v33 = vld [vmem:[%s5180_s10 + $0x8] sm:$0xff]   ;;  %vm705_vm9 = vcmask 261120  }
  0xe4   :  { %3097 = vmatprep.mubr.msk.bf16.mxu0 %vm3999_vm0, %v3998_v1  ;;  %3109 = vmatprep.mubr.msk.bf16.mxu1 %vm3999_vm0, %v3998_v1  ;;  %v4338_v34 = vld [vmem:[#allocation8] sm:$0xff]   ;;  %v3409_v40 = vld [vmem:[%s5181_s11] sm:$0xff]   ;;  %v3410_v43 = vld [vmem:[%s5181_s11 + $0x8] sm:$0xff]   ;;  %s5216_s27 = sld [smem:[#allocation31_spill]]  ;;  %vm2216_vm12 = vcmask 23552   ;;  %s5217_s1 = sld [smem:[#allocation30_spill]] }
  0xe5   :  { %3102 = vmatpush3.bf16.msra.mxu1 %v3401_v11  ;;  %v4362_v44 = vld [vmem:[#allocation8 + $0x8] sm:$0xff]   ;;  %v4370_v48 = vld [vmem:[#allocation8 + $0x10] sm:$0xff]   ;;  %v4375_v49 = vld [vmem:[#allocation8 + $0x18] sm:$0xff]   ;;  %s4001_s6 = smov 126   ;;  %s4002_s23 = smov 127  }
  0xe6   :  { %3103 = vmatprep.subr.bf16.mxu1 %v3998_v1  ;;  %v4379_v50 = vld [vmem:[#allocation8 + $0x20] sm:$0xff]   ;;  %v4383_v51 = vld [vmem:[#allocation8 + $0x28] sm:$0xff]   ;;  %v4387_v52 = vld [vmem:[#allocation8 + $0x30] sm:$0xff]   ;;  %s4003_s24 = smov [#allocation21]  }
  0xe7   :  { %v205_v2 = vld [vmem:[%s5214_s30] sm:$0xff]  ;;  %v206_v3 = vld [vmem:[%s5214_s30 + $0x8] sm:$0xff]  ;;  %v3397_v10 = vld [vmem:[%s5215_s26 + $0x10] sm:$0xff]   ;;  %s2779_s12 = sshll.u32 %s4003_s24, 4  ;;  %s2780_s12 = int_to_ptr.vmem [resolvable:$true] %s2779_s12 }
  0xe8   :  { %313 = vperm.xlu1 %3394, %v205_v2   ;;  %v2810_v4 = vadd.s32 4294967168, %v205_v2  ;;  %v2811_v5 = vadd.s32 4294967168, %v206_v3  ;;  %v3395_v6 = vld [vmem:[%s5215_s26] sm:$0xff]   ;;  %v3396_v7 = vld [vmem:[%s5215_s26 + $0x8] sm:$0xff]   ;;  %v2836_v8 = vadd.s32 4294967104, %v206_v3  ;;  %v2835_v9 = vadd.s32 4294967104, %v205_v2  ;;  %p3951_p5 = scmp.lt.s32.totalorder %s2780_s12, %s2780_s12 }
  0xe9   :  { %3082 = vmatpush3.bf16.msra.mxu0 %v3395_v6  ;;  %v2852_v12 = vadd.s32 4294967072, %v206_v3  ;;  %v2851_v14 = vadd.s32 4294967072, %v205_v2  ;;  %v3398_v15 = vld [vmem:[%s5215_s26 + $0x18] sm:$0xff]   ;;  %3104 = vmatpush3.bf16.msra.mxu1 %v3403_v13  ;;  %v3399_v17 = vld [vmem:[%s5215_s26 + $0x20] sm:$0xff]   ;;  %v3400_v19 = vld [vmem:[%s5215_s26 + $0x28] sm:$0xff]  }
  0xea   :  { %418 = vperm.xlu0 %3393, %v2810_v4   ;;  %3083 = vmatprep.subr.bf16.mxu0 %v3998_v1  ;;  %v3402_v20 = vld [vmem:[%s5215_s26 + $0x30] sm:$0xff]   ;;  %v3404_v21 = vld [vmem:[%s5215_s26 + $0x38] sm:$0xff]  }
  0xeb   :  { %3105 = vmatprep.subr.bf16.mxu1 %v3998_v1  ;;  %v4391_v53 = vld [vmem:[#allocation8 + $0x38] sm:$0xff]   ;;  %v4395_v62 = vld [vmem:[#allocation6] sm:$0xff]  }
  0xec   :  { %316 = vperm.xlu1 %3394, %v206_v3  }
  0xed   :  { %3084 = vmatpush3.bf16.msra.mxu0 %v3396_v7  ;;  %3106 = vmatpush3.bf16.msra.mxu1 %v3405_v16  ;;  %v4425_v16 = vld [vmem:[#allocation6 + $0x20] sm:$0xff]  }
  0xee   :  { %421 = vperm.xlu0 %3393, %v2811_v5   ;;  %3085 = vmatprep.subr.bf16.mxu0 %v3998_v1 }
  0xef   :  { %3107 = vmatprep.subr.bf16.mxu1 %v3998_v1 }
  0xf0   :  { %684 = vperm.xlu1 %3394, %v2836_v8   ;;  %v4407_v8 = vld [vmem:[#allocation6 + $0x8] sm:$0xff]  }
  0xf1   :  { %3086 = vmatpush3.bf16.msra.mxu0 %v3397_v10  ;;  %3108 = vmatpush3.bf16.msra.mxu1 %v3406_v18  ;;  %v4433_v18 = vld [vmem:[#allocation6 + $0x30] sm:$0xff]  }
  0xf2   :  { %681 = vperm.xlu0 %3393, %v2835_v9   ;;  %3087 = vmatprep.subr.bf16.mxu0 %v3998_v1 }
  0xf3   :  { %3113 = vmatprep.subr.bf16.mxu1 %v3998_v1 }
  0xf4   :  { %867 = vperm.xlu1 %3394, %v2852_v12  }
  0xf5   :  { %3088 = vmatpush3.bf16.msra.mxu0 %v3398_v15  ;;  %v4421_v15 = vld [vmem:[#allocation6 + $0x18] sm:$0xff]  }
  0xf6   :  { %864 = vperm.xlu0 %3393, %v2851_v14   ;;  %3089 = vmatprep.subr.bf16.mxu0 %v3998_v1  ;;  %v4417_v14 = vld [vmem:[#allocation6 + $0x10] sm:$0xff]  }
  0xf9   :  { %3090 = vmatpush3.bf16.msra.mxu0 %v3399_v17  ;;  %v4429_v17 = vld [vmem:[#allocation6 + $0x28] sm:$0xff]  }
  0xfa   :  { %3091 = vmatprep.subr.bf16.mxu0 %v3998_v1 }
  0xfd   :  { %3092 = vmatpush3.bf16.msra.mxu0 %v3400_v19  ;;  %v4437_v19 = vld [vmem:[#allocation6 + $0x38] sm:$0xff]  }
  0xfe   :  { %3093 = vmatprep.subr.bf16.mxu0 %v3998_v1 }
 0x101   :  { %3094 = vmatpush3.bf16.msra.mxu0 %v3402_v20  ;;  %v3427_v20 = vld [vmem:[%s5177_s7] sm:$0xff]  }
 0x102   :  { %3095 = vmatprep.subr.bf16.mxu0 %v3998_v1 }
 0x105   :  { %3096 = vmatpush3.bf16.msra.mxu0 %v3404_v21  ;;  %v795_v21 = vsel %vm454_vm6, %v3427_v20, 0 }
 0x106   :  { %3153 = vmatprep.subr.bf16.mxu0 %v3998_v1 }
 0x167   :  { %v314_v23 = vpop.permute.xlu1 %313 }
 0x168   :  { %vm318_vm1 = vcmp.eq.s32.totalorder %v4322_v24, %v314_v23  ;;  %v3443_v23 = vld [vmem:[%s5185_s15] ss:$12 sps:$4 sm:$0xff]  }
 0x169   :  { %v419_v25 = vpop.permute.xlu0 %418 }
 0x16a   :  { %vm423_vm2 = vcmp.eq.s32.totalorder %v4322_v24, %v419_v25  ;;  %v3445_v25 = vld [vmem:[%s5185_s15 + $0x4] ss:$12 sps:$4 sm:$0xff]  }
 0x16b   :  { %v317_v26 = vpop.permute.xlu1 %316  ;;  %v2812_v30 = vsel %vm423_vm2, 1.0, %v3998_v1 }
 0x16c   :  { %vm319_vm3 = vcmp.eq.s32.totalorder %v4322_v24, %v317_v26  ;;  %v3448_v26 = vld [vmem:[%s5185_s15 + $0x1c] ss:$12 sps:$4 sm:$0xff]  }
 0x16d   :  { %vm2808_vm4 = vmpackc.low %vm319_vm3, %vm318_vm1  ;;  %v422_v28 = vpop.permute.xlu0 %421 }
 0x16e   :  { %vm424_vm5 = vcmp.eq.s32.totalorder %v4322_v24, %v422_v28  ;;  %3098 = vmatmul.mubr.msk.bf16.vlgmr.msra.gmra.mrb[0].mxu0 %vm2808_vm4, %v4000_v29  ;;  %v3446_v28 = vld [vmem:[%s5185_s15 + $0x18] ss:$12 sps:$4 sm:$0xff]   ;;  %v3451_v29 = vld [vmem:[%s5185_s15 + $0x34] ss:$12 sps:$4 sm:$0xff]  }
 0x16f   :  { %v2813_v31 = vsel %vm424_vm5, 1.0, %v3998_v1  ;;  %3154 = vmatpush3.bf16.msra.mxu0 %v3407_v27  ;;  %v685_v32 = vpop.permute.xlu1 %684  ;;  %3157 = vmatprep.mubr.msk.bf16.mxu0 %vm3999_vm0, %v3998_v1  ;;  %v3428_v27 = vld [vmem:[%s5177_s7 + $0x8] sm:$0xff]  }
 0x170   :  { %v429_v35 = vpack.c.bf16 %v2813_v31, %v2812_v30  ;;  %vm687_vm7 = vcmp.eq.s32.totalorder %v4322_v24, %v685_v32  ;;  %3155 = vmatprep.subr.bf16.mxu0 %v3998_v1  ;;  %v798_v30 = vsel %vm454_vm6, %v3428_v27, 0  ;;  %v3449_v31 = vld [vmem:[%s5185_s15 + $0x30] ss:$12 sps:$4 sm:$0xff]   ;;  %v3454_v32 = vld [vmem:[%s5185_s15 + $0x4c] ss:$12 sps:$4 sm:$0xff]  }
 0x171   :  { %v2838_v36 = vsel %vm687_vm7, 1.0, %v3998_v1  ;;  %v682_v37 = vpop.permute.xlu0 %681  ;;  %v3469_v27 = vld [vmem:[%s5185_s15 + $0x38] ss:$12 sps:$4 sm:$0xff]  }
 0x172   :  { %vm686_vm8 = vcmp.eq.s32.totalorder %v4322_v24, %v682_v37  ;;  %3110 = vmatmul.mubr.msk.bf16.vlgmr.msra.gmra.mrb[0].mxu1 %vm454_vm6, %v429_v35  ;;  %v3452_v35 = vld [vmem:[%s5185_s15 + $0x48] ss:$12 sps:$4 sm:$0xff]  }
 0x173   :  { %v2837_v38 = vsel %vm686_vm8, 1.0, %v3998_v1  ;;  %3156 = vmatpush3.bf16.msra.mxu0 %v3408_v33  ;;  %v868_v39 = vpop.permute.xlu1 %867  ;;  %3114 = vmatpush3.bf16.xpose.msra.mxu1 %v4338_v34  ;;  %v3429_v33 = vld [vmem:[%s5177_s7 + $0x10] sm:$0xff]  }
 0x174   :  { %v692_v41 = vpack.c.bf16 %v2838_v36, %v2837_v38  ;;  %3181 = vmatprep.subr.bf16.mxu0 %v3998_v1  ;;  %3115 = vmatprep.subr.bf16.mxu1 %v3998_v1  ;;  %vm870_vm10 = vcmp.eq.s32.totalorder %v4322_v24, %v868_v39  ;;  %v3457_v36 = vld [vmem:[%s5185_s15 + $0x64] ss:$12 sps:$4 sm:$0xff]   ;;  %v801_v37 = vsel %vm454_vm6, %v3429_v33, 0  ;;  %v3455_v38 = vld [vmem:[%s5185_s15 + $0x60] ss:$12 sps:$4 sm:$0xff]   ;;  %v1293_v33 = vshrl.u32 %v310_v22, 7 }
 0x175   :  { %v865_v42 = vpop.permute.xlu0 %864  ;;  %3129 = vmatprep.mubr.msk.bf16.mxu1 %vm3999_vm0, %v3998_v1  ;;  %v2854_v45 = vsel %vm870_vm10, 1.0, %v3998_v1  ;;  %v3460_v39 = vld [vmem:[%s5185_s15 + $0x7c] ss:$12 sps:$4 sm:$0xff]  }
 0x176   :  { %vm869_vm11 = vcmp.eq.s32.totalorder %v4322_v24, %v865_v42  ;;  %3158 = vmatmul.mubr.msk.bf16.vlgmr.msra.gmra.mrb[4].mxu0 %vm705_vm9, %v692_v41  ;;  %v3458_v41 = vld [vmem:[%s5185_s15 + $0x78] ss:$12 sps:$4 sm:$0xff]   ;;  %v3463_v42 = vld [vmem:[%s5185_s15 + $0x94] ss:$12 sps:$4 sm:$0xff]  }
 0x177   :  { %3182 = vmatpush3.bf16.msra.mxu0 %v3409_v40  ;;  %3185 = vmatprep.mubr.msk.bf16.mxu0 %vm3999_vm0, %v3998_v1  ;;  %v2853_v46 = vsel %vm869_vm11, 1.0, %v3998_v1  ;;  %v3430_v40 = vld [vmem:[%s5177_s7 + $0x18] sm:$0xff]  }
 0x178   :  { %3183 = vmatprep.subr.bf16.mxu0 %v3998_v1  ;;  %v875_v47 = vpack.c.bf16 %v2854_v45, %v2853_v46  ;;  %v3461_v45 = vld [vmem:[%s5185_s15 + $0x90] ss:$12 sps:$4 sm:$0xff]   ;;  %v3431_v46 = vld [vmem:[%s5177_s7 + $0x20] sm:$0xff]  }
 0x17b   :  { %3184 = vmatpush3.bf16.msra.mxu0 %v3410_v43  ;;  %3116 = vmatpush3.bf16.xpose.msra.mxu1 %v4362_v44  ;;  %v804_v43 = vsel %vm454_vm6, %v3430_v40, 0 }
 0x17c   :  { %3117 = vmatprep.subr.bf16.mxu1 %v3998_v1  ;;  %1206 = vmatprep.subr.bf16.mxu0 %v3445_v25  ;;  %v3442_v25 = vld [vmem:[%s5178_s8 + $0x38] sm:$0xff]  }
 0x17e   :  { %3186 = vmatmul.mubr.msk.bf16.vlgmr.msra.gmra.mrb[8].mxu0 %vm705_vm9, %v875_v47  ;;  %v807_v47 = vsel %vm454_vm6, %v3431_v46, 0 }
 0x17f   :  { %1238 = vmatprep.mubr.bf16.mxu0 %v3997_v0  ;;  %1207 = vmatpush1.bf16.msra.mxu0 %v3443_v23 }
 0x180   :  { %1208 = vmatprep.subr.bf16.mxu0 %v3448_v26  ;;  %v998_v26 = vsel %vm454_vm6, %v3442_v25, 0 }
 0x183   :  { %3118 = vmatpush3.bf16.xpose.msra.mxu1 %v4370_v48  ;;  %1209 = vmatpush1.bf16.msra.mxu0 %v3446_v28  ;;  %v3470_v28 = vld [vmem:[%s5185_s15 + $0x50] ss:$12 sps:$4 sm:$0xff]  }
 0x184   :  { %3119 = vmatprep.subr.bf16.mxu1 %v3998_v1  ;;  %1210 = vmatprep.subr.bf16.mxu0 %v3451_v29  ;;  %v3471_v29 = vld [vmem:[%s5185_s15 + $0x68] ss:$12 sps:$4 sm:$0xff]  }
 0x187   :  { %1211 = vmatpush1.bf16.msra.mxu0 %v3449_v31  ;;  %v3473_v31 = vld [vmem:[%s5185_s15 + $0x98] ss:$12 sps:$4 sm:$0xff]  }
 0x188   :  { %1212 = vmatprep.subr.bf16.mxu0 %v3454_v32  ;;  %v3474_v32 = vld [vmem:[%s5185_s15 + $0xb0] ss:$12 sps:$4 sm:$0xff]  }
 0x18b   :  { %3120 = vmatpush3.bf16.xpose.msra.mxu1 %v4375_v49  ;;  %1213 = vmatpush1.bf16.msra.mxu0 %v3452_v35  ;;  %v4641_v35 = vsub.s32 0, %v1293_v33 }
 0x18c   :  { %3121 = vmatprep.subr.bf16.mxu1 %v3998_v1  ;;  %1214 = vmatprep.subr.bf16.mxu0 %v3457_v36  ;;  %v1290_v36 = vld [vmem:[#allocation14] sm:$0x3] }
 0x18f   :  { %1215 = vmatpush1.bf16.msra.mxu0 %v3455_v38  ;;  %v4644_v38 = vrot.slane %v1290_v36, %v4641_v35 }
 0x190   :  { %1216 = vmatprep.subr.bf16.mxu0 %v3460_v39  ;;  %v1304_v39 = vld [vmem:[%s5216_s27] sm:$0x3] }
 0x193   :  { %3122 = vmatpush3.bf16.xpose.msra.mxu1 %v4379_v50  ;;  %1217 = vmatpush1.bf16.msra.mxu0 %v3458_v41 }
 0x194   :  { %3123 = vmatprep.subr.bf16.mxu1 %v3998_v1  ;;  %1218 = vmatprep.subr.bf16.mxu0 %v3463_v42  ;;  %v1309_v42 = vmul.f32 %v4644_v38, %v1304_v39 }
 0x197   :  { %1219 = vmatpush1.bf16.msra.mxu0 %v3461_v45 }
 0x19b   :  { %3124 = vmatpush3.bf16.xpose.msra.mxu1 %v4383_v51 }
 0x19c   :  { %3125 = vmatprep.subr.bf16.mxu1 %v3998_v1 }
 0x1a3   :  { %3126 = vmatpush3.bf16.xpose.msra.mxu1 %v4387_v52 }
 0x1a4   :  { %3127 = vmatprep.subr.bf16.mxu1 %v3998_v1 }
 0x1ab   :  { %3128 = vmatpush3.bf16.xpose.msra.mxu1 %v4391_v53 }
 0x1ac   :  { %3133 = vmatprep.subr.bf16.mxu1 %v3998_v1 }
 0x241   :  { %v407_v54 = vpop.f32.mrb[0].mxu0 }
 0x242   :  { %v3099_v55 = vpop.f32.mrb[1].mxu0 }
 0x243   :  { %v410_v56 = vpop.f32.mrb[2].mxu0 }
 0x244   :  { %v414_v57 = vpack.c.bf16 %v410_v56, %v407_v54  ;;  %v3100_v58 = vpop.f32.mrb[3].mxu0  ;;  %v3432_v54 = vld [vmem:[%s5177_s7 + $0x28] sm:$0xff]   ;;  %v3433_v56 = vld [vmem:[%s5177_s7 + $0x30] sm:$0xff]  }
 0x245   :  { %v492_v59 = vpop.f32.mrb[0].mxu1  ;;  %v810_v55 = vsel %vm454_vm6, %v3432_v54, 0  ;;  %v3434_v58 = vld [vmem:[%s5177_s7 + $0x38] sm:$0xff]  }
 0x246   :  { %v3111_v60 = vpop.f32.mrb[1].mxu1 }
 0x247   :  { %v495_v61 = vpop.f32.mrb[2].mxu1  ;;  %v3435_v60 = vld [vmem:[%s5178_s8] sm:$0xff]  }
 0x248   :  { %v499_v63 = vpack.c.bf16 %v495_v61, %v492_v59  ;;  %v3112_v2 = vpop.f32.mrb[3].mxu1  ;;  %v816_v59 = vsel %vm454_vm6, %v3434_v58, 0  ;;  %v977_v61 = vsel %vm454_vm6, %v3435_v60, 0  ;;  %v4660_v58 = vsub.s32 1, %v1293_v33 }
 0x249   :  { %v4397_v3 = vpop.f32.mrb[4].mxu0 }
 0x24a   :  { %3130 = vmatmul.mubr.bf16.vlgmr.msra.gmra.mrb[4].mxu1 %v499_v63  ;;  %v3159_v4 = vpop.f32.mrb[5].mxu0  ;;  %v3436_v63 = vld [vmem:[%s5178_s8 + $0x8] sm:$0xff]  }
 0x24b   :  { %3134 = vmatpush3.bf16.xpose.msra.mxu1 %v4395_v62  ;;  %v4400_v5 = vpop.f32.mrb[6].mxu0  ;;  %3149 = vmatprep.mubr.msk.bf16.mxu1 %vm3999_vm0, %v3998_v1  ;;  %v980_v2 = vsel %vm454_vm6, %v3436_v63, 0 }
 0x24c   :  { %v750_v6 = vpack.c.bf16 %v4400_v5, %v4397_v3  ;;  %v3160_v7 = vpop.f32.mrb[7].mxu0  ;;  %3135 = vmatprep.subr.bf16.mxu1 %v3998_v1  ;;  %v3437_v3 = vld [vmem:[%s5178_s8 + $0x10] sm:$0xff]   ;;  %v3438_v5 = vld [vmem:[%s5178_s8 + $0x18] sm:$0xff]  }
 0x24d   :  { %v983_v4 = vsel %vm454_vm6, %v3437_v3, 0  ;;  %v3439_v7 = vld [vmem:[%s5178_s8 + $0x20] sm:$0xff]  }
 0x251   :  { %v4409_v9 = vpop.f32.mrb[8].mxu0 }
 0x252   :  { %v3187_v10 = vpop.f32.mrb[9].mxu0 }
 0x253   :  { %3136 = vmatpush3.bf16.xpose.msra.mxu1 %v4407_v8  ;;  %v4412_v11 = vpop.f32.mrb[10].mxu0  ;;  %v989_v10 = vsel %vm454_vm6, %v3439_v7, 0 }
 0x254   :  { %v932_v12 = vpack.c.bf16 %v4412_v11, %v4409_v9  ;;  %v3188_v13 = vpop.f32.mrb[11].mxu0  ;;  %3137 = vmatprep.subr.bf16.mxu1 %v3998_v1  ;;  %v3467_v9 = vld [vmem:[%s5185_s15 + $0x8] ss:$12 sps:$4 sm:$0xff]  }
 0x255   :  { %v3440_v13 = vld [vmem:[%s5178_s8 + $0x28] sm:$0xff]  }
 0x256   :  { %v992_v20 = vsel %vm454_vm6, %v3440_v13, 0 }
 0x25b   :  { %3138 = vmatpush3.bf16.xpose.msra.mxu1 %v4417_v14 }
 0x25c   :  { %3139 = vmatprep.subr.bf16.mxu1 %v3998_v1 }
 0x263   :  { %3140 = vmatpush3.bf16.xpose.msra.mxu1 %v4421_v15 }
 0x264   :  { %3141 = vmatprep.subr.bf16.mxu1 %v3998_v1 }
 0x26b   :  { %3142 = vmatpush3.bf16.xpose.msra.mxu1 %v4425_v16 }
 0x26c   :  { %3143 = vmatprep.subr.bf16.mxu1 %v3998_v1 }
 0x273   :  { %3144 = vmatpush3.bf16.xpose.msra.mxu1 %v4429_v17 }
 0x274   :  { %3145 = vmatprep.subr.bf16.mxu1 %v3998_v1 }
 0x27b   :  { %3146 = vmatpush3.bf16.xpose.msra.mxu1 %v4433_v18 }
 0x27c   :  { %3147 = vmatprep.subr.bf16.mxu1 %v3998_v1 }
 0x283   :  { %3148 = vmatpush3.bf16.xpose.msra.mxu1 %v4437_v19 }
 0x284   :  { %3161 = vmatprep.subr.bf16.mxu1 %v3998_v1 }
 0x28a   :  { %3150 = vmatmul.mubr.bf16.vlgmr.msra.gmra.mrb[4].mxu1 %v414_v57  ;;  %v813_v57 = vsel %vm454_vm6, %v3433_v56, 0 }
 0x28b   :  { %3162 = vmatpush3.bf16.xpose.msra.mxu1 %v795_v21  ;;  %3177 = vmatprep.mubr.msk.bf16.mxu1 %vm3999_vm0, %v3998_v1  ;;  %v3441_v21 = vld [vmem:[%s5178_s8 + $0x30] sm:$0xff]  }
 0x28c   :  { %3163 = vmatprep.subr.bf16.mxu1 %v3998_v1  ;;  %v995_v23 = vsel %vm454_vm6, %v3441_v21, 0 }
 0x293   :  { %3164 = vmatpush3.bf16.xpose.msra.mxu1 %v798_v30  ;;  %v3472_v30 = vld [vmem:[%s5185_s15 + $0x80] ss:$12 sps:$4 sm:$0xff]  }
 0x294   :  { %3165 = vmatprep.subr.bf16.mxu1 %v3998_v1 }
 0x29b   :  { %3166 = vmatpush3.bf16.xpose.msra.mxu1 %v801_v37  ;;  %v1291_v37 = vld [vmem:[#allocation15] sm:$0x3] }
 0x29c   :  { %3167 = vmatprep.subr.bf16.mxu1 %v3998_v1  ;;  %v1295_v40 = vrot.slane %v1291_v37, %v4641_v35  ;;  %v1301_v60 = vrot.slane %v1291_v37, %v4660_v58 }
 0x2a3   :  { %3168 = vmatpush3.bf16.xpose.msra.mxu1 %v804_v43 }
 0x2a4   :  { %3169 = vmatprep.subr.bf16.mxu1 %v3998_v1 }
 0x2ab   :  { %3170 = vmatpush3.bf16.xpose.msra.mxu1 %v807_v47 }
 0x2ac   :  { %3171 = vmatprep.subr.bf16.mxu1 %v3998_v1 }
 0x2b3   :  { %3172 = vmatpush3.bf16.xpose.msra.mxu1 %v810_v55 }
 0x2b4   :  { %3173 = vmatprep.subr.bf16.mxu1 %v3998_v1 }
 0x2bb   :  { %3174 = vmatpush3.bf16.xpose.msra.mxu1 %v813_v57 }
 0x2bc   :  { %3175 = vmatprep.subr.bf16.mxu1 %v3998_v1 }
 0x2c3   :  { %3176 = vmatpush3.bf16.xpose.msra.mxu1 %v816_v59  ;;  %v4663_v59 = vrot.slane %v1290_v36, %v4660_v58 }
 0x2c4   :  { %3189 = vmatprep.subr.bf16.mxu1 %v3998_v1 }
 0x2c5   :  { %v1321_v63 = vmul.f32 %v4663_v59, %v1304_v39 }
 0x2ca   :  { %3178 = vmatmul.mubr.msk.bf16.vlgmr.msra.gmra.mrb[4].mxu1 %vm454_vm6, %v750_v6  ;;  %v986_v6 = vsel %vm454_vm6, %v3438_v5, 0 }
 0x2cb   :  { %3190 = vmatpush3.bf16.xpose.msra.mxu1 %v977_v61  ;;  %3205 = vmatprep.mubr.msk.bf16.mxu1 %vm3999_vm0, %v3998_v1 }
 0x2cc   :  { %3191 = vmatprep.subr.bf16.mxu1 %v3998_v1 }
 0x2d3   :  { %3192 = vmatpush3.bf16.xpose.msra.mxu1 %v980_v2 }
 0x2d4   :  { %3193 = vmatprep.subr.bf16.mxu1 %v3998_v1 }
 0x2db   :  { %3194 = vmatpush3.bf16.xpose.msra.mxu1 %v983_v4 }
 0x2dc   :  { %3195 = vmatprep.subr.bf16.mxu1 %v3998_v1 }
 0x2e3   :  { %3196 = vmatpush3.bf16.xpose.msra.mxu1 %v986_v6 }
 0x2e4   :  { %3197 = vmatprep.subr.bf16.mxu1 %v3998_v1 }
 0x2eb   :  { %3198 = vmatpush3.bf16.xpose.msra.mxu1 %v989_v10 }
 0x2ec   :  { %3199 = vmatprep.subr.bf16.mxu1 %v3998_v1 }
 0x2f3   :  { %3200 = vmatpush3.bf16.xpose.msra.mxu1 %v992_v20 }
 0x2f4   :  { %3201 = vmatprep.subr.bf16.mxu1 %v3998_v1 }
 0x2fb   :  { %3202 = vmatpush3.bf16.xpose.msra.mxu1 %v995_v23 }
 0x2fc   :  { %3203 = vmatprep.subr.bf16.mxu1 %v3998_v1 }
 0x303   :  { %3204 = vmatpush3.bf16.xpose.msra.mxu1 %v998_v26 }
 0x304   :  { %3269 = vmatprep.subr.bf16.mxu1 %v3998_v1 }
 0x30a   :  { %3206 = vmatmul.mubr.msk.bf16.vlgmr.msra.gmra.mrb[4].mxu1 %vm454_vm6, %v932_v12  ;;  %v3468_v12 = vld [vmem:[%s5185_s15 + $0x20] ss:$12 sps:$4 sm:$0xff]  }
 0x30b   :  { %3270 = vmatpush3.bf16.msra.mxu1 %v4338_v34  ;;  %3285 = vmatprep.mubr.msk.bf16.mxu1 %vm3999_vm0, %v3998_v1  ;;  %v3466_v34 = vld [vmem:[%s5185_s15 + $0xac] ss:$12 sps:$4 sm:$0xff]  }
 0x30c   :  { %3271 = vmatprep.subr.bf16.mxu1 %v3998_v1  ;;  %1220 = vmatprep.subr.bf16.mxu0 %v3466_v34 }
 0x30f   :  { %3272 = vmatpush3.bf16.msra.mxu1 %v4362_v44  ;;  %v3464_v44 = vld [vmem:[%s5185_s15 + $0xa8] ss:$12 sps:$4 sm:$0xff]  }
 0x310   :  { %3273 = vmatprep.subr.bf16.mxu1 %v3998_v1  ;;  %1221 = vmatpush1.bf16.msra.mxu0 %v3464_v44 }
 0x311   :  { %3209 = vmatprep.subr.bf16.mxu0 %v3998_v1 }
 0x313   :  { %3274 = vmatpush3.bf16.msra.mxu1 %v4370_v48 }
 0x314   :  { %3275 = vmatprep.subr.bf16.mxu1 %v3998_v1 }
 0x317   :  { %3276 = vmatpush3.bf16.msra.mxu1 %v4375_v49 }
 0x318   :  { %3277 = vmatprep.subr.bf16.mxu1 %v3998_v1 }
 0x31b   :  { %3278 = vmatpush3.bf16.msra.mxu1 %v4379_v50 }
 0x31c   :  { %3279 = vmatprep.subr.bf16.mxu1 %v3998_v1 }
 0x31f   :  { %3280 = vmatpush3.bf16.msra.mxu1 %v4383_v51 }
 0x320   :  { %3281 = vmatprep.subr.bf16.mxu1 %v3998_v1 }
 0x323   :  { %3282 = vmatpush3.bf16.msra.mxu1 %v4387_v52 }
 0x324   :  { %3283 = vmatprep.subr.bf16.mxu1 %v3998_v1 }
 0x327   :  { %3284 = vmatpush3.bf16.msra.mxu1 %v4391_v53 }
 0x328   :  { %3301 = vmatprep.subr.bf16.mxu1 %v3998_v1 }
 0x3dd   :  { %v1034_v48 = vpop.f32.mrb[4].mxu1 }
 0x3de   :  { %v3207_v49 = vpop.f32.mrb[5].mxu1  ;;  %v4600_v51 = vmul.f32 11.313708, %v1034_v48 }
 0x3df   :  { %v1037_v50 = vpop.f32.mrb[6].mxu1 }
 0x3e0   :  { %v4602_v52 = vmul.f32 11.313708, %v1037_v50  ;;  %v3208_v53 = vpop.f32.mrb[7].mxu1 }
 0x3e2   :  { %v1045_v11 = vpack.c.bf16 %v4602_v52, %v4600_v51 }
 0x3e4   :  { %1239 = vmatmul.mubr.bf16.vlgmr.msra.gmra.mrb[12].mxu0 %v1045_v11 }
 0x3e5   :  { %3210 = vmatpush3.bf16.msra.mxu0 %v3467_v9  ;;  %3225 = vmatprep.mubr.msk.bf16.mxu0 %vm3999_vm0, %v3998_v1 }
 0x3e6   :  { %3211 = vmatprep.subr.bf16.mxu0 %v3998_v1 }
 0x3e9   :  { %3212 = vmatpush3.bf16.msra.mxu0 %v3468_v12 }
 0x3ea   :  { %3213 = vmatprep.subr.bf16.mxu0 %v3998_v1 }
 0x3ed   :  { %3214 = vmatpush3.bf16.msra.mxu0 %v3469_v27 }
 0x3ee   :  { %3215 = vmatprep.subr.bf16.mxu0 %v3998_v1 }
 0x3f1   :  { %3216 = vmatpush3.bf16.msra.mxu0 %v3470_v28 }
 0x3f2   :  { %3217 = vmatprep.subr.bf16.mxu0 %v3998_v1 }
 0x3f5   :  { %3218 = vmatpush3.bf16.msra.mxu0 %v3471_v29 }
 0x3f6   :  { %3219 = vmatprep.subr.bf16.mxu0 %v3998_v1 }
 0x3f9   :  { %3220 = vmatpush3.bf16.msra.mxu0 %v3472_v30 }
 0x3fa   :  { %3221 = vmatprep.subr.bf16.mxu0 %v3998_v1 }
 0x3fd   :  { %3222 = vmatpush3.bf16.msra.mxu0 %v3473_v31 }
 0x3fe   :  { %3223 = vmatprep.subr.bf16.mxu0 %v3998_v1 }
 0x401   :  { %3224 = vmatpush3.bf16.msra.mxu0 %v3474_v32 }
 0x404   :  { %3226 = vmatmul.mubr.bf16.vlgmr.msra.gmra.mrb[16].mxu0 %v1045_v11 }
 0x405   :  { %1772 = vmatprep.mubr.bf16.mxu0 %v3997_v0 }
 0x4b7   :  { %v4650_v41 = vpop.f32.mrb[12].mxu0 }
 0x4b8   :  { %v1242_v43 = vpop.f32.mrb[13].mxu0 }
 0x4b9   :  { %v4653_v45 = vadd.f32 %v1295_v40, %v1242_v43  ;;  %v4655_v22 = vpop.f32.mrb[14].mxu0 }
 0x4ba   :  { %v1246_v46 = vpop.f32.mrb[15].mxu0 }
 0x4bb   :  { %v1310_v47 = vadd.f32 %v1309_v42, %v4653_v45  ;;  %v4658_v54 = vadd.f32 %v1295_v40, %v1246_v46 }
 0x4bd   :  { %v2891_v55 = vmul.f32 -1.442695, %v1310_v47 }
 0x4bf   :  { %3508 = vpow2.f32 %v2891_v55 }
 0x4c9   :  { %v3509_v56 = vpop.eup %3508 }
 0x4ca   :  { %v1314_v57 = vadd.f32 1.0, %v3509_v56 }
 0x4cc   :  { %3510 = vrcp.f32 %v1314_v57 }
 0x4d6   :  { %v3511_v61 = vpop.eup %3510 }
 0x4d7   :  { %v1330_v2 = vsub.f32 1.0, %v3511_v61  ;;  %v1283_v3 = vpop.f32.mrb[16].mxu0  ;;  %v1329_v6 = vmul.f32 %v3511_v61, %v1304_v39 }
 0x4d8   :  { %v4667_v4 = vadd.f32 %v1301_v60, %v1283_v3  ;;  %v3227_v5 = vpop.f32.mrb[17].mxu0 }
 0x4d9   :  { %v1331_v7 = vmul.f32 %v1330_v2, %v4650_v41  ;;  %v1286_v10 = vpop.f32.mrb[18].mxu0 }
 0x4da   :  { %v1322_v13 = vadd.f32 %v1321_v63, %v4667_v4  ;;  %v4671_v20 = vadd.f32 %v1301_v60, %v1286_v10  ;;  %v3228_v21 = vpop.f32.mrb[19].mxu0 }
 0x4db   :  { %v1332_v23 = vadd.f32 %v1331_v7, %v1329_v6 }
 0x4dc   :  { %v2892_v25 = vmul.f32 -1.442695, %v1322_v13 }
 0x4dd   :  { %v1338_v26 = vmul.f32 %v1332_v23, %v4644_v38  ;;  %v1349_v34 = vmul.f32 %v1332_v23, %v4663_v59  ;;  %v1361_v42 = vrot.slane %v1332_v23, 6 }
 0x4de   :  { %3512 = vpow2.f32 %v2892_v25 }
 0x4df   :  { %v1340_v44 = vrot.slane %v1338_v26, 6  ;;  %v1351_v48 = vrot.slane %v1349_v34, 6 }
 0x4e1   :  { %v1342_v49 = vadd.f32 %v1340_v44, %v4653_v45  ;;  %v1353_v50 = vadd.f32 %v1351_v48, %v4667_v4 }
 0x4e3   :  { %v2893_v53 = vmul.f32 -1.442695, %v1342_v49  ;;  %v2894_v9 = vmul.f32 -1.442695, %v1353_v50 }
 0x4e5   :  { %3514 = vpow2.f32 %v2893_v53 }
 0x4e6   :  { %3516 = vpow2.f32 %v2894_v9 }
 0x4e8   :  { %v3513_v11 = vpop.eup %3512 }
 0x4e9   :  { %v1326_v12 = vadd.f32 1.0, %v3513_v11 }
 0x4eb   :  { %3518 = vrcp.f32 %v1326_v12 }
 0x4ef   :  { %v3515_v27 = vpop.eup %3514 }
 0x4f0   :  { %v3517_v28 = vpop.eup %3516  ;;  %v1346_v29 = vadd.f32 1.0, %v3515_v27 }
 0x4f1   :  { %v1357_v30 = vadd.f32 1.0, %v3517_v28 }
 0x4f2   :  { %3520 = vrcp.f32 %v1346_v29 }
 0x4f3   :  { %3522 = vrcp.f32 %v1357_v30 }
 0x4f5   :  { %v3519_v31 = vpop.eup %3518 }
 0x4f6   :  { %v1334_v32 = vsub.f32 1.0, %v3519_v31  ;;  %v1333_v33 = vmul.f32 %v3519_v31, %v1332_v23 }
 0x4f8   :  { %v1335_v36 = vmul.f32 %v1334_v32, %v4600_v51 }
 0x4fa   :  { %v1336_v37 = vadd.f32 %v1335_v36, %v1333_v33 }
 0x4fc   :  { %v3521_v39 = vpop.eup %3520  ;;  %1337 = vst [vmem:[#allocation2] sm:$0x3] %v1336_v37 }
 0x4fd   :  { %v3523_v40 = vpop.eup %3522  ;;  %v1364_v43 = vsub.f32 1.0, %v3521_v39  ;;  %v1363_v46 = vmul.f32 %v3521_v39, %v1361_v42 }
 0x4fe   :  { %v1368_v55 = vsub.f32 1.0, %v3523_v40 }
 0x4ff   :  { %v1365_v47 = vmul.f32 %v1364_v43, %v4650_v41 }
 0x500   :  { %v1369_v61 = vmul.f32 %v1368_v55, %v4600_v51 }
 0x501   :  { %v1366_v56 = vadd.f32 %v1365_v47, %v1363_v46 }
 0x503   :  { %v1372_v57 = vmul.f32 %v1366_v56, %v4644_v38  ;;  %v1367_v60 = vmul.f32 %v3523_v40, %v1366_v56  ;;  %v1383_v63 = vmul.f32 %v1366_v56, %v4663_v59  ;;  %v1395_v48 = vrot.slane %v1366_v56, 6 }
 0x505   :  { %v1374_v2 = vrot.slane %v1372_v57, 6  ;;  %v1370_v3 = vadd.f32 %v1369_v61, %v1367_v60  ;;  %v1385_v5 = vrot.slane %v1383_v63, 6 }
 0x507   :  { %v1376_v6 = vadd.f32 %v1374_v2, %v4653_v45  ;;  %1371 = vst [vmem:[#allocation2] sm:$0xc] %v1370_v3  ;;  %v1387_v7 = vadd.f32 %v1385_v5, %v4667_v4 }
 0x509   :  { %v2895_v10 = vmul.f32 -1.442695, %v1376_v6  ;;  %v2896_v13 = vmul.f32 -1.442695, %v1387_v7 }
 0x50b   :  { %3524 = vpow2.f32 %v2895_v10 }
 0x50c   :  { %3526 = vpow2.f32 %v2896_v13 }
 0x515   :  { %v3525_v21 = vpop.eup %3524 }
 0x516   :  { %v3527_v23 = vpop.eup %3526  ;;  %v1380_v25 = vadd.f32 1.0, %v3525_v21 }
 0x517   :  { %v1391_v26 = vadd.f32 1.0, %v3527_v23  ;;  %v3477_v23 = vld [vmem:[#allocation17 + $0x4] ss:$12 sps:$4 sm:$0xff]  }
 0x518   :  { %3528 = vrcp.f32 %v1380_v25  ;;  %v3475_v25 = vld [vmem:[#allocation17] ss:$12 sps:$4 sm:$0xff]   ;;  %1740 = vmatprep.subr.bf16.mxu0 %v3477_v23 }
 0x519   :  { %3530 = vrcp.f32 %v1391_v26  ;;  %1741 = vmatpush1.bf16.msra.mxu0 %v3475_v25 }
 0x522   :  { %v3529_v34 = vpop.eup %3528 }
 0x523   :  { %v3531_v44 = vpop.eup %3530  ;;  %v1398_v49 = vsub.f32 1.0, %v3529_v34  ;;  %v1397_v50 = vmul.f32 %v3529_v34, %v1395_v48  ;;  %v3480_v34 = vld [vmem:[#allocation17 + $0x1c] ss:$12 sps:$4 sm:$0xff]  }
 0x524   :  { %v1402_v9 = vsub.f32 1.0, %v3531_v44  ;;  %1742 = vmatprep.subr.bf16.mxu0 %v3480_v34  ;;  %v3481_v48 = vld [vmem:[#allocation17 + $0x30] ss:$12 sps:$4 sm:$0xff]  }
 0x525   :  { %v1399_v53 = vmul.f32 %v1398_v49, %v4650_v41  ;;  %v3486_v49 = vld [vmem:[#allocation17 + $0x4c] ss:$12 sps:$4 sm:$0xff]  }
 0x526   :  { %v1403_v28 = vmul.f32 %v1402_v9, %v4600_v51 }
 0x527   :  { %v1400_v11 = vadd.f32 %v1399_v53, %v1397_v50  ;;  %v3484_v50 = vld [vmem:[#allocation17 + $0x48] ss:$12 sps:$4 sm:$0xff]  }
 0x529   :  { %v1406_v12 = vmul.f32 %v1400_v11, %v4644_v38  ;;  %v1401_v27 = vmul.f32 %v3531_v44, %v1400_v11  ;;  %v1417_v29 = vmul.f32 %v1400_v11, %v4663_v59  ;;  %v1429_v56 = vrot.slane %v1400_v11, 6  ;;  %v3483_v44 = vld [vmem:[#allocation17 + $0x34] ss:$12 sps:$4 sm:$0xff]  }
 0x52b   :  { %v1408_v30 = vrot.slane %v1406_v12, 6  ;;  %v1404_v31 = vadd.f32 %v1403_v28, %v1401_v27  ;;  %v1419_v32 = vrot.slane %v1417_v29, 6  ;;  %v3489_v27 = vld [vmem:[#allocation17 + $0x64] ss:$12 sps:$4 sm:$0xff]   ;;  %v3487_v28 = vld [vmem:[#allocation17 + $0x60] ss:$12 sps:$4 sm:$0xff]  }
 0x52c   :  { %v3492_v29 = vld [vmem:[#allocation17 + $0x7c] ss:$12 sps:$4 sm:$0xff]  }
 0x52d   :  { %v1410_v33 = vadd.f32 %v1408_v30, %v4653_v45  ;;  %1405 = vst [vmem:[#allocation2] sm:$0x30] %v1404_v31  ;;  %v1421_v36 = vadd.f32 %v1419_v32, %v4667_v4  ;;  %v3490_v30 = vld [vmem:[#allocation17 + $0x78] ss:$12 sps:$4 sm:$0xff]   ;;  %v3493_v31 = vld [vmem:[#allocation17 + $0x90] ss:$12 sps:$4 sm:$0xff]  }
 0x52e   :  { %v3495_v32 = vld [vmem:[#allocation17 + $0x94] ss:$12 sps:$4 sm:$0xff]  }
 0x52f   :  { %v2897_v37 = vmul.f32 -1.442695, %v1410_v33  ;;  %v2898_v39 = vmul.f32 -1.442695, %v1421_v36  ;;  %v3498_v33 = vld [vmem:[#allocation17 + $0xac] ss:$12 sps:$4 sm:$0xff]  }
 0x531   :  { %3532 = vpow2.f32 %v2897_v37  ;;  %v3496_v37 = vld [vmem:[#allocation17 + $0xa8] ss:$12 sps:$4 sm:$0xff]  }
 0x532   :  { %3534 = vpow2.f32 %v2898_v39 }
 0x53b   :  { %v3533_v40 = vpop.eup %3532 }
 0x53c   :  { %v3535_v42 = vpop.eup %3534  ;;  %v1414_v43 = vadd.f32 1.0, %v3533_v40 }
 0x53d   :  { %v1425_v46 = vadd.f32 1.0, %v3535_v42 }
 0x53e   :  { %3536 = vrcp.f32 %v1414_v43 }
 0x53f   :  { %3538 = vrcp.f32 %v1425_v46 }
 0x548   :  { %v3537_v47 = vpop.eup %3536 }
 0x549   :  { %v3539_v55 = vpop.eup %3538  ;;  %v1432_v57 = vsub.f32 1.0, %v3537_v47  ;;  %v1431_v60 = vmul.f32 %v3537_v47, %v1429_v56 }
 0x54a   :  { %v1436_v61 = vsub.f32 1.0, %v3539_v55 }
 0x54b   :  { %v1433_v45 = vmul.f32 %v1432_v57, %v4650_v41 }
 0x54c   :  { %v1437_v3 = vmul.f32 %v1436_v61, %v4600_v51  ;;  %v3478_v51 = vld [vmem:[#allocation17 + $0x18] ss:$12 sps:$4 sm:$0xff]  }
 0x54d   :  { %v1434_v63 = vadd.f32 %v1433_v45, %v1431_v60  ;;  %1743 = vmatpush1.bf16.msra.mxu0 %v3478_v51 }
 0x54e   :  { %1744 = vmatprep.subr.bf16.mxu0 %v3483_v44 }
 0x54f   :  { %v1440_v4 = vmul.f32 %v1434_v63, %v4644_v38  ;;  %v1435_v2 = vmul.f32 %v3539_v55, %v1434_v63  ;;  %v1451_v5 = vmul.f32 %v1434_v63, %v4663_v59  ;;  %v1463_v40 = vrot.slane %v1434_v63, 6 }
 0x551   :  { %v1442_v6 = vrot.slane %v1440_v4, 6  ;;  %v1438_v7 = vadd.f32 %v1437_v3, %v1435_v2  ;;  %v1453_v10 = vrot.slane %v1451_v5, 6  ;;  %1745 = vmatpush1.bf16.msra.mxu0 %v3481_v48 }
 0x552   :  { %1746 = vmatprep.subr.bf16.mxu0 %v3486_v49 }
 0x553   :  { %v1444_v13 = vadd.f32 %v1442_v6, %v4658_v54  ;;  %1439 = vst [vmem:[#allocation2] sm:$0xc0] %v1438_v7  ;;  %v1455_v21 = vadd.f32 %v1453_v10, %v4671_v20 }
 0x555   :  { %v2899_v41 = vmul.f32 -1.442695, %v1444_v13  ;;  %v2900_v26 = vmul.f32 -1.442695, %v1455_v21  ;;  %1747 = vmatpush1.bf16.msra.mxu0 %v3484_v50 }
 0x556   :  { %1748 = vmatprep.subr.bf16.mxu0 %v3489_v27 }
 0x557   :  { %3540 = vpow2.f32 %v2899_v41 }
 0x558   :  { %3542 = vpow2.f32 %v2900_v26 }
 0x559   :  { %1749 = vmatpush1.bf16.msra.mxu0 %v3487_v28 }
 0x55a   :  { %1750 = vmatprep.subr.bf16.mxu0 %v3492_v29 }
 0x55d   :  { %1751 = vmatpush1.bf16.msra.mxu0 %v3490_v30 }
 0x55e   :  { %1752 = vmatprep.subr.bf16.mxu0 %v3495_v32 }
 0x561   :  { %v3541_v53 = vpop.eup %3540  ;;  %1753 = vmatpush1.bf16.msra.mxu0 %v3493_v31 }
 0x562   :  { %v3543_v9 = vpop.eup %3542  ;;  %v1448_v11 = vadd.f32 1.0, %v3541_v53  ;;  %1754 = vmatprep.subr.bf16.mxu0 %v3498_v33 }
 0x563   :  { %v1459_v12 = vadd.f32 1.0, %v3543_v9 }
 0x564   :  { %3544 = vrcp.f32 %v1448_v11 }
 0x565   :  { %3546 = vrcp.f32 %v1459_v12  ;;  %1755 = vmatpush1.bf16.msra.mxu0 %v3496_v37 }
 0x566   :  { %3229 = vmatprep.subr.bf16.mxu0 %v3998_v1 }
 0x56e   :  { %v3545_v36 = vpop.eup %3544 }
 0x56f   :  { %v3547_v39 = vpop.eup %3546  ;;  %v1466_v42 = vsub.f32 1.0, %v3545_v36  ;;  %v1465_v43 = vmul.f32 %v3545_v36, %v1463_v40 }
 0x570   :  { %v1470_v47 = vsub.f32 1.0, %v3547_v39 }
 0x571   :  { %v1467_v46 = vmul.f32 %v1466_v42, %v4655_v22 }
 0x572   :  { %v1471_v60 = vmul.f32 %v1470_v47, %v4602_v52 }
 0x573   :  { %v1468_v55 = vadd.f32 %v1467_v46, %v1465_v43 }
 0x575   :  { %v1474_v56 = vmul.f32 %v1468_v55, %v4644_v38  ;;  %v1469_v57 = vmul.f32 %v3547_v39, %v1468_v55  ;;  %v1485_v45 = vmul.f32 %v1468_v55, %v4663_v59  ;;  %v1497_v41 = vrot.slane %v1468_v55, 6 }
 0x577   :  { %v1476_v61 = vrot.slane %v1474_v56, 6  ;;  %v1472_v4 = vadd.f32 %v1471_v60, %v1469_v57  ;;  %v1487_v63 = vrot.slane %v1485_v45, 6 }
 0x579   :  { %v1478_v2 = vadd.f32 %v1476_v61, %v4658_v54  ;;  %1473 = vst [vmem:[#allocation2 + $0x8] sm:$0x3] %v1472_v4  ;;  %v1489_v3 = vadd.f32 %v1487_v63, %v4671_v20 }
 0x57b   :  { %v2901_v5 = vmul.f32 -1.442695, %v1478_v2  ;;  %v2902_v6 = vmul.f32 -1.442695, %v1489_v3 }
 0x57d   :  { %3548 = vpow2.f32 %v2901_v5 }
 0x57e   :  { %3550 = vpow2.f32 %v2902_v6 }
 0x587   :  { %v3549_v7 = vpop.eup %3548 }
 0x588   :  { %v3551_v10 = vpop.eup %3550  ;;  %v1482_v13 = vadd.f32 1.0, %v3549_v7 }
 0x589   :  { %v1493_v21 = vadd.f32 1.0, %v3551_v10 }
 0x58a   :  { %3552 = vrcp.f32 %v1482_v13 }
 0x58b   :  { %3554 = vrcp.f32 %v1493_v21 }
 0x594   :  { %v3553_v23 = vpop.eup %3552 }
 0x595   :  { %v3555_v25 = vpop.eup %3554  ;;  %v1500_v26 = vsub.f32 1.0, %v3553_v23  ;;  %v1499_v34 = vmul.f32 %v3553_v23, %v1497_v41 }
 0x596   :  { %v1504_v44 = vsub.f32 1.0, %v3555_v25 }
 0x597   :  { %v1501_v51 = vmul.f32 %v1500_v26, %v4655_v22 }
 0x598   :  { %v1505_v53 = vmul.f32 %v1504_v44, %v4602_v52 }
 0x599   :  { %v1502_v48 = vadd.f32 %v1501_v51, %v1499_v34 }
 0x59b   :  { %v1508_v49 = vmul.f32 %v1502_v48, %v4644_v38  ;;  %v1503_v50 = vmul.f32 %v3555_v25, %v1502_v48  ;;  %v1519_v9 = vmul.f32 %v1502_v48, %v4663_v59  ;;  %v1531_v42 = vrot.slane %v1502_v48, 6 }
 0x59d   :  { %v1510_v11 = vrot.slane %v1508_v49, 6  ;;  %v1506_v12 = vadd.f32 %v1505_v53, %v1503_v50  ;;  %v1521_v27 = vrot.slane %v1519_v9, 6  ;;  %v4717_v49 = vld [vmem:[#allocation2] sm:$0xff] }
 0x59e   :  { %v3499_v53 = vld [vmem:[#allocation17 + $0x8] ss:$12 sps:$4 sm:$0xff]  }
 0x59f   :  { %v1512_v28 = vadd.f32 %v1510_v11, %v4658_v54  ;;  %1507 = vst [vmem:[#allocation2 + $0x8] sm:$0xc] %v1506_v12  ;;  %v1523_v29 = vadd.f32 %v1521_v27, %v4671_v20  ;;  %v3500_v11 = vld [vmem:[#allocation17 + $0x20] ss:$12 sps:$4 sm:$0xff]   ;;  %v3503_v12 = vld [vmem:[#allocation17 + $0x68] ss:$12 sps:$4 sm:$0xff]  }
 0x5a0   :  { %v3504_v27 = vld [vmem:[#allocation17 + $0x80] ss:$12 sps:$4 sm:$0xff]  }
 0x5a1   :  { %v2903_v30 = vmul.f32 -1.442695, %v1512_v28  ;;  %v2904_v31 = vmul.f32 -1.442695, %v1523_v29  ;;  %v3505_v28 = vld [vmem:[#allocation17 + $0x98] ss:$12 sps:$4 sm:$0xff]  }
 0x5a2   :  { %v3506_v29 = vld [vmem:[#allocation17 + $0xb0] ss:$12 sps:$4 sm:$0xff]  }
 0x5a3   :  { %3556 = vpow2.f32 %v2903_v30 }
 0x5a4   :  { %3558 = vpow2.f32 %v2904_v31 }
 0x5ad   :  { %v3557_v32 = vpop.eup %3556 }
 0x5ae   :  { %v3559_v33 = vpop.eup %3558  ;;  %v1516_v36 = vadd.f32 1.0, %v3557_v32 }
 0x5af   :  { %v1527_v37 = vadd.f32 1.0, %v3559_v33 }
 0x5b0   :  { %3560 = vrcp.f32 %v1516_v36 }
 0x5b1   :  { %3562 = vrcp.f32 %v1527_v37 }
 0x5ba   :  { %v3561_v39 = vpop.eup %3560 }
 0x5bb   :  { %v3563_v40 = vpop.eup %3562  ;;  %v1534_v43 = vsub.f32 1.0, %v3561_v39  ;;  %v1533_v46 = vmul.f32 %v3561_v39, %v1531_v42 }
 0x5bc   :  { %v1538_v55 = vsub.f32 1.0, %v3563_v40 }
 0x5bd   :  { %v1535_v47 = vmul.f32 %v1534_v43, %v4655_v22 }
 0x5be   :  { %v1539_v45 = vmul.f32 %v1538_v55, %v4602_v52 }
 0x5bf   :  { %v1536_v56 = vadd.f32 %v1535_v47, %v1533_v46 }
 0x5c1   :  { %v1542_v57 = vmul.f32 %v1536_v56, %v4644_v38  ;;  %v1537_v60 = vmul.f32 %v3563_v40, %v1536_v56  ;;  %v1553_v61 = vmul.f32 %v1536_v56, %v4663_v59  ;;  %v1565_v25 = vrot.slane %v1536_v56, 6 }
 0x5c3   :  { %v1544_v4 = vrot.slane %v1542_v57, 6  ;;  %v1540_v63 = vadd.f32 %v1539_v45, %v1537_v60  ;;  %v1555_v2 = vrot.slane %v1553_v61, 6 }
 0x5c5   :  { %v1546_v3 = vadd.f32 %v1544_v4, %v4658_v54  ;;  %1541 = vst [vmem:[#allocation2 + $0x8] sm:$0x30] %v1540_v63  ;;  %v1557_v5 = vadd.f32 %v1555_v2, %v4671_v20 }
 0x5c7   :  { %v2905_v6 = vmul.f32 -1.442695, %v1546_v3  ;;  %v2906_v7 = vmul.f32 -1.442695, %v1557_v5 }
 0x5c9   :  { %3564 = vpow2.f32 %v2905_v6 }
 0x5ca   :  { %3566 = vpow2.f32 %v2906_v7 }
 0x5d3   :  { %v3565_v10 = vpop.eup %3564 }
 0x5d4   :  { %v3567_v13 = vpop.eup %3566  ;;  %v1550_v38 = vadd.f32 1.0, %v3565_v10 }
 0x5d5   :  { %v1561_v21 = vadd.f32 1.0, %v3567_v13 }
 0x5d6   :  { %3568 = vrcp.f32 %v1550_v38 }
 0x5d7   :  { %3570 = vrcp.f32 %v1561_v21 }
 0x5e0   :  { %v3569_v23 = vpop.eup %3568 }
 0x5e1   :  { %v3571_v59 = vpop.eup %3570  ;;  %v1568_v41 = vsub.f32 1.0, %v3569_v23  ;;  %v1567_v26 = vmul.f32 %v3569_v23, %v1565_v25 }
 0x5e2   :  { %v1572_v34 = vsub.f32 1.0, %v3571_v59 }
 0x5e3   :  { %v1569_v54 = vmul.f32 %v1568_v41, %v4655_v22  ;;  %v3502_v22 = vld [vmem:[#allocation17 + $0x50] ss:$12 sps:$4 sm:$0xff]  }
 0x5e4   :  { %v1573_v44 = vmul.f32 %v1572_v34, %v4602_v52  ;;  %v3501_v52 = vld [vmem:[#allocation17 + $0x38] ss:$12 sps:$4 sm:$0xff]  }
 0x5e5   :  { %v1570_v51 = vadd.f32 %v1569_v54, %v1567_v26 }
 0x5e7   :  { %v1571_v20 = vmul.f32 %v3571_v59, %v1570_v51  ;;  %1576 = vst [vmem:[#allocation21 - $0x6] sm:$0xc0] %v1570_v51 }
 0x5e9   :  { %v1574_v48 = vadd.f32 %v1573_v44, %v1571_v20 }
 0x5eb   :  { %1575 = vst [vmem:[#allocation2 + $0x8] sm:$0xc0] %v1574_v48 }
 0x5f2   :  { %v4719_v50 = vld [vmem:[#allocation2 + $0x8] sm:$0xff] }
 0x5f3   :  { %v1579_v9 = vpack.c.bf16 %v4719_v50, %v4717_v49 }
 0x5f5   :  { %1773 = vmatmul.mubr.bf16.vlgmr.msra.gmra.mrb[20].mxu0 %v1579_v9 }
 0x5f6   :  { %3230 = vmatpush3.bf16.msra.mxu0 %v3499_v53  ;;  %3245 = vmatprep.mubr.msk.bf16.mxu0 %vm3999_vm0, %v3998_v1 }
 0x5f7   :  { %3231 = vmatprep.subr.bf16.mxu0 %v3998_v1 }
 0x5fa   :  { %3232 = vmatpush3.bf16.msra.mxu0 %v3500_v11 }
 0x5fb   :  { %3233 = vmatprep.subr.bf16.mxu0 %v3998_v1 }
 0x5fe   :  { %3234 = vmatpush3.bf16.msra.mxu0 %v3501_v52 }
 0x5ff   :  { %3235 = vmatprep.subr.bf16.mxu0 %v3998_v1 }
 0x602   :  { %3236 = vmatpush3.bf16.msra.mxu0 %v3502_v22 }
 0x603   :  { %3237 = vmatprep.subr.bf16.mxu0 %v3998_v1 }
 0x606   :  { %3238 = vmatpush3.bf16.msra.mxu0 %v3503_v12 }
 0x607   :  { %3239 = vmatprep.subr.bf16.mxu0 %v3998_v1 }
 0x60a   :  { %3240 = vmatpush3.bf16.msra.mxu0 %v3504_v27 }
 0x60b   :  { %3241 = vmatprep.subr.bf16.mxu0 %v3998_v1 }
 0x60e   :  { %3242 = vmatpush3.bf16.msra.mxu0 %v3505_v28 }
 0x60f   :  { %3243 = vmatprep.subr.bf16.mxu0 %v3998_v1 }
 0x612   :  { %3244 = vmatpush3.bf16.msra.mxu0 %v3506_v29 }
 0x613   :  { %3249 = vmatprep.subr.bf16.mxu0 %v3998_v1 }
 0x615   :  { %3246 = vmatmul.mubr.bf16.vlgmr.msra.gmra.mrb[24].mxu0 %v1579_v9 }
 0x616   :  { %3250 = vmatpush3.bf16.msra.mxu0 %v4395_v62  ;;  %3265 = vmatprep.mubr.msk.bf16.mxu0 %vm3999_vm0, %v3998_v1  ;;  %v1824_v62 = vld [vmem:[#allocation18] sm:$0x3] }
 0x617   :  { %3251 = vmatprep.subr.bf16.mxu0 %v3998_v1  ;;  %v4769_v42 = vrot.slane %v1824_v62, %v4660_v58 }
 0x61a   :  { %3252 = vmatpush3.bf16.msra.mxu0 %v4407_v8  ;;  %v1825_v8 = vld [vmem:[#allocation20] sm:$0x3] }
 0x61b   :  { %3253 = vmatprep.subr.bf16.mxu0 %v3998_v1  ;;  %v1835_v43 = vrot.slane %v1825_v8, %v4660_v58 }
 0x61e   :  { %3254 = vmatpush3.bf16.msra.mxu0 %v4417_v14  ;;  %v4752_v14 = vrot.slane %v1824_v62, %v4641_v35 }
 0x61f   :  { %3255 = vmatprep.subr.bf16.mxu0 %v3998_v1 }
 0x622   :  { %3256 = vmatpush3.bf16.msra.mxu0 %v4421_v15  ;;  %v2931_v15 = vld [vmem:[%s5216_s27 + $0x2] sm:$0x3] }
 0x623   :  { %3257 = vmatprep.subr.bf16.mxu0 %v3998_v1  ;;  %v1856_v47 = vmul.f32 %v2931_v15, %v4769_v42 }
 0x626   :  { %3258 = vmatpush3.bf16.msra.mxu0 %v4425_v16  ;;  %v1829_v16 = vrot.slane %v1825_v8, %v4641_v35 }
 0x627   :  { %3259 = vmatprep.subr.bf16.mxu0 %v3998_v1 }
 0x62a   :  { %3260 = vmatpush3.bf16.msra.mxu0 %v4429_v17 }
 0x62b   :  { %3261 = vmatprep.subr.bf16.mxu0 %v3998_v1 }
 0x62e   :  { %3262 = vmatpush3.bf16.msra.mxu0 %v4433_v18  ;;  %v1844_v18 = vmul.f32 %v2931_v15, %v4752_v14 }
 0x62f   :  { %3263 = vmatprep.subr.bf16.mxu0 %v3998_v1 }
 0x632   :  { %3264 = vmatpush3.bf16.msra.mxu0 %v4437_v19 }
 0x633   :  { %2173 = vmatprep.subr.bf16.mxu0 %v3997_v0 }
 0x6c8   :  { %v4758_v17 = vpop.f32.mrb[20].mxu0 }
 0x6c9   :  { %v1776_v30 = vpop.f32.mrb[21].mxu0 }
 0x6ca   :  { %v4761_v31 = vadd.f32 %v1829_v16, %v1776_v30  ;;  %v4763_v19 = vpop.f32.mrb[22].mxu0 }
 0x6cb   :  { %v1780_v32 = vpop.f32.mrb[23].mxu0 }
 0x6cc   :  { %v1845_v33 = vadd.f32 %v1844_v18, %v4761_v31  ;;  %v4766_v36 = vadd.f32 %v1829_v16, %v1780_v32 }
 0x6ce   :  { %v2932_v37 = vmul.f32 -1.442695, %v1845_v33 }
 0x6d0   :  { %3572 = vpow2.f32 %v2932_v37 }
 0x6da   :  { %v3573_v39 = vpop.eup %3572 }
 0x6db   :  { %v1849_v40 = vadd.f32 1.0, %v3573_v39 }
 0x6dd   :  { %3574 = vrcp.f32 %v1849_v40 }
 0x6e7   :  { %v3575_v46 = vpop.eup %3574 }
 0x6e8   :  { %v1865_v55 = vsub.f32 1.0, %v3575_v46  ;;  %v1817_v56 = vpop.f32.mrb[24].mxu0  ;;  %v1864_v45 = vmul.f32 %v3575_v46, %v2931_v15 }
 0x6e9   :  { %v4773_v57 = vadd.f32 %v1835_v43, %v1817_v56  ;;  %v3247_v60 = vpop.f32.mrb[25].mxu0 }
 0x6ea   :  { %v1866_v61 = vmul.f32 %v1865_v55, %v4758_v17  ;;  %v1820_v4 = vpop.f32.mrb[26].mxu0 }
 0x6eb   :  { %v1857_v63 = vadd.f32 %v1856_v47, %v4773_v57  ;;  %v4777_v2 = vadd.f32 %v1835_v43, %v1820_v4  ;;  %v3248_v3 = vpop.f32.mrb[27].mxu0 }
 0x6ec   :  { %v1867_v5 = vadd.f32 %v1866_v61, %v1864_v45 }
 0x6ed   :  { %v2933_v6 = vmul.f32 -1.442695, %v1857_v63 }
 0x6ee   :  { %v1873_v7 = vmul.f32 %v1867_v5, %v4752_v14  ;;  %v1884_v10 = vmul.f32 %v1867_v5, %v4769_v42  ;;  %v1896_v12 = vrot.slane %v1867_v5, 6 }
 0x6ef   :  { %3576 = vpow2.f32 %v2933_v6 }
 0x6f0   :  { %v1875_v13 = vrot.slane %v1873_v7, 6  ;;  %v1886_v38 = vrot.slane %v1884_v10, 6 }
 0x6f2   :  { %v1877_v21 = vadd.f32 %v1875_v13, %v4761_v31  ;;  %v1888_v23 = vadd.f32 %v1886_v38, %v4773_v57 }
 0x6f4   :  { %v2934_v59 = vmul.f32 -1.442695, %v1877_v21  ;;  %v2935_v25 = vmul.f32 -1.442695, %v1888_v23 }
 0x6f6   :  { %3578 = vpow2.f32 %v2934_v59 }
 0x6f7   :  { %3580 = vpow2.f32 %v2935_v25 }
 0x6f9   :  { %v3577_v41 = vpop.eup %3576 }
 0x6fa   :  { %v1861_v26 = vadd.f32 1.0, %v3577_v41 }
 0x6fc   :  { %3582 = vrcp.f32 %v1861_v26 }
 0x700   :  { %v3579_v54 = vpop.eup %3578 }
 0x701   :  { %v3581_v34 = vpop.eup %3580  ;;  %v1881_v51 = vadd.f32 1.0, %v3579_v54 }
 0x702   :  { %v1892_v20 = vadd.f32 1.0, %v3581_v34 }
 0x703   :  { %3584 = vrcp.f32 %v1881_v51 }
 0x704   :  { %3586 = vrcp.f32 %v1892_v20 }
 0x706   :  { %v3583_v44 = vpop.eup %3582 }
 0x707   :  { %v1869_v48 = vsub.f32 1.0, %v3583_v44  ;;  %v1868_v53 = vmul.f32 %v3583_v44, %v1867_v5 }
 0x709   :  { %v1870_v9 = vmul.f32 %v1869_v48, %v4717_v49 }
 0x70b   :  { %v1871_v11 = vadd.f32 %v1870_v9, %v1868_v53 }
 0x70d   :  { %v3585_v52 = vpop.eup %3584  ;;  %1872 = vst [vmem:[#allocation2] sm:$0x3] %v1871_v11 }
 0x70e   :  { %v3587_v22 = vpop.eup %3586  ;;  %v1899_v27 = vsub.f32 1.0, %v3585_v52  ;;  %v1898_v28 = vmul.f32 %v3585_v52, %v1896_v12 }
 0x70f   :  { %v1903_v62 = vsub.f32 1.0, %v3587_v22 }
 0x710   :  { %v1900_v29 = vmul.f32 %v1899_v27, %v4758_v17 }
 0x711   :  { %v1904_v18 = vmul.f32 %v1903_v62, %v4717_v49 }
 0x712   :  { %v1901_v8 = vadd.f32 %v1900_v29, %v1898_v28 }
 0x714   :  { %v1907_v15 = vmul.f32 %v1901_v8, %v4752_v14  ;;  %v1902_v16 = vmul.f32 %v3587_v22, %v1901_v8  ;;  %v1918_v30 = vmul.f32 %v1901_v8, %v4769_v42  ;;  %v1930_v4 = vrot.slane %v1901_v8, 6 }
 0x716   :  { %v1909_v32 = vrot.slane %v1907_v15, 6  ;;  %v1905_v33 = vadd.f32 %v1904_v18, %v1902_v16  ;;  %v1920_v37 = vrot.slane %v1918_v30, 6 }
 0x718   :  { %v1911_v39 = vadd.f32 %v1909_v32, %v4761_v31  ;;  %1906 = vst [vmem:[#allocation2] sm:$0xc] %v1905_v33  ;;  %v1922_v40 = vadd.f32 %v1920_v37, %v4773_v57 }
 0x71a   :  { %v2936_v43 = vmul.f32 -1.442695, %v1911_v39  ;;  %v2937_v46 = vmul.f32 -1.442695, %v1922_v40 }
 0x71c   :  { %3588 = vpow2.f32 %v2936_v43 }
 0x71d   :  { %3590 = vpow2.f32 %v2937_v46 }
 0x726   :  { %v3589_v47 = vpop.eup %3588 }
 0x727   :  { %v3591_v55 = vpop.eup %3590  ;;  %v1915_v56 = vadd.f32 1.0, %v3589_v47 }
 0x728   :  { %v1926_v60 = vadd.f32 1.0, %v3591_v55 }
 0x729   :  { %3592 = vrcp.f32 %v1915_v56 }
 0x72a   :  { %3594 = vrcp.f32 %v1926_v60 }
 0x733   :  { %v3593_v45 = vpop.eup %3592 }
 0x734   :  { %v3595_v61 = vpop.eup %3594  ;;  %v1933_v63 = vsub.f32 1.0, %v3593_v45  ;;  %v1932_v3 = vmul.f32 %v3593_v45, %v1930_v4 }
 0x735   :  { %v1937_v6 = vsub.f32 1.0, %v3595_v61 }
 0x736   :  { %v1934_v5 = vmul.f32 %v1933_v63, %v4758_v17 }
 0x737   :  { %v1938_v38 = vmul.f32 %v1937_v6, %v4717_v49 }
 0x738   :  { %v1935_v7 = vadd.f32 %v1934_v5, %v1932_v3 }
 0x73a   :  { %v1941_v10 = vmul.f32 %v1935_v7, %v4752_v14  ;;  %v1936_v13 = vmul.f32 %v3595_v61, %v1935_v7  ;;  %v1952_v21 = vmul.f32 %v1935_v7, %v4769_v42  ;;  %v1964_v11 = vrot.slane %v1935_v7, 6 }
 0x73c   :  { %v1943_v23 = vrot.slane %v1941_v10, 6  ;;  %v1939_v59 = vadd.f32 %v1938_v38, %v1936_v13  ;;  %v1954_v25 = vrot.slane %v1952_v21, 6 }
 0x73e   :  { %v1945_v41 = vadd.f32 %v1943_v23, %v4761_v31  ;;  %1940 = vst [vmem:[#allocation2] sm:$0x30] %v1939_v59  ;;  %v1956_v26 = vadd.f32 %v1954_v25, %v4773_v57 }
 0x740   :  { %v2938_v54 = vmul.f32 -1.442695, %v1945_v41  ;;  %v2939_v34 = vmul.f32 -1.442695, %v1956_v26 }
 0x742   :  { %3596 = vpow2.f32 %v2938_v54 }
 0x743   :  { %3598 = vpow2.f32 %v2939_v34 }
 0x74c   :  { %v3597_v51 = vpop.eup %3596 }
 0x74d   :  { %v3599_v20 = vpop.eup %3598  ;;  %v1949_v44 = vadd.f32 1.0, %v3597_v51 }
 0x74e   :  { %v1960_v48 = vadd.f32 1.0, %v3599_v20 }
 0x74f   :  { %3600 = vrcp.f32 %v1949_v44 }
 0x750   :  { %3602 = vrcp.f32 %v1960_v48 }
 0x759   :  { %v3601_v53 = vpop.eup %3600 }
 0x75a   :  { %v3603_v9 = vpop.eup %3602  ;;  %v1967_v52 = vsub.f32 1.0, %v3601_v53  ;;  %v1966_v22 = vmul.f32 %v3601_v53, %v1964_v11 }
 0x75b   :  { %v1971_v12 = vsub.f32 1.0, %v3603_v9 }
 0x75c   :  { %v1968_v31 = vmul.f32 %v1967_v52, %v4758_v17 }
 0x75d   :  { %v1972_v29 = vmul.f32 %v1971_v12, %v4717_v49 }
 0x75e   :  { %v1969_v27 = vadd.f32 %v1968_v31, %v1966_v22 }
 0x760   :  { %v1975_v57 = vmul.f32 %v1969_v27, %v4752_v14  ;;  %v1970_v28 = vmul.f32 %v3603_v9, %v1969_v27  ;;  %v1986_v62 = vmul.f32 %v1969_v27, %v4769_v42  ;;  %v1998_v46 = vrot.slane %v1969_v27, 6 }
 0x762   :  { %v1977_v8 = vrot.slane %v1975_v57, 6  ;;  %v1973_v15 = vadd.f32 %v1972_v29, %v1970_v28  ;;  %v1988_v16 = vrot.slane %v1986_v62, 6 }
 0x764   :  { %v1979_v18 = vadd.f32 %v1977_v8, %v4766_v36  ;;  %1974 = vst [vmem:[#allocation2] sm:$0xc0] %v1973_v15  ;;  %v1990_v30 = vadd.f32 %v1988_v16, %v4777_v2 }
 0x766   :  { %v2940_v32 = vmul.f32 -1.442695, %v1979_v18  ;;  %v2941_v33 = vmul.f32 -1.442695, %v1990_v30 }
 0x768   :  { %3604 = vpow2.f32 %v2940_v32 }
 0x769   :  { %3606 = vpow2.f32 %v2941_v33 }
 0x772   :  { %v3605_v17 = vpop.eup %3604 }
 0x773   :  { %v3607_v37 = vpop.eup %3606  ;;  %v1983_v39 = vadd.f32 1.0, %v3605_v17 }
 0x774   :  { %v1994_v40 = vadd.f32 1.0, %v3607_v37 }
 0x775   :  { %3608 = vrcp.f32 %v1983_v39 }
 0x776   :  { %3610 = vrcp.f32 %v1994_v40 }
 0x77f   :  { %v3609_v49 = vpop.eup %3608 }
 0x780   :  { %v3611_v43 = vpop.eup %3610  ;;  %v2001_v47 = vsub.f32 1.0, %v3609_v49  ;;  %v2000_v55 = vmul.f32 %v3609_v49, %v1998_v46 }
 0x781   :  { %v2005_v60 = vsub.f32 1.0, %v3611_v43 }
 0x782   :  { %v2002_v56 = vmul.f32 %v2001_v47, %v4763_v19 }
 0x783   :  { %v2006_v63 = vmul.f32 %v2005_v60, %v4719_v50 }
 0x784   :  { %v2003_v45 = vadd.f32 %v2002_v56, %v2000_v55 }
 0x786   :  { %v2009_v61 = vmul.f32 %v2003_v45, %v4752_v14  ;;  %v2004_v4 = vmul.f32 %v3611_v43, %v2003_v45  ;;  %v2020_v3 = vmul.f32 %v2003_v45, %v4769_v42  ;;  %v2032_v34 = vrot.slane %v2003_v45, 6 }
 0x788   :  { %v2011_v5 = vrot.slane %v2009_v61, 6  ;;  %v2007_v6 = vadd.f32 %v2006_v63, %v2004_v4  ;;  %v2022_v7 = vrot.slane %v2020_v3, 6 }
 0x78a   :  { %v2013_v10 = vadd.f32 %v2011_v5, %v4766_v36  ;;  %2008 = vst [vmem:[#allocation2 + $0x8] sm:$0x3] %v2007_v6  ;;  %v2024_v13 = vadd.f32 %v2022_v7, %v4777_v2 }
 0x78c   :  { %v2942_v38 = vmul.f32 -1.442695, %v2013_v10  ;;  %v2943_v21 = vmul.f32 -1.442695, %v2024_v13 }
 0x78e   :  { %3612 = vpow2.f32 %v2942_v38 }
 0x78f   :  { %3614 = vpow2.f32 %v2943_v21 }
 0x798   :  { %v3613_v23 = vpop.eup %3612 }
 0x799   :  { %v3615_v59 = vpop.eup %3614  ;;  %v2017_v25 = vadd.f32 1.0, %v3613_v23 }
 0x79a   :  { %v2028_v41 = vadd.f32 1.0, %v3615_v59 }
 0x79b   :  { %3616 = vrcp.f32 %v2017_v25 }
 0x79c   :  { %3618 = vrcp.f32 %v2028_v41 }
 0x7a5   :  { %v3617_v26 = vpop.eup %3616 }
 0x7a6   :  { %v3619_v54 = vpop.eup %3618  ;;  %v2035_v51 = vsub.f32 1.0, %v3617_v26  ;;  %v2034_v20 = vmul.f32 %v3617_v26, %v2032_v34  ;;  %v2113_v26 = vld [vmem:[#allocation2] sm:$0xff] }
 0x7a7   :  { %v2039_v48 = vsub.f32 1.0, %v3619_v54 }
 0x7a8   :  { %v2036_v44 = vmul.f32 %v2035_v51, %v4763_v19  ;;  %v3674_v51 = vld [vmem:[%s5177_s7 + $0x8] sm:$0xff]  }
 0x7a9   :  { %v2040_v52 = vmul.f32 %v2039_v48, %v4719_v50  ;;  %v3677_v48 = vld [vmem:[%s5177_s7 + $0x18] sm:$0xff]  }
 0x7aa   :  { %v2037_v53 = vadd.f32 %v2036_v44, %v2034_v20  ;;  %v3675_v20 = vld [vmem:[%s5177_s7 + $0x10] sm:$0xff]   ;;  %v3676_v44 = vld [vmem:[%s5215_s26 + $0x8] sm:$0xff]  }
 0x7ac   :  { %v2043_v9 = vmul.f32 %v2037_v53, %v4752_v14  ;;  %v2038_v11 = vmul.f32 %v3619_v54, %v2037_v53  ;;  %v2054_v22 = vmul.f32 %v2037_v53, %v4769_v42  ;;  %v2066_v33 = vrot.slane %v2037_v53, 6  ;;  %v3678_v53 = vld [vmem:[%s5177_s7 + $0x20] sm:$0xff]  }
 0x7ae   :  { %v2045_v31 = vrot.slane %v2043_v9, 6  ;;  %v2041_v12 = vadd.f32 %v2040_v52, %v2038_v11  ;;  %v2056_v27 = vrot.slane %v2054_v22, 6  ;;  %v3679_v9 = vld [vmem:[%s5215_s26 + $0x10] sm:$0xff]   ;;  %v3680_v11 = vld [vmem:[%s5177_s7 + $0x28] sm:$0xff]   ;;  %v3682_v22 = vld [vmem:[%s5215_s26 + $0x18] sm:$0xff]  }
 0x7af   :  { %v3681_v52 = vld [vmem:[%s5177_s7 + $0x30] sm:$0xff]  }
 0x7b0   :  { %v2047_v57 = vadd.f32 %v2045_v31, %v4766_v36  ;;  %2042 = vst [vmem:[#allocation2 + $0x8] sm:$0xc] %v2041_v12  ;;  %v2058_v28 = vadd.f32 %v2056_v27, %v4777_v2  ;;  %v3683_v31 = vld [vmem:[%s5177_s7 + $0x38] sm:$0xff]   ;;  %v3684_v12 = vld [vmem:[%s5215_s26 + $0x20] sm:$0xff]   ;;  %v3685_v27 = vld [vmem:[%s5215_s26 + $0x28] sm:$0xff]  }
 0x7b2   :  { %v2944_v29 = vmul.f32 -1.442695, %v2047_v57  ;;  %v2945_v62 = vmul.f32 -1.442695, %v2058_v28  ;;  %v3686_v57 = vld [vmem:[%s5215_s26 + $0x30] sm:$0xff]   ;;  %v3687_v28 = vld [vmem:[%s5215_s26 + $0x38] sm:$0xff]  }
 0x7b4   :  { %3620 = vpow2.f32 %v2944_v29  ;;  %v3507_v29 = vld [vmem:[%s5215_s26 + $0x40] ss:$0 sps:$4 sm:$0x33]  }
 0x7b5   :  { %3622 = vpow2.f32 %v2945_v62 }
 0x7be   :  { %v3621_v8 = vpop.eup %3620 }
 0x7bf   :  { %v3623_v15 = vpop.eup %3622  ;;  %v2051_v16 = vadd.f32 1.0, %v3621_v8 }
 0x7c0   :  { %v2062_v18 = vadd.f32 1.0, %v3623_v15 }
 0x7c1   :  { %3624 = vrcp.f32 %v2051_v16 }
 0x7c2   :  { %3626 = vrcp.f32 %v2062_v18 }
 0x7cb   :  { %v3625_v30 = vpop.eup %3624 }
 0x7cc   :  { %v3627_v32 = vpop.eup %3626  ;;  %v2069_v17 = vsub.f32 1.0, %v3625_v30  ;;  %v2068_v37 = vmul.f32 %v3625_v30, %v2066_v33 }
 0x7cd   :  { %v2073_v40 = vsub.f32 1.0, %v3627_v32 }
 0x7ce   :  { %v2070_v39 = vmul.f32 %v2069_v17, %v4763_v19 }
 0x7cf   :  { %v2074_v47 = vmul.f32 %v2073_v40, %v4719_v50  ;;  %v3690_v40 = vld [vmem:[%s5179_s9 + $0x10] sm:$0xff]  }
 0x7d0   :  { %v2071_v49 = vadd.f32 %v2070_v39, %v2068_v37  ;;  %v3689_v39 = vld [vmem:[%s5179_s9 + $0x8] sm:$0xff]  }
 0x7d2   :  { %v2077_v43 = vmul.f32 %v2071_v49, %v4752_v14  ;;  %v2072_v46 = vmul.f32 %v3627_v32, %v2071_v49  ;;  %v2088_v55 = vmul.f32 %v2071_v49, %v4769_v42  ;;  %v2100_v13 = vrot.slane %v2071_v49, 6  ;;  %v3691_v49 = vld [vmem:[%s5179_s9 + $0x18] sm:$0xff]  }
 0x7d4   :  { %v2079_v56 = vrot.slane %v2077_v43, 6  ;;  %v2075_v60 = vadd.f32 %v2074_v47, %v2072_v46  ;;  %v2090_v45 = vrot.slane %v2088_v55, 6 }
 0x7d6   :  { %v2081_v61 = vadd.f32 %v2079_v56, %v4766_v36  ;;  %2076 = vst [vmem:[#allocation2 + $0x8] sm:$0x30] %v2075_v60  ;;  %v2092_v4 = vadd.f32 %v2090_v45, %v4777_v2  ;;  %v3692_v60 = vld [vmem:[%s5180_s10] sm:$0xff]  }
 0x7d7   :  { %v2497_v45 = vsel %vm454_vm6, %v3692_v60, 0 }
 0x7d8   :  { %v2946_v63 = vmul.f32 -1.442695, %v2081_v61  ;;  %v2947_v3 = vmul.f32 -1.442695, %v2092_v4  ;;  %v3693_v61 = vld [vmem:[%s5180_s10 + $0x8] sm:$0xff]  }
 0x7d9   :  { %v2500_v4 = vsel %vm454_vm6, %v3693_v61, 0 }
 0x7da   :  { %3628 = vpow2.f32 %v2946_v63  ;;  %v3694_v63 = vld [vmem:[%s5178_s8] sm:$0xff]  }
 0x7db   :  { %3630 = vpow2.f32 %v2947_v3  ;;  %v3695_v3 = vld [vmem:[%s5178_s8 + $0x8] sm:$0xff]  }
 0x7e4   :  { %v3629_v5 = vpop.eup %3628 }
 0x7e5   :  { %v3631_v6 = vpop.eup %3630  ;;  %v2085_v14 = vadd.f32 1.0, %v3629_v5  ;;  %v3696_v5 = vld [vmem:[%s5178_s8 + $0x10] sm:$0xff]  }
 0x7e6   :  { %v2096_v7 = vadd.f32 1.0, %v3631_v6  ;;  %v3697_v6 = vld [vmem:[%s5178_s8 + $0x18] sm:$0xff]  }
 0x7e7   :  { %3632 = vrcp.f32 %v2085_v14  ;;  %v3698_v14 = vld [vmem:[%s5178_s8 + $0x20] sm:$0xff]  }
 0x7e8   :  { %3634 = vrcp.f32 %v2096_v7  ;;  %v3699_v7 = vld [vmem:[%s5178_s8 + $0x28] sm:$0xff]  }
 0x7f1   :  { %v3633_v10 = vpop.eup %3632 }
 0x7f2   :  { %v3635_v42 = vpop.eup %3634  ;;  %v2103_v38 = vsub.f32 1.0, %v3633_v10  ;;  %v2102_v21 = vmul.f32 %v3633_v10, %v2100_v13  ;;  %v3700_v10 = vld [vmem:[%s5178_s8 + $0x30] sm:$0xff]   ;;  %v3702_v13 = vld [vmem:[%s5181_s11] sm:$0xff]  }
 0x7f3   :  { %v2107_v23 = vsub.f32 1.0, %v3635_v42 }
 0x7f4   :  { %v2104_v36 = vmul.f32 %v2103_v38, %v4763_v19  ;;  %v3672_v19 = vld [vmem:[%s5177_s7] sm:$0xff]   ;;  %v2667_v38 = vsel %vm454_vm6, %v3702_v13, 0 }
 0x7f5   :  { %v2108_v25 = vmul.f32 %v2107_v23, %v4719_v50  ;;  %v3673_v50 = vld [vmem:[%s5215_s26] sm:$0xff]  }
 0x7f6   :  { %v2105_v59 = vadd.f32 %v2104_v36, %v2102_v21  ;;  %v3703_v21 = vld [vmem:[%s5181_s11 + $0x8] sm:$0xff]  }
 0x7f7   :  { %v2670_v36 = vsel %vm454_vm6, %v3703_v21, 0 }
 0x7f8   :  { %v2106_v2 = vmul.f32 %v3635_v42, %v2105_v59  ;;  %2112 = vst [vmem:[#allocation21 - $0x4] sm:$0xc0] %v2105_v59  ;;  %v3701_v42 = vld [vmem:[%s5178_s8 + $0x38] sm:$0xff]  }
 0x7fa   :  { %v2109_v41 = vadd.f32 %v2108_v25, %v2106_v2 }
 0x7fc   :  { %2110 = vst [vmem:[#allocation2 + $0x8] sm:$0xc0] %v2109_v41  ;;  %v226_v41 = vld [vmem:[#allocation3] sm:$0x3] }
 0x803   :  { %v2114_v54 = vld [vmem:[#allocation2 + $0x8] sm:$0xff] }
 0x804   :  { %v4822_v34 = vpack.c.bf16 %v2114_v54, %v2113_v26  ;;  %v2166_v26 = vrot.slane %v226_v41, %v4660_v58  ;;  %v2949_v54 = vld [vmem:[#allocation9] ss:$0 sm:$0xff] }
 0x806   :  { %3266 = vmatmul.mubr.bf16.vlgmr.msra.gmra.mrb[28].mxu0 %v4822_v34  ;;  %3286 = vmatmul.mubr.bf16.vlgmr.msra.gmra.mrb[8].mxu1 %v4822_v34 }
 0x807   :  { %3302 = vmatpush3.bf16.msra.mxu1 %v3672_v19  ;;  %3317 = vmatprep.mubr.msk.bf16.mxu1 %vm3999_vm0, %v3998_v1 }
 0x808   :  { %3303 = vmatprep.subr.bf16.mxu1 %v3998_v1  ;;  %2174 = vmatpush1.bf16.xpose.msra.mxu0 %v3673_v50 }
 0x809   :  { %2175 = vmatprep.subr.bf16.mxu0 %v3997_v0  ;;  %2205 = vmatprep.mubr.bf16.mxu0 %v3997_v0 }
 0x80b   :  { %3304 = vmatpush3.bf16.msra.mxu1 %v3674_v51  ;;  %v2162_v51 = vrot.slane %v226_v41, %v4641_v35 }
 0x80c   :  { %3305 = vmatprep.subr.bf16.mxu1 %v3998_v1 }
 0x80f   :  { %3306 = vmatpush3.bf16.msra.mxu1 %v3675_v20 }
 0x810   :  { %3307 = vmatprep.subr.bf16.mxu1 %v3998_v1  ;;  %2176 = vmatpush1.bf16.xpose.msra.mxu0 %v3676_v44 }
 0x811   :  { %2177 = vmatprep.subr.bf16.mxu0 %v3997_v0 }
 0x813   :  { %3308 = vmatpush3.bf16.msra.mxu1 %v3677_v48 }
 0x814   :  { %3309 = vmatprep.subr.bf16.mxu1 %v3998_v1 }
 0x817   :  { %3310 = vmatpush3.bf16.msra.mxu1 %v3678_v53 }
 0x818   :  { %3311 = vmatprep.subr.bf16.mxu1 %v3998_v1  ;;  %2178 = vmatpush1.bf16.xpose.msra.mxu0 %v3679_v9 }
 0x819   :  { %2179 = vmatprep.subr.bf16.mxu0 %v3997_v0 }
 0x81b   :  { %3312 = vmatpush3.bf16.msra.mxu1 %v3680_v11 }
 0x81c   :  { %3313 = vmatprep.subr.bf16.mxu1 %v3998_v1 }
 0x81f   :  { %3314 = vmatpush3.bf16.msra.mxu1 %v3681_v52  ;;  %v2952_v52 = vld [vmem:[#allocation11] ss:$0 sm:$0xff] }
 0x820   :  { %3315 = vmatprep.subr.bf16.mxu1 %v3998_v1  ;;  %2180 = vmatpush1.bf16.xpose.msra.mxu0 %v3682_v22 }
 0x821   :  { %2181 = vmatprep.subr.bf16.mxu0 %v3997_v0 }
 0x823   :  { %3316 = vmatpush3.bf16.msra.mxu1 %v3683_v31 }
 0x824   :  { %3349 = vmatprep.subr.bf16.mxu1 %v3998_v1 }
 0x826   :  { %3318 = vmatmul.mubr.bf16.vlgmr.msra.gmra.mrb[12].mxu1 %v4822_v34 }
 0x827   :  { %3353 = vmatprep.mubr.msk.bf16.mxu1 %vm3999_vm0, %v3998_v1 }
 0x828   :  { %2182 = vmatpush1.bf16.xpose.msra.mxu0 %v3684_v12 }
 0x829   :  { %2183 = vmatprep.subr.bf16.mxu0 %v3997_v0 }
 0x82c   :  { %3350 = vmatpush3.bf16.xpose.msra.mxu1 %v2667_v38 }
 0x82d   :  { %3351 = vmatprep.subr.bf16.mxu1 %v3998_v1 }
 0x830   :  { %2184 = vmatpush1.bf16.xpose.msra.mxu0 %v3685_v27 }
 0x831   :  { %2185 = vmatprep.subr.bf16.mxu0 %v3997_v0 }
 0x834   :  { %3352 = vmatpush3.bf16.xpose.msra.mxu1 %v2670_v36 }
 0x838   :  { %2186 = vmatpush1.bf16.xpose.msra.mxu0 %v3686_v57 }
 0x839   :  { %2187 = vmatprep.subr.bf16.mxu0 %v3997_v0 }
 0x840   :  { %2188 = vmatpush1.bf16.xpose.msra.mxu0 %v3687_v28 }
 0x841   :  { %2189 = vmatprep.subr.bf16.mxu0 %v3997_v0  ;;  %v3688_v0 = vld [vmem:[%s5179_s9] sm:$0xff]   ;;  %s3946_s9 = scalar_lea.vmem %s2780_s12, 64 }
 0x842   :  { %p3947_p4 = scmp.ne.s32.totalorder %s2780_s12, %s3946_s9  ;;  %p3952_p6 = scmp.lt.s32.totalorder %s3946_s9, %s3946_s9 }
 0x844   :  { %p3953_p7 = por %p3952_p6, %p3951_p5 }
 0x846   :  { %p3954_p8 = pnand %p3953_p7, %p3947_p4 }
 0x848   :  { %2190 = vmatpush1.bf16.xpose.msra.mxu0 %v3507_v29 }
 0x849   :  { %3289 = vmatprep.subr.bf16.mxu0 %v3998_v1 }
 0x8d9   :  { %v2150_v62 = vpop.f32.mrb[28].mxu0  ;;  %v2318_v8 = vpop.f32.mrb[8].mxu1 }
 0x8da   :  { %v3267_v15 = vpop.f32.mrb[29].mxu0  ;;  %v3287_v16 = vpop.f32.mrb[9].mxu1 }
 0x8db   :  { %v2153_v18 = vpop.f32.mrb[30].mxu0  ;;  %v2321_v30 = vpop.f32.mrb[10].mxu1 }
 0x8dc   :  { %v2157_v32 = vpack.c.bf16 %v2153_v18, %v2150_v62  ;;  %v2325_v33 = vpack.c.bf16 %v2321_v30, %v2318_v8  ;;  %v3268_v17 = vpop.f32.mrb[31].mxu0  ;;  %v3288_v37 = vpop.f32.mrb[11].mxu1  ;;  %v5008_v18 = vld [vmem:[%s5217_s1] sm:$0xff] }
 0x8de   :  { %2206 = vmatmul.mubr.bf16.vlgmr.msra.gmra.mrb[32].mxu0 %v2157_v32  ;;  %v2950_v32 = vadd.s32 4294967168, %v5008_v18 }
 0x8df   :  { %3290 = vmatpush3.bf16.xpose.msra.mxu0 %v3688_v0  ;;  %3297 = vmatprep.mubr.msk.bf16.mxu0 %vm3999_vm0, %v3998_v1 }
 0x8e0   :  { %3291 = vmatprep.subr.bf16.mxu0 %v3998_v1 }
 0x8e7   :  { %3292 = vmatpush3.bf16.xpose.msra.mxu0 %v3689_v39 }
 0x8e8   :  { %3293 = vmatprep.subr.bf16.mxu0 %v3998_v1 }
 0x8ef   :  { %3294 = vmatpush3.bf16.xpose.msra.mxu0 %v3690_v40 }
 0x8f0   :  { %3295 = vmatprep.subr.bf16.mxu0 %v3998_v1 }
 0x8f7   :  { %3296 = vmatpush3.bf16.xpose.msra.mxu0 %v3691_v49 }
 0x8f8   :  { %3321 = vmatprep.subr.bf16.mxu0 %v3998_v1 }
 0x8f9   :  { %v2479_v43 = vpop.f32.mrb[12].mxu1 }
 0x8fa   :  { %v3319_v46 = vpop.f32.mrb[13].mxu1 }
 0x8fb   :  { %v2482_v47 = vpop.f32.mrb[14].mxu1 }
 0x8fc   :  { %v2486_v55 = vpack.c.bf16 %v2482_v47, %v2479_v43  ;;  %v3320_v56 = vpop.f32.mrb[15].mxu1 }
 0x8fe   :  { %3298 = vmatmul.mubr.bf16.vlgmr.msra.gmra.mrb[36].mxu0 %v2325_v33 }
 0x8ff   :  { %3322 = vmatpush3.bf16.xpose.msra.mxu0 %v2497_v45  ;;  %3325 = vmatprep.mubr.msk.bf16.mxu0 %vm3999_vm0, %v3998_v1 }
 0x900   :  { %3323 = vmatprep.subr.bf16.mxu0 %v3998_v1 }
 0x907   :  { %3324 = vmatpush3.bf16.xpose.msra.mxu0 %v2500_v4 }
 0x908   :  { %3329 = vmatprep.subr.bf16.mxu0 %v3998_v1 }
 0x90e   :  { %3326 = vmatmul.mubr.msk.bf16.vlgmr.msra.gmra.mrb[40].mxu0 %vm454_vm6, %v2486_v55 }
 0x90f   :  { %3330 = vmatpush3.bf16.msra.mxu0 %v3694_v63  ;;  %3345 = vmatprep.mubr.msk.bf16.mxu0 %vm3999_vm0, %v3998_v1 }
 0x910   :  { %3331 = vmatprep.subr.bf16.mxu0 %v3998_v1 }
 0x913   :  { %3332 = vmatpush3.bf16.msra.mxu0 %v3695_v3 }
 0x914   :  { %3333 = vmatprep.subr.bf16.mxu0 %v3998_v1 }
 0x917   :  { %3334 = vmatpush3.bf16.msra.mxu0 %v3696_v5 }
 0x918   :  { %3335 = vmatprep.subr.bf16.mxu0 %v3998_v1 }
 0x91b   :  { %3336 = vmatpush3.bf16.msra.mxu0 %v3697_v6 }
 0x91c   :  { %3337 = vmatprep.subr.bf16.mxu0 %v3998_v1 }
 0x91f   :  { %3338 = vmatpush3.bf16.msra.mxu0 %v3698_v14 }
 0x920   :  { %3339 = vmatprep.subr.bf16.mxu0 %v3998_v1 }
 0x923   :  { %3340 = vmatpush3.bf16.msra.mxu0 %v3699_v7 }
 0x924   :  { %3341 = vmatprep.subr.bf16.mxu0 %v3998_v1 }
 0x927   :  { %3342 = vmatpush3.bf16.msra.mxu0 %v3700_v10 }
 0x928   :  { %3343 = vmatprep.subr.bf16.mxu0 %v3998_v1 }
 0x92b   :  { %3344 = vmatpush3.bf16.msra.mxu0 %v3701_v42 }
 0x92e   :  { %3346 = vmatmul.mubr.bf16.vlgmr.msra.gmra.mrb[44].mxu0 %v4822_v34 }
 0x9b1   :  { %v2207_v23 = vpop.f32.mrb[32].mxu0 }
 0x9b2   :  { %v2209_v59 = vpop.f32.mrb[33].mxu0  ;;  %v4988_v11 = vadd.f32 %v2207_v23, %v2162_v51 }
 0x9b3   :  { %v2211_v2 = vpop.f32.mrb[34].mxu0  ;;  %v4975_v19 = vadd.f32 %v2209_v59, %v2166_v26 }
 0x9b4   :  { %v2213_v25 = vpop.f32.mrb[35].mxu0  ;;  %v5003_v16 = vadd.f32 %v2211_v2, %v2162_v51 }
 0x9b5   :  { %v2217_v9 = vsel %vm2216_vm12, %v4975_v19, -inf  ;;  %v4993_v57 = vadd.f32 %v2213_v25, %v2166_v26 }
 0x9b6   :  { %v2218_v35 = vmax.f32 %v4988_v11, %v2217_v9 }
 0x9b7   :  { %v2221_v15 = vsel %vm2216_vm12, %v4993_v57, -inf }
 0x9b8   :  { %v2222_v30 = vmax.f32 %v5003_v16, %v2221_v15 }
 0x9d1   :  { %v2366_v34 = vpop.f32.mrb[36].mxu0 }
 0x9d2   :  { %v4977_v50 = vadd.f32 %v2949_v54, %v2366_v34  ;;  %v3299_v1 = vpop.f32.mrb[37].mxu0 }
 0x9d3   :  { %v2369_v20 = vpop.f32.mrb[38].mxu0 }
 0x9d4   :  { %v4980_v44 = vadd.f32 %v2949_v54, %v2369_v20  ;;  %v3300_v48 = vpop.f32.mrb[39].mxu0  ;;  %v2373_v53 = vsel %vm454_vm6, %v4977_v50, -inf }
 0x9d5   :  { %2374 = vmax.xlane.f32.xlu0 %v2373_v53 }
 0x9d6   :  { %v2376_v58 = vsel %vm454_vm6, %v4980_v44, -inf }
 0x9d7   :  { %2377 = vmax.xlane.f32.xlu1 %v2376_v58 }
 0x9db   :  { %2219 = vmax.xlane.f32.xlu1 %v2218_v35  ;;  %v2956_v35 = vld [vmem:[#allocation12] ss:$0 sm:$0xff] }
 0x9e1   :  { %v2536_v22 = vpop.f32.mrb[40].mxu0 }
 0x9e2   :  { %v4991_v31 = vadd.f32 %v2952_v52, %v2536_v22  ;;  %v3327_v12 = vpop.f32.mrb[41].mxu0 }
 0x9e3   :  { %v2539_v27 = vpop.f32.mrb[42].mxu0 }
 0x9e4   :  { %v4995_v28 = vadd.f32 %v2952_v52, %v2539_v27  ;;  %v3328_v29 = vpop.f32.mrb[43].mxu0  ;;  %v2543_v62 = vsel %vm705_vm9, %v4991_v31, -inf }
 0x9e5   :  { %2544 = vmax.xlane.f32.xlu0 %v2543_v62 }
 0x9e6   :  { %v2546_v8 = vsel %vm705_vm9, %v4995_v28, -inf }
 0x9e9   :  { %2547 = vmax.xlane.f32.xlu0 %v2546_v8 }
 0x9ec   :  { %2257 = vperm.xlu1 %3394, %v5008_v18  }
 0x9ed   :  { %2223 = vmax.xlane.f32.xlu0 %v2222_v30  ;;  %v2954_v30 = vadd.s32 4294967104, %v5008_v18 }
 0x9f0   :  { %2402 = vperm.xlu1 %3394, %v2950_v32   ;;  %v5060_v32 = vld [vmem:[%s5217_s1 + $0x8] sm:$0xff] }
 0xa01   :  { %v2649_v33 = vpop.f32.mrb[44].mxu0 }
 0xa02   :  { %v3347_v17 = vpop.f32.mrb[45].mxu0 }
 0xa03   :  { %v2652_v37 = vpop.f32.mrb[46].mxu0  ;;  %v2951_v17 = vadd.s32 4294967168, %v5060_v32 }
 0xa04   :  { %v2656_v0 = vpack.c.bf16 %v2652_v37, %v2649_v33  ;;  %v3348_v39 = vpop.f32.mrb[47].mxu0  ;;  %v2955_v33 = vadd.s32 4294967104, %v5060_v32 }
 0xa06   :  { %3354 = vmatmul.mubr.msk.bf16.vlgmr.msra.gmra.mrb[16].mxu1 %vm454_vm6, %v2656_v0 }
 0xa62   :  { %v5022_v56 = vpop.xlane.xlu0 %2374 }
 0xa63   :  { %v2379_v7 = vsub.f32 %v4977_v50, %v5022_v56 }
 0xa64   :  { %v5014_v40 = vpop.xlane.xlu1 %2377 }
 0xa65   :  { %v2381_v13 = vmul.f32 1.442695, %v2379_v7  ;;  %v2380_v38 = vsub.f32 %v4980_v44, %v5014_v40 }
 0xa67   :  { %v2383_v21 = vmul.f32 1.442695, %v2380_v38 }
 0xa68   :  { %v5016_v49 = vpop.xlane.xlu1 %2219 }
 0xa69   :  { %v2225_v43 = vsub.f32 %v4988_v11, %v5016_v49  ;;  %v2226_v46 = vsub.f32 %v4975_v19, %v5016_v49 }
 0xa6b   :  { %v2229_v47 = vmul.f32 1.442695, %v2225_v43  ;;  %v2231_v55 = vmul.f32 1.442695, %v2226_v46 }
 0xa6c   :  { %v5065_v39 = vpop.permute.xlu1 %2257 }
 0xa6d   :  { %3636 = vpow2.f32 %v2229_v47  ;;  %vm2262_vm3 = vcmp.eq.s32.totalorder %v4322_v24, %v5065_v39 }
 0xa6e   :  { %3638 = vpow2.f32 %v2231_v55 }
 0xa70   :  { %v2403_v46 = vpop.permute.xlu1 %2402 }
 0xa71   :  { %vm2407_vm13 = vcmp.eq.s32.totalorder %v4322_v24, %v2403_v46 }
 0xa72   :  { %v5024_v60 = vpop.xlane.xlu0 %2544 }
 0xa73   :  { %v2549_v36 = vsub.f32 %v4991_v31, %v5024_v60 }
 0xa75   :  { %v2551_v23 = vmul.f32 1.442695, %v2549_v36  ;;  %v2958_v36 = vadd.s32 4294967072, %v5008_v18 }
 0xa76   :  { %v5026_v45 = vpop.xlane.xlu0 %2547 }
 0xa77   :  { %v3637_v61 = vpop.eup %3636  ;;  %v2550_v59 = vsub.f32 %v4995_v28, %v5026_v45 }
 0xa78   :  { %v3639_v4 = vpop.eup %3638 }
 0xa79   :  { %v2237_v63 = vsel %vm2216_vm12, %v3639_v4, 0.0  ;;  %v2553_v26 = vmul.f32 1.442695, %v2550_v59 }
 0xa7a   :  { %v5029_v3 = vpop.xlane.xlu0 %2223  ;;  %v2238_v5 = vadd.f32 %v3637_v61, %v2237_v63 }
 0xa7b   :  { %v2227_v6 = vsub.f32 %v5003_v16, %v5029_v3  ;;  %v2228_v14 = vsub.f32 %v4993_v57, %v5029_v3 }
 0xa7c   :  { %2239 = vadd.xlane.f32.xlu1 %v2238_v5 }
 0xa7d   :  { %v2233_v10 = vmul.f32 1.442695, %v2227_v6  ;;  %v2235_v42 = vmul.f32 1.442695, %v2228_v14 }
 0xa7f   :  { %3640 = vpow2.f32 %v2233_v10 }
 0xa80   :  { %3642 = vpow2.f32 %v2235_v42 }
 0xa81   :  { %3644 = vpow2.f32 %v2381_v13 }
 0xa82   :  { %3646 = vpow2.f32 %v2383_v21  ;;  %v2959_v21 = vadd.s32 4294967072, %v5060_v32 }
 0xa83   :  { %3648 = vpow2.f32 %v2551_v23 }
 0xa84   :  { %3650 = vpow2.f32 %v2553_v26 }
 0xa89   :  { %v3641_v2 = vpop.eup %3640 }
 0xa8a   :  { %v3643_v25 = vpop.eup %3642 }
 0xa8b   :  { %v2241_v41 = vsel %vm2216_vm12, %v3643_v25, 0.0  ;;  %v3645_v34 = vpop.eup %3644 }
 0xa8c   :  { %v2242_v54 = vadd.f32 %v3641_v2, %v2241_v41  ;;  %v2385_v1 = vsel %vm454_vm6, %v3645_v34, 0.0  ;;  %v3647_v51 = vpop.eup %3646 }
 0xa8d   :  { %v2388_v20 = vsel %vm454_vm6, %v3647_v51, 0.0  ;;  %v3649_v48 = vpop.eup %3648 }
 0xa8e   :  { %2243 = vadd.xlane.f32.xlu0 %v2242_v54  ;;  %v2555_v53 = vsel %vm705_vm9, %v3649_v48, 0.0  ;;  %v3651_v58 = vpop.eup %3650 }
 0xa8f   :  { %v2558_v9 = vsel %vm705_vm9, %v3651_v58, 0.0 }
 0xa92   :  { %2386 = vadd.xlane.f32.xlu0 %v2385_v1 }
 0xa96   :  { %2389 = vadd.xlane.f32.xlu0 %v2388_v20 }
 0xa9a   :  { %2556 = vadd.xlane.f32.xlu0 %v2555_v53 }
 0xa9e   :  { %2559 = vadd.xlane.f32.xlu0 %v2558_v9 }
 0xad9   :  { %v2706_v52 = vpop.f32.mrb[16].mxu1 }
 0xada   :  { %v5048_v22 = vadd.f32 %v2956_v35, %v2706_v52  ;;  %v3355_v12 = vpop.f32.mrb[17].mxu1 }
 0xadb   :  { %v2709_v27 = vpop.f32.mrb[18].mxu1 }
 0xadc   :  { %v5050_v29 = vadd.f32 %v2956_v35, %v2709_v27  ;;  %v3356_v62 = vpop.f32.mrb[19].mxu1  ;;  %v2713_v8 = vsel %vm705_vm9, %v5048_v22, -inf }
 0xadd   :  { %2714 = vmax.xlane.f32.xlu1 %v2713_v8  ;;  %v2255_v62 = vadd.s32 128, %v4322_v24 }
 0xade   :  { %v2716_v15 = vsel %vm705_vm9, %v5050_v29, -inf }
 0xadf   :  { %2717 = vmax.xlane.f32.xlu0 %v2716_v15  ;;  %vm2263_vm0 = vcmp.eq.s32.totalorder %v2255_v62, %v5065_v39 }
 0xaee   :  { %2572 = vperm.xlu1 %3394, %v2954_v30  }
 0xaf2   :  { %2575 = vperm.xlu1 %3394, %v2955_v33  }
 0xaf5   :  { %2405 = vperm.xlu0 %3393, %v2951_v17  }
 0xaf6   :  { %2260 = vperm.xlu1 %3394, %v5060_v32  }
 0xb09   :  { %v2240_v55 = vpop.xlane.xlu1 %2239 }
 0xb1b   :  { %v2244_v37 = vpop.xlane.xlu0 %2243 }
 0xb1f   :  { %v2387_v0 = vpop.xlane.xlu0 %2386 }
 0xb23   :  { %v2390_v43 = vpop.xlane.xlu0 %2389 }
 0xb27   :  { %v2557_v47 = vpop.xlane.xlu0 %2556 }
 0xb2b   :  { %v2560_v61 = vpop.xlane.xlu0 %2559 }
 0xb6a   :  { %v5067_v4 = vpop.xlane.xlu1 %2714 }
 0xb6b   :  { %v2719_v63 = vsub.f32 %v5048_v22, %v5067_v4 }
 0xb6c   :  { %v5071_v5 = vpop.xlane.xlu0 %2717 }
 0xb6d   :  { %v2721_v6 = vmul.f32 1.442695, %v2719_v63  ;;  %v2720_v14 = vsub.f32 %v5050_v29, %v5071_v5 }
 0xb6e   :  { %v2573_v25 = vpop.permute.xlu1 %2572 }
 0xb6f   :  { %3652 = vpow2.f32 %v2721_v6  ;;  %v2723_v7 = vmul.f32 1.442695, %v2720_v14  ;;  %vm2577_vm15 = vcmp.eq.s32.totalorder %v4322_v24, %v2573_v25 }
 0xb71   :  { %3654 = vpow2.f32 %v2723_v7 }
 0xb72   :  { %3656 = vlog2.f32 %v2387_v0  ;;  %v2576_v53 = vpop.permute.xlu1 %2575 }
 0xb73   :  { %3658 = vlog2.f32 %v2240_v55  ;;  %vm2578_vm1 = vcmp.eq.s32.totalorder %v4322_v24, %v2576_v53 }
 0xb74   :  { %3660 = vlog2.f32 %v2390_v43  ;;  %v2406_v12 = vpop.permute.xlu0 %2405 }
 0xb75   :  { %3662 = vlog2.f32 %v2557_v47  ;;  %vm2408_vm14 = vcmp.eq.s32.totalorder %v4322_v24, %v2406_v12 }
 0xb76   :  { %3664 = vlog2.f32 %v2244_v37 }
 0xb77   :  { %3666 = vlog2.f32 %v2560_v61 }
 0xb79   :  { %v3653_v10 = vpop.eup %3652 }
 0xb7a   :  { %v2725_v42 = vsel %vm705_vm9, %v3653_v10, 0.0 }
 0xb7b   :  { %v3655_v13 = vpop.eup %3654  ;;  %2726 = vadd.xlane.f32.xlu1 %v2725_v42 }
 0xb7c   :  { %v2728_v38 = vsel %vm705_vm9, %v3655_v13, 0.0  ;;  %v3657_v23 = vpop.eup %3656 }
 0xb7d   :  { %2729 = vadd.xlane.f32.xlu0 %v2728_v38  ;;  %v3659_v59 = vpop.eup %3658  ;;  %v2392_v2 = vmul.f32 0.6931472, %v3657_v23 }
 0xb7e   :  { %v3661_v41 = vpop.eup %3660  ;;  %v2246_v54 = vmul.f32 0.6931472, %v3659_v59 }
 0xb7f   :  { %v3663_v26 = vpop.eup %3662  ;;  %v2395_v1 = vadd.f32 %v2392_v2, %v5022_v56  ;;  %v2394_v51 = vmul.f32 0.6931472, %v3661_v41 }
 0xb80   :  { %v3665_v34 = vpop.eup %3664  ;;  %v2562_v48 = vmul.f32 0.6931472, %v3663_v26  ;;  %v2249_v58 = vadd.f32 %v2246_v54, %v5016_v49 }
 0xb81   :  { %v3667_v20 = vpop.eup %3666  ;;  %v2248_v9 = vmul.f32 0.6931472, %v3665_v34  ;;  %v2396_v35 = vadd.f32 %v2394_v51, %v5014_v40  ;;  %v2397_v27 = vsub.f32 %v4977_v50, %v2395_v1  ;;  %v2261_v40 = vpop.permute.xlu1 %2260 }
 0xb82   :  { %v2564_v52 = vmul.f32 0.6931472, %v3667_v20  ;;  %v2565_v8 = vadd.f32 %v2562_v48, %v5024_v60  ;;  %v5087_v56 = vsub.f32 %v4975_v19, %v2249_v58  ;;  %vm2265_vm2 = vcmp.eq.s32.totalorder %v2255_v62, %v2261_v40 }
 0xb83   :  { %v2250_v49 = vadd.f32 %v2248_v9, %v5029_v3  ;;  %v2409_v30 = vsel %vm2407_vm13, %v2397_v27, 0.0  ;;  %v2398_v33 = vsub.f32 %v4980_v44, %v2396_v35  ;;  %v2251_v3 = vsub.f32 %v4988_v11, %v2249_v58 }
 0xb84   :  { %v2566_v15 = vadd.f32 %v2564_v52, %v5026_v45  ;;  %v2567_v60 = vsub.f32 %v4991_v31, %v2565_v8  ;;  %v2411_v19 = vsel %vm454_vm6, %v2409_v30, 0.0  ;;  %v2267_v37 = vsel %vm2263_vm0, %v5087_v56, 0.0 }
 0xb85   :  { %v2410_v50 = vsel %vm2408_vm14, %v2398_v33, 0.0  ;;  %v5100_v45 = vsub.f32 %v4993_v57, %v2250_v49  ;;  %vm2264_vm4 = vcmp.eq.s32.totalorder %v4322_v24, %v2261_v40  ;;  %v2266_v43 = vsel %vm2262_vm3, %v2251_v3, 0.0 }
 0xb86   :  { %v2579_v17 = vsel %vm2577_vm15, %v2567_v60, 0.0  ;;  %v2568_v44 = vsub.f32 %v4995_v28, %v2566_v15  ;;  %v2414_v0 = vsel %vm454_vm6, %v2410_v50, 0.0  ;;  %v2270_v46 = vsel %vm2216_vm12, %v2267_v37, 0.0 }
 0xb87   :  { %v2269_v31 = vsel %vm2265_vm2, %v5100_v45, 0.0  ;;  %v2581_v57 = vsel %vm705_vm9, %v2579_v17, 0.0  ;;  %v2253_v28 = vsub.f32 %v5003_v16, %v2250_v49  ;;  %v2271_v39 = vadd.f32 %v2270_v46, %v2266_v43 }
 0xb88   :  { %v2580_v11 = vsel %vm2578_vm1, %v2568_v44, 0.0  ;;  %v2274_v61 = vsel %vm2216_vm12, %v2269_v31, 0.0 }
 0xb89   :  { %v2584_v47 = vsel %vm705_vm9, %v2580_v11, 0.0  ;;  %v2268_v55 = vsel %vm2264_vm4, %v2253_v28, 0.0 }
 0xb8a   :  { %v2275_v63 = vadd.f32 %v2274_v61, %v2268_v55 }
 0xb8c   :  { %2745 = vperm.xlu1 %3394, %v2959_v21  }
 0xb93   :  { %2742 = vperm.xlu0 %3393, %v2958_v36  }
 0xbb0   :  { %2412 = vadd.xlane.f32.xlu1 %v2411_v19 }
 0xbb2   :  { %2415 = vadd.xlane.f32.xlu0 %v2414_v0 }
 0xbb4   :  { %2582 = vadd.xlane.f32.xlu1 %v2581_v57 }
 0xbb6   :  { %2585 = vadd.xlane.f32.xlu0 %v2584_v47 }
 0xbb8   :  { %2272 = vadd.xlane.f32.xlu1 %v2271_v39 }
 0xbba   :  { %2276 = vadd.xlane.f32.xlu0 %v2275_v63 }
 0xc08   :  { %v2727_v6 = vpop.xlane.xlu1 %2726 }
 0xc0a   :  { %v2730_v14 = vpop.xlane.xlu0 %2729 }
 0xc0b   :  { %3668 = vlog2.f32 %v2730_v14 }
 0xc0c   :  { %v2746_v7 = vpop.permute.xlu1 %2745  ;;  %3670 = vlog2.f32 %v2727_v6 }
 0xc0d   :  { %vm2748_vm5 = vcmp.eq.s32.totalorder %v4322_v24, %v2746_v7 }
 0xc12   :  { %v2743_v10 = vpop.permute.xlu0 %2742 }
 0xc13   :  { %vm2747_vm6 = vcmp.eq.s32.totalorder %v4322_v24, %v2743_v10 }
 0xc15   :  { %v3669_v23 = vpop.eup %3668 }
 0xc16   :  { %v3671_v59 = vpop.eup %3670  ;;  %v2734_v2 = vmul.f32 0.6931472, %v3669_v23 }
 0xc17   :  { %v2732_v25 = vmul.f32 0.6931472, %v3671_v59 }
 0xc18   :  { %v2736_v41 = vadd.f32 %v2734_v2, %v5071_v5 }
 0xc19   :  { %v2735_v26 = vadd.f32 %v2732_v25, %v5067_v4 }
 0xc1a   :  { %v2738_v54 = vsub.f32 %v5050_v29, %v2736_v41 }
 0xc1b   :  { %v2737_v34 = vsub.f32 %v5048_v22, %v2735_v26 }
 0xc1c   :  { %v2750_v1 = vsel %vm2748_vm5, %v2738_v54, 0.0 }
 0xc1d   :  { %v2754_v51 = vsel %vm705_vm9, %v2750_v1, 0.0  ;;  %v2749_v20 = vsel %vm2747_vm6, %v2737_v34, 0.0 }
 0xc1e   :  { %v2751_v48 = vsel %vm705_vm9, %v2749_v20, 0.0 }
 0xc3d   :  { %v2413_v42 = vpop.xlane.xlu1 %2412 }
 0xc3e   :  { %v2423_v13 = vadd.f32 %v2413_v42, %v5087_v56 }
 0xc3f   :  { %v2416_v38 = vpop.xlane.xlu0 %2415 }
 0xc40   :  { %v2425_v16 = vsub.f32 0.0, %v2423_v13  ;;  %v2424_v21 = vadd.f32 %v2416_v38, %v5100_v45 }
 0xc41   :  { %v2583_v53 = vpop.xlane.xlu1 %2582 }
 0xc42   :  { %v2426_v36 = vsub.f32 0.0, %v2424_v21  ;;  %2429 = vrot.lane.b32.xlu1 %v2425_v16, %s4001_s6  ;;  %v2593_v4 = vadd.f32 %v2583_v53, %v5087_v56 }
 0xc43   :  { %v2586_v5 = vpop.xlane.xlu0 %2585 }
 0xc44   :  { %2431 = vrot.lane.b32.xlu0 %v2426_v36, %s4001_s6  ;;  %v2594_v29 = vadd.f32 %v2586_v5, %v5100_v45  ;;  %v2595_v58 = vsub.f32 0.0, %v2593_v4 }
 0xc46   :  { %v2596_v9 = vsub.f32 0.0, %v2594_v29 }
 0xc63   :  { %2755 = vadd.xlane.f32.xlu0 %v2754_v51 }
 0xc66   :  { %2752 = vadd.xlane.f32.xlu1 %v2751_v48 }
 0xc77   :  { %2599 = vrot.lane.b32.xlu1 %v2595_v58, %s4002_s23 }
 0xc79   :  { %2601 = vrot.lane.b32.xlu0 %v2596_v9, %s4002_s23 }
 0xc7a   :  { %3957 = shalt.err (!%p3954_p8)
}
 0xc7b   :  { %s5218_s29 = sld [smem:[#allocation37_spill]] }
 0xc81   :  { %s3958_s19 = scalar_lea.hbm %s5218_s29, 64 }
 0xc82   :  { %p3959_p9 = scmp.ne.s32.totalorder %s5218_s29, %s3958_s19  ;;  %p3962_p10 = scmp.lt.u32.totalorder %s3958_s19, %s5218_s29 }
 0xc84   :  { %p3964_p11 = pnand %p3962_p10, %p3959_p9 }
 0xc86   :  { %3967 = shalt.err (!%p3964_p11)
}
 0xc87   :  { %s4004_s20 = smov 32   ;;  %s4005_s3 = smov 2   ;;  %v2277_v24 = vpop.xlane.xlu0 %2276  ;;  %v2273_v22 = vpop.xlane.xlu1 %2272  ;;  %vm2418_vm7 = vcmp.ge.s32.totalorder %v5060_v32, 128  ;;  %vm2420_vm8 = vcmp.lt.s32.totalorder %v5060_v32, 192  ;;  %vm2588_vm9 = vcmp.ge.s32.totalorder %v5060_v32, 192  ;;  %vm2590_vm10 = vcmp.lt.s32.totalorder %v5060_v32, 224 }
 0xc88   :  { %2785 = dma.vmem_to_hbm [thread:$0]  %s2780_s12, 64, %s5218_s29, [#allocation5], %s4004_s20, %s4004_s20, %s4005_s3   ;;  %v2281_v52 = vsub.f32 0.0, %v2277_v24  ;;  %vm2279_vm11 = vcmp.lt.s32.totalorder %v5060_v32, 128  ;;  %vm2758_vm12 = vcmp.ge.s32.totalorder %v5060_v32, 224  ;;  %vm2760_vm13 = vcmp.lt.s32.totalorder %v5060_v32, 256  ;;  %vm5147_vm0 = vmand %vm2418_vm7, %vm2420_vm8 }
 0xc89   :  { %vm2417_vm14 = vcmp.ge.s32.totalorder %v5008_v18, 128  ;;  %vm2419_vm15 = vcmp.lt.s32.totalorder %v5008_v18, 192  ;;  %vm2278_vm1 = vcmp.lt.s32.totalorder %v5008_v18, 128  ;;  %v2280_v49 = vsub.f32 0.0, %v2273_v22  ;;  %vm2592_vm2 = vmand %vm2588_vm9, %vm2590_vm10  ;;  %s5221_s22 = sld [smem:[#allocation36_spill]] }
 0xc8a   :  { %vm2587_vm3 = vcmp.ge.s32.totalorder %v5008_v18, 192  ;;  %vm2589_vm4 = vcmp.lt.s32.totalorder %v5008_v18, 224  ;;  %v2283_v15 = vsel %vm2279_vm11, %v2281_v52, 0.0  ;;  %vm2762_vm5 = vmand %vm2758_vm12, %vm2760_vm13  ;;  %vm2757_vm6 = vcmp.ge.s32.totalorder %v5008_v18, 224 }
 0xc8b   :  { %vm2759_vm7 = vcmp.lt.s32.totalorder %v5008_v18, 256  ;;  %vm2421_vm8 = vmand %vm2417_vm14, %vm2419_vm15  ;;  %vm2769_vm9 = vcmask 7168   ;;  %v2282_v19 = vsel %vm2278_vm1, %v2280_v49, 0.0 }
 0xc8c   :  { %vm2591_vm10 = vmand %vm2587_vm3, %vm2589_vm4 }
 0xc8d   :  { %vm2761_vm11 = vmand %vm2757_vm6, %vm2759_vm7 }
 0xcb4   :  { %v2430_v12 = vpop.permute.xlu1 %2429 }
 0xcb5   :  { %v2435_v17 = vsel %vm2421_vm8, %v2430_v12, %v2282_v19 }
 0xcb6   :  { %v2432_v35 = vpop.permute.xlu0 %2431 }
 0xcb7   :  { %v2436_v30 = vsel %vm5147_vm0, %v2432_v35, %v2283_v15 }
 0xcf0   :  { %v2756_v27 = vpop.xlane.xlu0 %2755 }
 0xcf1   :  { %v2764_v8 = vadd.f32 %v2756_v27, %v5100_v45 }
 0xcf3   :  { %v2766_v32 = vsub.f32 0.0, %v2764_v8  ;;  %v2753_v40 = vpop.xlane.xlu1 %2752 }
 0xcf4   :  { %v2763_v33 = vadd.f32 %v2753_v40, %v5087_v56  ;;  %v2602_v50 = vpop.permute.xlu0 %2601 }
 0xcf5   :  { %v2606_v60 = vsel %vm2592_vm2, %v2602_v50, %v2436_v30 }
 0xcf6   :  { %v2765_v3 = vsub.f32 0.0, %v2763_v33  ;;  %v2768_v45 = vsel %vm2762_vm5, %v2766_v32, %v2606_v60 }
 0xcf7   :  { %2771 = vst.msk [vmem:[%s5221_s22 + $0x8] sm:$0xff] %vm2769_vm9, %v2768_v45  ;;  %v2600_v44 = vpop.permute.xlu1 %2599 }
 0xcf8   :  { %v2605_v37 = vsel %vm2591_vm10, %v2600_v44, %v2435_v17 }
 0xcf9   :  { %v2767_v0 = vsel %vm2761_vm11, %v2765_v3, %v2605_v37 }
 0xcfa   :  { %2770 = vst.msk [vmem:[%s5221_s22] sm:$0xff] %vm2769_vm9, %v2767_v0 }
 0xcfb   :  { %3980 = dma.done.wait [#allocation5], 64  }
 0xcfc   :  { %3981 = vsyncadd [#allocation5], 4294967232 }
 0xcfd   :  { %2791 = vsyncpa [#allocation4], 1 }
 0xcfe   :  { %2792 = vsyncpa [#allocation7], 1 }
 0xcff   :  { %2793 = vsyncpa [#allocation10], 1 }
 0xd00   :  { %2794 = vsyncpa [#allocation13], 1 }
 0xd01   :  { %2795 = vsyncpa [#allocation16], 1 }
 0xd02   :  { %2796 = vsyncpa [#allocation19], 1 }
 0xd03   :  { %2797 = vsyncpa [#allocation5], 1 }

</bundles_post_ra>
